<compile_context>
chip_gen: v5e
topology: v5e:2x2
jax: 0.10.0
libtpu: 0.0.40
codegen_flags: <defaults>
</compile_context>

<pallas_src>
import jax
import jax.numpy as jnp
from jax.experimental import pallas as pl
from jax.experimental.pallas import tpu as pltpu


def _vmem_spec():
    return pl.BlockSpec(memory_space=pltpu.MemorySpace.VMEM)


# ---------------------------------------------------------------------------
# Fused kernel: bidirectional GRU recurrence + HAN attention + classifier.
# Gate order follows PyTorch: (r, z, n); weights are passed pre-transposed.
# ---------------------------------------------------------------------------
def _make_kernel(S, Bp, H):
    H2, H3, H6 = 2 * H, 3 * H, 6 * H

    def kernel(x2d_ref, h0_ref, wih_ref, bih_ref,
               whh_f_ref, bhn_f_ref, whh_b_ref, bhn_b_ref,
               sw_ref, sb_ref, cw_ref, fcw_ref, fcb_ref, mask_ref,
               out_ref, hn_ref, gi_buf_ref, f_buf_ref):
        f32 = jnp.float32

        # ---- hoist recurrent weights / n-gate bias out of the loop ----------
        whh_f = whh_f_ref[...]                  # (H, 3H)
        whh_b = whh_b_ref[...]
        bhn_f = bhn_f_ref[...]                  # already (Bp, H) from wrapper
        bhn_b = bhn_b_ref[...]

        # ---- fused fwd+bwd input projection: one (S*Bp, I) x (I, 6H) matmul --
        # (r/z halves of b_hh are pre-folded into bih in the wrapper)
        gi_buf_ref[...] = (jnp.dot(x2d_ref[...], wih_ref[...],
                                   preferred_element_type=f32) + bih_ref[...])

        def cell(gi_t, h, whh_T, bhn):
            # only the recurrent matmul (Bp, H) x (H, 3H) stays serial
            gh = jnp.dot(h, whh_T, preferred_element_type=f32)
            r = jax.nn.sigmoid(gi_t[:, 0:H] + gh[:, 0:H])
            z = jax.nn.sigmoid(gi_t[:, H:H2] + gh[:, H:H2])
            n = jnp.tanh(gi_t[:, H2:H3] + r * (gh[:, H2:H3] + bhn))
            return (1.0 - z) * n + z * h

        # ---- fully-unrolled, interleaved fwd/bwd recurrence -------------------
        # Two independent dependency chains in flight; per-step hidden states go
        # straight into the VMEM scratch f_buf (no Python-list live ranges).
        h_f = h0_ref[0]
        h_b = h0_ref[1]
        for t in range(S):
            tb = S - 1 - t
            gi_f_t = gi_buf_ref[t * Bp:(t + 1) * Bp, 0:H3]
            gi_b_t = gi_buf_ref[tb * Bp:(tb + 1) * Bp, H3:H6]
            h_f = cell(gi_f_t, h_f, whh_f, bhn_f)
            h_b = cell(gi_b_t, h_b, whh_b, bhn_b)
            f_buf_ref[t * Bp:(t + 1) * Bp, 0:H] = h_f
            f_buf_ref[tb * Bp:(tb + 1) * Bp, H:H2] = h_b

        hn_ref[0] = h_f                         # final forward hidden state
        hn_ref[1] = h_b                         # final backward hidden state

        # f_output stays in VMEM; never written to HBM.
        f2d = f_buf_ref[...]                    # (S*Bp, 2H)

        # ---- HAN attention ----------------------------------------------------
        # u = tanh(f @ sent_w + sent_b) -- single 2-D MXU matmul
        u = jnp.tanh(jnp.dot(f2d, sw_ref[...],
                             preferred_element_type=f32) + sb_ref[...])
        u3 = u.reshape(S, Bp, H2)
        # a = tanh(u @ context_w)  (VPU mul + lane reduce)
        a = jnp.tanh(jnp.sum(u3 * cw_ref[...], axis=-1))            # (S, Bp)

        # softmax over the BATCH axis (HAN quirk; matches torch.softmax(.., dim=0)
        # on the permuted (batch, seq) tensor).  Padded batch rows are masked out.
        mask = mask_ref[...]                                         # (1, Bp)
        a = jnp.where(mask > 0.0, a, -1e30)
        m = jnp.max(a, axis=1, keepdims=True)
        e = jnp.exp(a - m) * mask
        denom = jnp.sum(e, axis=1, keepdims=True)
        w = e / denom                                                # (S, Bp)

        # ctx = sum_t f[t] * w[t][:, None]   (element_wise_mul + sum over seq)
        f3 = f2d.reshape(S, Bp, H2)
        ctx = jnp.sum(f3 * w[:, :, None], axis=0)                    # (Bp, 2H)

        # classifier -- output lane-padded to 128 (lane-dense unmasked store)
        out_ref[...] = (jnp.dot(ctx, fcw_ref[...],
                                preferred_element_type=f32) + fcb_ref[...])

    return kernel


# ---------------------------------------------------------------------------
# Wrapper: pad batch to the 8-sublane width, pad the classifier lane dim to
# 128, fold biases, fuse input-projection weights, call the fused kernel,
# slice the padding back off.
# ---------------------------------------------------------------------------
def attention_forward(params, x, h0):
    S, batch, I = x.shape
    H = h0.shape[2]
    num_classes = params['fc_w'].shape[0]
    NCp = 128 * max(1, pl.cdiv(num_classes, 128))    # lane-dense output width

    Bp = max(8, ((batch + 7) // 8) * 8)              # sublane-aligned batch
    pad = Bp - batch
    if pad:
        x = jnp.pad(x, ((0, 0), (0, pad), (0, 0)))
        h0 = jnp.pad(h0, ((0, 0), (0, pad), (0, 0)))
    x2d = x.reshape(S * Bp, I)                       # free reshape in XLA
    mask = (jnp.arange(Bp) < batch).astype(jnp.float32)[None, :]     # (1, Bp)

    # Fold the r/z halves of b_hh into the (hoisted) input-projection bias.
    def fold_bias(bih, bhh):
        return bih + jnp.concatenate([bhh[:2 * H], jnp.zeros((H,), bih.dtype)])

    bih_f = fold_bias(params['bih_f'], params['bhh_f'])
    bih_b = fold_bias(params['bih_b'], params['bhh_b'])
    wih_comb = jnp.concatenate([params['wih_f'].T, params['wih_b'].T], axis=1)   # (I, 6H)
    bih_comb = jnp.concatenate([bih_f, bih_b])[None, :]                          # (1, 6H)

    # n-gate recurrent bias, pre-broadcast once (no per-step broadcast_in_dim).
    bhn_f = jnp.broadcast_to(params['bhh_f'][2 * H:][None, :], (Bp, H))
    bhn_b = jnp.broadcast_to(params['bhh_b'][2 * H:][None, :], (Bp, H))

    # classifier weights, lane-padded to NCp
    fcw_p = jnp.zeros((2 * H, NCp), jnp.float32).at[:, :num_classes].set(params['fc_w'].T)
    fcb_p = jnp.zeros((1, NCp), jnp.float32).at[0, :num_classes].set(params['fc_b'])

    args = (x2d, h0, wih_comb, bih_comb,
            params['whh_f'].T, bhn_f, params['whh_b'].T, bhn_b,
            params['sent_w'], params['sent_b'], params['ctx_w'].T,
            fcw_p, fcb_p, mask)

    out_shapes = (jax.ShapeDtypeStruct((Bp, NCp), jnp.float32),
                  jax.ShapeDtypeStruct((2, Bp, H), jnp.float32))

    logits_p, hn_p = pl.pallas_call(
        _make_kernel(S, Bp, H),
        out_shape=out_shapes,
        in_specs=[_vmem_spec() for _ in args],
        out_specs=tuple(_vmem_spec() for _ in out_shapes),
        scratch_shapes=[pltpu.VMEM((S * Bp, 6 * H), jnp.float32),   # gi (input proj)
                        pltpu.VMEM((S * Bp, 2 * H), jnp.float32)],  # f_output buffer
        compiler_params=pltpu.CompilerParams(
            vmem_limit_bytes=32 * 1024 * 1024),     # explicit; valid on v5e/v6e/v7x
    )(*args)

    return logits_p[:batch, :num_classes], hn_p[:, :batch]


# ---------------------------------------------------------------------------
# Pure-JAX reference (for correctness check)
# ---------------------------------------------------------------------------
def reference_forward(params, x, h0):
    H = h0.shape[2]

    def cell(x_t, h, wih, whh, bih, bhh):
        gi = x_t @ wih.T + bih
        gh = h @ whh.T + bhh
        r = jax.nn.sigmoid(gi[:, :H] + gh[:, :H])
        z = jax.nn.sigmoid(gi[:, H:2 * H] + gh[:, H:2 * H])
        n = jnp.tanh(gi[:, 2 * H:] + r * gh[:, 2 * H:])
        return (1.0 - z) * n + z * h

    def scan_f(h, x_t):
        h = cell(x_t, h, params['wih_f'], params['whh_f'],
                 params['bih_f'], params['bhh_f'])
        return h, h

    def scan_b(h, x_t):
        h = cell(x_t, h, params['wih_b'], params['whh_b'],
                 params['bih_b'], params['bhh_b'])
        return h, h

    h_f, hf_seq = jax.lax.scan(scan_f, h0[0], x)
    h_b, hb_rev = jax.lax.scan(scan_b, h0[1], x[::-1])
    f_output = jnp.concatenate([hf_seq, hb_rev[::-1]], axis=-1)
    h_n = jnp.stack([h_f, h_b], axis=0)

    u = jnp.tanh(jnp.einsum('sbd,de->sbe', f_output, params['sent_w'])
                 + params['sent_b'])
    a = jnp.tanh((u @ params['ctx_w'])[..., 0])        # (seq, batch)
    w = jax.nn.softmax(a, axis=1)                      # softmax over batch
    ctx = jnp.sum(f_output * w[:, :, None], axis=0)
    logits = ctx @ params['fc_w'].T + params['fc_b']
    return logits, h_n


def init_params(key, input_size, hidden_size, num_classes, std=0.05):
    ks = jax.random.split(key, 13)
    H = hidden_size
    p = {
        'wih_f': jax.random.normal(ks[0], (3 * H, input_size)) * std,
        'whh_f': jax.random.normal(ks[1], (3 * H, H)) * std,
        'bih_f': jax.random.normal(ks[2], (3 * H,)) * std,
        'bhh_f': jax.random.normal(ks[3], (3 * H,)) * std,
        'wih_b': jax.random.normal(ks[4], (3 * H, input_size)) * std,
        'whh_b': jax.random.normal(ks[5], (3 * H, H)) * std,
        'bih_b': jax.random.normal(ks[6], (3 * H,)) * std,
        'bhh_b': jax.random.normal(ks[7], (3 * H,)) * std,
        'sent_w': jax.random.normal(ks[8], (2 * H, 2 * H)) * std,
        'sent_b': jax.random.normal(ks[9], (1, 2 * H)) * std,
        'ctx_w': jax.random.normal(ks[10], (2 * H, 1)) * std,
        'fc_w': jax.random.normal(ks[11], (num_classes, 2 * H)) * std,
        'fc_b': jax.random.normal(ks[12], (num_classes,)) * std,
    }
    return jax.tree_util.tree_map(lambda a: a.astype(jnp.float32), p)


if __name__ == "__main__":
    # hidden_size kept at the lane width (128) so every gate slice is tile-aligned
    seq_len, batch, input_size, hidden_size, num_classes = 8, 4, 32, 128, 4

    key = jax.random.PRNGKey(0)
    k_p, k_x, k_h = jax.random.split(key, 3)
    params = init_params(k_p, input_size, hidden_size, num_classes)
    x = jax.random.normal(k_x, (seq_len, batch, input_size), dtype=jnp.float32)
    h0 = jax.random.normal(k_h, (2, batch, hidden_size), dtype=jnp.float32)

    logits, h_n = jax.jit(attention_forward)(params, x, h0)
    jax.block_until_ready((logits, h_n))

    ref_logits, ref_h_n = reference_forward(params, x, h0)
    assert logits.shape == (batch, num_classes)
    assert h_n.shape == (2, batch, hidden_size)
    # all math is exact f32 (exact softmax divide); only matmul accumulation
    # order differs between the MXU and the XLA reference.
    assert jnp.allclose(h_n, ref_h_n, rtol=1e-4, atol=1e-4)
    assert jnp.allclose(logits, ref_logits, rtol=1e-3, atol=1e-3)

    print("KERNEL_OK")
</pallas_src>

<mosaic_0001>
module attributes {stable_mosaic.version = 11 : i64} {
  func.func @kernel(%arg0: memref<64x32xf32, #tpu.memory_space<vmem>>, %arg1: memref<2x8x128xf32, #tpu.memory_space<vmem>>, %arg2: memref<32x768xf32, #tpu.memory_space<vmem>>, %arg3: memref<1x768xf32, #tpu.memory_space<vmem>>, %arg4: memref<128x384xf32, #tpu.memory_space<vmem>>, %arg5: memref<8x128xf32, #tpu.memory_space<vmem>>, %arg6: memref<128x384xf32, #tpu.memory_space<vmem>>, %arg7: memref<8x128xf32, #tpu.memory_space<vmem>>, %arg8: memref<256x256xf32, #tpu.memory_space<vmem>>, %arg9: memref<1x256xf32, #tpu.memory_space<vmem>>, %arg10: memref<1x256xf32, #tpu.memory_space<vmem>>, %arg11: memref<256x128xf32, #tpu.memory_space<vmem>>, %arg12: memref<1x128xf32, #tpu.memory_space<vmem>>, %arg13: memref<1x8xf32, #tpu.memory_space<vmem>>, %arg14: memref<8x128xf32, #tpu.memory_space<vmem>>, %arg15: memref<2x8x128xf32, #tpu.memory_space<vmem>>, %arg16: memref<64x768xf32, #tpu.memory_space<vmem>>, %arg17: memref<64x256xf32, #tpu.memory_space<vmem>>) attributes {dimension_semantics = [], scalar_prefetch = 0 : i64, scratch_operands = 2 : i64, tpu.core_type = #tpu.core_type<tc>} {
    %c0 = arith.constant 0 : index
    %c0_0 = arith.constant 0 : index
    %0 = vector.load %arg4[%c0, %c0_0] : memref<128x384xf32, #tpu.memory_space<vmem>>, vector<128x384xf32>
    %c0_1 = arith.constant 0 : index
    %c0_2 = arith.constant 0 : index
    %1 = vector.load %arg6[%c0_1, %c0_2] : memref<128x384xf32, #tpu.memory_space<vmem>>, vector<128x384xf32>
    %c0_3 = arith.constant 0 : index
    %c0_4 = arith.constant 0 : index
    %2 = vector.load %arg5[%c0_3, %c0_4] : memref<8x128xf32, #tpu.memory_space<vmem>>, vector<8x128xf32>
    %c0_5 = arith.constant 0 : index
    %c0_6 = arith.constant 0 : index
    %3 = vector.load %arg7[%c0_5, %c0_6] : memref<8x128xf32, #tpu.memory_space<vmem>>, vector<8x128xf32>
    %c0_7 = arith.constant 0 : index
    %c0_8 = arith.constant 0 : index
    %4 = vector.load %arg0[%c0_7, %c0_8] : memref<64x32xf32, #tpu.memory_space<vmem>>, vector<64x32xf32>
    %c0_9 = arith.constant 0 : index
    %c0_10 = arith.constant 0 : index
    %5 = vector.load %arg2[%c0_9, %c0_10] : memref<32x768xf32, #tpu.memory_space<vmem>>, vector<32x768xf32>
    %cst = arith.constant dense<0.000000e+00> : vector<64x768xf32>
    %6 = tpu.matmul %4, %5, %cst {dimension_numbers = #tpu.dot_dimension_numbers<[1], [0], [0], [1], [0, 0, 1, 1], [], []>} : vector<64x32xf32>, vector<32x768xf32>, vector<64x768xf32> -> vector<64x768xf32>
    %c0_11 = arith.constant 0 : index
    %c0_12 = arith.constant 0 : index
    %7 = vector.load %arg3[%c0_11, %c0_12] : memref<1x768xf32, #tpu.memory_space<vmem>>, vector<1x768xf32>
    %8 = vector.broadcast %7 : vector<1x768xf32> to vector<64x768xf32>
    %9 = arith.addf %6, %8 : vector<64x768xf32>
    %c0_13 = arith.constant 0 : index
    %c0_14 = arith.constant 0 : index
    %10 = vector.load %arg16[%c0_13, %c0_14] : memref<64x768xf32, #tpu.memory_space<vmem>>, vector<64x768xf32>
    tpu.vector_store %arg16[%c0_13, %c0_14], %9 {strides = array<i32>} : memref<64x768xf32, #tpu.memory_space<vmem>>, vector<64x768xf32>,
    %c0_15 = arith.constant 0 : index
    %c0_16 = arith.constant 0 : index
    %c0_17 = arith.constant 0 : index
    %11 = vector.load %arg1[%c0_15, %c0_16, %c0_17] : memref<2x8x128xf32, #tpu.memory_space<vmem>>, vector<1x8x128xf32>
    %12 = vector.shape_cast %11 : vector<1x8x128xf32> to vector<8x128xf32>
    %c1 = arith.constant 1 : index
    %c0_18 = arith.constant 0 : index
    %c0_19 = arith.constant 0 : index
    %13 = vector.load %arg1[%c1, %c0_18, %c0_19] : memref<2x8x128xf32, #tpu.memory_space<vmem>>, vector<1x8x128xf32>
    %14 = vector.shape_cast %13 : vector<1x8x128xf32> to vector<8x128xf32>
    %c0_20 = arith.constant 0 : index
    %c0_21 = arith.constant 0 : index
    %15 = vector.load %arg16[%c0_20, %c0_21] : memref<64x768xf32, #tpu.memory_space<vmem>>, vector<8x384xf32>
    %c56 = arith.constant 56 : index
    %c384 = arith.constant 384 : index
    %16 = vector.load %arg16[%c56, %c384] : memref<64x768xf32, #tpu.memory_space<vmem>>, vector<8x384xf32>
    %cst_22 = arith.constant dense<0.000000e+00> : vector<8x384xf32>
    %17 = tpu.matmul %12, %0, %cst_22 {dimension_numbers = #tpu.dot_dimension_numbers<[1], [0], [0], [1], [0, 0, 1, 1], [], []>} : vector<8x128xf32>, vector<128x384xf32>, vector<8x384xf32> -> vector<8x384xf32>
    %18 = vector.extract_strided_slice %15 {offsets = [0, 0], sizes = [8, 128], strides = [1, 1]} : vector<8x384xf32> to vector<8x128xf32>
    %19 = vector.extract_strided_slice %17 {offsets = [0, 0], sizes = [8, 128], strides = [1, 1]} : vector<8x384xf32> to vector<8x128xf32>
    %20 = arith.addf %18, %19 : vector<8x128xf32>
    %21 = arith.negf %20 : vector<8x128xf32>
    %22 = math.exp %21 : vector<8x128xf32>
    %cst_23 = arith.constant 1.000000e+00 : f32
    %23 = vector.broadcast %cst_23 : f32 to vector<8x128xf32>
    %24 = arith.addf %23, %22 : vector<8x128xf32>
    %25 = arith.divf %23, %24 : vector<8x128xf32>
    %26 = vector.extract_strided_slice %15 {offsets = [0, 128], sizes = [8, 128], strides = [1, 1]} : vector<8x384xf32> to vector<8x128xf32>
    %27 = vector.extract_strided_slice %17 {offsets = [0, 128], sizes = [8, 128], strides = [1, 1]} : vector<8x384xf32> to vector<8x128xf32>
    %28 = arith.addf %26, %27 : vector<8x128xf32>
    %29 = arith.negf %28 : vector<8x128xf32>
    %30 = math.exp %29 : vector<8x128xf32>
    %cst_24 = arith.constant 1.000000e+00 : f32
    %31 = vector.broadcast %cst_24 : f32 to vector<8x128xf32>
    %32 = arith.addf %31, %30 : vector<8x128xf32>
    %33 = arith.divf %31, %32 : vector<8x128xf32>
    %34 = vector.extract_strided_slice %15 {offsets = [0, 256], sizes = [8, 128], strides = [1, 1]} : vector<8x384xf32> to vector<8x128xf32>
    %35 = vector.extract_strided_slice %17 {offsets = [0, 256], sizes = [8, 128], strides = [1, 1]} : vector<8x384xf32> to vector<8x128xf32>
    %36 = arith.addf %35, %2 : vector<8x128xf32>
    %37 = arith.mulf %25, %36 : vector<8x128xf32>
    %38 = arith.addf %34, %37 : vector<8x128xf32>
    %39 = math.tanh %38 : vector<8x128xf32>
    %cst_25 = arith.constant 1.000000e+00 : f32
    %40 = vector.broadcast %cst_25 : f32 to vector<8x128xf32>
    %41 = arith.subf %40, %33 : vector<8x128xf32>
    %42 = arith.mulf %41, %39 : vector<8x128xf32>
    %43 = arith.mulf %33, %12 : vector<8x128xf32>
    %44 = arith.addf %42, %43 : vector<8x128xf32>
    %cst_26 = arith.constant dense<0.000000e+00> : vector<8x384xf32>
    %45 = tpu.matmul %14, %1, %cst_26 {dimension_numbers = #tpu.dot_dimension_numbers<[1], [0], [0], [1], [0, 0, 1, 1], [], []>} : vector<8x128xf32>, vector<128x384xf32>, vector<8x384xf32> -> vector<8x384xf32>
    %46 = vector.extract_strided_slice %16 {offsets = [0, 0], sizes = [8, 128], strides = [1, 1]} : vector<8x384xf32> to vector<8x128xf32>
    %47 = vector.extract_strided_slice %45 {offsets = [0, 0], sizes = [8, 128], strides = [1, 1]} : vector<8x384xf32> to vector<8x128xf32>
    %48 = arith.addf %46, %47 : vector<8x128xf32>
    %49 = arith.negf %48 : vector<8x128xf32>
    %50 = math.exp %49 : vector<8x128xf32>
    %cst_27 = arith.constant 1.000000e+00 : f32
    %51 = vector.broadcast %cst_27 : f32 to vector<8x128xf32>
    %52 = arith.addf %51, %50 : vector<8x128xf32>
    %53 = arith.divf %51, %52 : vector<8x128xf32>
    %54 = vector.extract_strided_slice %16 {offsets = [0, 128], sizes = [8, 128], strides = [1, 1]} : vector<8x384xf32> to vector<8x128xf32>
    %55 = vector.extract_strided_slice %45 {offsets = [0, 128], sizes = [8, 128], strides = [1, 1]} : vector<8x384xf32> to vector<8x128xf32>
    %56 = arith.addf %54, %55 : vector<8x128xf32>
    %57 = arith.negf %56 : vector<8x128xf32>
    %58 = math.exp %57 : vector<8x128xf32>
    %cst_28 = arith.constant 1.000000e+00 : f32
    %59 = vector.broadcast %cst_28 : f32 to vector<8x128xf32>
    %60 = arith.addf %59, %58 : vector<8x128xf32>
    %61 = arith.divf %59, %60 : vector<8x128xf32>
    %62 = vector.extract_strided_slice %16 {offsets = [0, 256], sizes = [8, 128], strides = [1, 1]} : vector<8x384xf32> to vector<8x128xf32>
    %63 = vector.extract_strided_slice %45 {offsets = [0, 256], sizes = [8, 128], strides = [1, 1]} : vector<8x384xf32> to vector<8x128xf32>
    %64 = arith.addf %63, %3 : vector<8x128xf32>
    %65 = arith.mulf %53, %64 : vector<8x128xf32>
    %66 = arith.addf %62, %65 : vector<8x128xf32>
    %67 = math.tanh %66 : vector<8x128xf32>
    %cst_29 = arith.constant 1.000000e+00 : f32
    %68 = vector.broadcast %cst_29 : f32 to vector<8x128xf32>
    %69 = arith.subf %68, %61 : vector<8x128xf32>
    %70 = arith.mulf %69, %67 : vector<8x128xf32>
    %71 = arith.mulf %61, %14 : vector<8x128xf32>
    %72 = arith.addf %70, %71 : vector<8x128xf32>
    %c0_30 = arith.constant 0 : index
    %c0_31 = arith.constant 0 : index
    %73 = vector.load %arg17[%c0_30, %c0_31] : memref<64x256xf32, #tpu.memory_space<vmem>>, vector<8x128xf32>
    tpu.vector_store %arg17[%c0_30, %c0_31], %44 {strides = array<i32>} : memref<64x256xf32, #tpu.memory_space<vmem>>, vector<8x128xf32>,
    %c56_32 = arith.constant 56 : index
    %c128 = arith.constant 128 : index
    %74 = vector.load %arg17[%c56_32, %c128] : memref<64x256xf32, #tpu.memory_space<vmem>>, vector<8x128xf32>
    tpu.vector_store %arg17[%c56_32, %c128], %72 {strides = array<i32>} : memref<64x256xf32, #tpu.memory_space<vmem>>, vector<8x128xf32>,
    %c8 = arith.constant 8 : index
    %c0_33 = arith.constant 0 : index
    %75 = vector.load %arg16[%c8, %c0_33] : memref<64x768xf32, #tpu.memory_space<vmem>>, vector<8x384xf32>
    %c48 = arith.constant 48 : index
    %c384_34 = arith.constant 384 : index
    %76 = vector.load %arg16[%c48, %c384_34] : memref<64x768xf32, #tpu.memory_space<vmem>>, vector<8x384xf32>
    %cst_35 = arith.constant dense<0.000000e+00> : vector<8x384xf32>
    %77 = tpu.matmul %44, %0, %cst_35 {dimension_numbers = #tpu.dot_dimension_numbers<[1], [0], [0], [1], [0, 0, 1, 1], [], []>} : vector<8x128xf32>, vector<128x384xf32>, vector<8x384xf32> -> vector<8x384xf32>
    %78 = vector.extract_strided_slice %75 {offsets = [0, 0], sizes = [8, 128], strides = [1, 1]} : vector<8x384xf32> to vector<8x128xf32>
    %79 = vector.extract_strided_slice %77 {offsets = [0, 0], sizes = [8, 128], strides = [1, 1]} : vector<8x384xf32> to vector<8x128xf32>
    %80 = arith.addf %78, %79 : vector<8x128xf32>
    %81 = arith.negf %80 : vector<8x128xf32>
    %82 = math.exp %81 : vector<8x128xf32>
    %cst_36 = arith.constant 1.000000e+00 : f32
    %83 = vector.broadcast %cst_36 : f32 to vector<8x128xf32>
    %84 = arith.addf %83, %82 : vector<8x128xf32>
    %85 = arith.divf %83, %84 : vector<8x128xf32>
    %86 = vector.extract_strided_slice %75 {offsets = [0, 128], sizes = [8, 128], strides = [1, 1]} : vector<8x384xf32> to vector<8x128xf32>
    %87 = vector.extract_strided_slice %77 {offsets = [0, 128], sizes = [8, 128], strides = [1, 1]} : vector<8x384xf32> to vector<8x128xf32>
    %88 = arith.addf %86, %87 : vector<8x128xf32>
    %89 = arith.negf %88 : vector<8x128xf32>
    %90 = math.exp %89 : vector<8x128xf32>
    %cst_37 = arith.constant 1.000000e+00 : f32
    %91 = vector.broadcast %cst_37 : f32 to vector<8x128xf32>
    %92 = arith.addf %91, %90 : vector<8x128xf32>
    %93 = arith.divf %91, %92 : vector<8x128xf32>
    %94 = vector.extract_strided_slice %75 {offsets = [0, 256], sizes = [8, 128], strides = [1, 1]} : vector<8x384xf32> to vector<8x128xf32>
    %95 = vector.extract_strided_slice %77 {offsets = [0, 256], sizes = [8, 128], strides = [1, 1]} : vector<8x384xf32> to vector<8x128xf32>
    %96 = arith.addf %95, %2 : vector<8x128xf32>
    %97 = arith.mulf %85, %96 : vector<8x128xf32>
    %98 = arith.addf %94, %97 : vector<8x128xf32>
    %99 = math.tanh %98 : vector<8x128xf32>
    %cst_38 = arith.constant 1.000000e+00 : f32
    %100 = vector.broadcast %cst_38 : f32 to vector<8x128xf32>
    %101 = arith.subf %100, %93 : vector<8x128xf32>
    %102 = arith.mulf %101, %99 : vector<8x128xf32>
    %103 = arith.mulf %93, %44 : vector<8x128xf32>
    %104 = arith.addf %102, %103 : vector<8x128xf32>
    %cst_39 = arith.constant dense<0.000000e+00> : vector<8x384xf32>
    %105 = tpu.matmul %72, %1, %cst_39 {dimension_numbers = #tpu.dot_dimension_numbers<[1], [0], [0], [1], [0, 0, 1, 1], [], []>} : vector<8x128xf32>, vector<128x384xf32>, vector<8x384xf32> -> vector<8x384xf32>
    %106 = vector.extract_strided_slice %76 {offsets = [0, 0], sizes = [8, 128], strides = [1, 1]} : vector<8x384xf32> to vector<8x128xf32>
    %107 = vector.extract_strided_slice %105 {offsets = [0, 0], sizes = [8, 128], strides = [1, 1]} : vector<8x384xf32> to vector<8x128xf32>
    %108 = arith.addf %106, %107 : vector<8x128xf32>
    %109 = arith.negf %108 : vector<8x128xf32>
    %110 = math.exp %109 : vector<8x128xf32>
    %cst_40 = arith.constant 1.000000e+00 : f32
    %111 = vector.broadcast %cst_40 : f32 to vector<8x128xf32>
    %112 = arith.addf %111, %110 : vector<8x128xf32>
    %113 = arith.divf %111, %112 : vector<8x128xf32>
    %114 = vector.extract_strided_slice %76 {offsets = [0, 128], sizes = [8, 128], strides = [1, 1]} : vector<8x384xf32> to vector<8x128xf32>
    %115 = vector.extract_strided_slice %105 {offsets = [0, 128], sizes = [8, 128], strides = [1, 1]} : vector<8x384xf32> to vector<8x128xf32>
    %116 = arith.addf %114, %115 : vector<8x128xf32>
    %117 = arith.negf %116 : vector<8x128xf32>
    %118 = math.exp %117 : vector<8x128xf32>
    %cst_41 = arith.constant 1.000000e+00 : f32
    %119 = vector.broadcast %cst_41 : f32 to vector<8x128xf32>
    %120 = arith.addf %119, %118 : vector<8x128xf32>
    %121 = arith.divf %119, %120 : vector<8x128xf32>
    %122 = vector.extract_strided_slice %76 {offsets = [0, 256], sizes = [8, 128], strides = [1, 1]} : vector<8x384xf32> to vector<8x128xf32>
    %123 = vector.extract_strided_slice %105 {offsets = [0, 256], sizes = [8, 128], strides = [1, 1]} : vector<8x384xf32> to vector<8x128xf32>
    %124 = arith.addf %123, %3 : vector<8x128xf32>
    %125 = arith.mulf %113, %124 : vector<8x128xf32>
    %126 = arith.addf %122, %125 : vector<8x128xf32>
    %127 = math.tanh %126 : vector<8x128xf32>
    %cst_42 = arith.constant 1.000000e+00 : f32
    %128 = vector.broadcast %cst_42 : f32 to vector<8x128xf32>
    %129 = arith.subf %128, %121 : vector<8x128xf32>
    %130 = arith.mulf %129, %127 : vector<8x128xf32>
    %131 = arith.mulf %121, %72 : vector<8x128xf32>
    %132 = arith.addf %130, %131 : vector<8x128xf32>
    %c8_43 = arith.constant 8 : index
    %c0_44 = arith.constant 0 : index
    %133 = vector.load %arg17[%c8_43, %c0_44] : memref<64x256xf32, #tpu.memory_space<vmem>>, vector<8x128xf32>
    tpu.vector_store %arg17[%c8_43, %c0_44], %104 {strides = array<i32>} : memref<64x256xf32, #tpu.memory_space<vmem>>, vector<8x128xf32>,
    %c48_45 = arith.constant 48 : index
    %c128_46 = arith.constant 128 : index
    %134 = vector.load %arg17[%c48_45, %c128_46] : memref<64x256xf32, #tpu.memory_space<vmem>>, vector<8x128xf32>
    tpu.vector_store %arg17[%c48_45, %c128_46], %132 {strides = array<i32>} : memref<64x256xf32, #tpu.memory_space<vmem>>, vector<8x128xf32>,
    %c16 = arith.constant 16 : index
    %c0_47 = arith.constant 0 : index
    %135 = vector.load %arg16[%c16, %c0_47] : memref<64x768xf32, #tpu.memory_space<vmem>>, vector<8x384xf32>
    %c40 = arith.constant 40 : index
    %c384_48 = arith.constant 384 : index
    %136 = vector.load %arg16[%c40, %c384_48] : memref<64x768xf32, #tpu.memory_space<vmem>>, vector<8x384xf32>
    %cst_49 = arith.constant dense<0.000000e+00> : vector<8x384xf32>
    %137 = tpu.matmul %104, %0, %cst_49 {dimension_numbers = #tpu.dot_dimension_numbers<[1], [0], [0], [1], [0, 0, 1, 1], [], []>} : vector<8x128xf32>, vector<128x384xf32>, vector<8x384xf32> -> vector<8x384xf32>
    %138 = vector.extract_strided_slice %135 {offsets = [0, 0], sizes = [8, 128], strides = [1, 1]} : vector<8x384xf32> to vector<8x128xf32>
    %139 = vector.extract_strided_slice %137 {offsets = [0, 0], sizes = [8, 128], strides = [1, 1]} : vector<8x384xf32> to vector<8x128xf32>
    %140 = arith.addf %138, %139 : vector<8x128xf32>
    %141 = arith.negf %140 : vector<8x128xf32>
    %142 = math.exp %141 : vector<8x128xf32>
    %cst_50 = arith.constant 1.000000e+00 : f32
    %143 = vector.broadcast %cst_50 : f32 to vector<8x128xf32>
    %144 = arith.addf %143, %142 : vector<8x128xf32>
    %145 = arith.divf %143, %144 : vector<8x128xf32>
    %146 = vector.extract_strided_slice %135 {offsets = [0, 128], sizes = [8, 128], strides = [1, 1]} : vector<8x384xf32> to vector<8x128xf32>
    %147 = vector.extract_strided_slice %137 {offsets = [0, 128], sizes = [8, 128], strides = [1, 1]} : vector<8x384xf32> to vector<8x128xf32>
    %148 = arith.addf %146, %147 : vector<8x128xf32>
    %149 = arith.negf %148 : vector<8x128xf32>
    %150 = math.exp %149 : vector<8x128xf32>
    %cst_51 = arith.constant 1.000000e+00 : f32
    %151 = vector.broadcast %cst_51 : f32 to vector<8x128xf32>
    %152 = arith.addf %151, %150 : vector<8x128xf32>
    %153 = arith.divf %151, %152 : vector<8x128xf32>
    %154 = vector.extract_strided_slice %135 {offsets = [0, 256], sizes = [8, 128], strides = [1, 1]} : vector<8x384xf32> to vector<8x128xf32>
    %155 = vector.extract_strided_slice %137 {offsets = [0, 256], sizes = [8, 128], strides = [1, 1]} : vector<8x384xf32> to vector<8x128xf32>
    %156 = arith.addf %155, %2 : vector<8x128xf32>
    %157 = arith.mulf %145, %156 : vector<8x128xf32>
    %158 = arith.addf %154, %157 : vector<8x128xf32>
    %159 = math.tanh %158 : vector<8x128xf32>
    %cst_52 = arith.constant 1.000000e+00 : f32
    %160 = vector.broadcast %cst_52 : f32 to vector<8x128xf32>
    %161 = arith.subf %160, %153 : vector<8x128xf32>
    %162 = arith.mulf %161, %159 : vector<8x128xf32>
    %163 = arith.mulf %153, %104 : vector<8x128xf32>
    %164 = arith.addf %162, %163 : vector<8x128xf32>
    %cst_53 = arith.constant dense<0.000000e+00> : vector<8x384xf32>
    %165 = tpu.matmul %132, %1, %cst_53 {dimension_numbers = #tpu.dot_dimension_numbers<[1], [0], [0], [1], [0, 0, 1, 1], [], []>} : vector<8x128xf32>, vector<128x384xf32>, vector<8x384xf32> -> vector<8x384xf32>
    %166 = vector.extract_strided_slice %136 {offsets = [0, 0], sizes = [8, 128], strides = [1, 1]} : vector<8x384xf32> to vector<8x128xf32>
    %167 = vector.extract_strided_slice %165 {offsets = [0, 0], sizes = [8, 128], strides = [1, 1]} : vector<8x384xf32> to vector<8x128xf32>
    %168 = arith.addf %166, %167 : vector<8x128xf32>
    %169 = arith.negf %168 : vector<8x128xf32>
    %170 = math.exp %169 : vector<8x128xf32>
    %cst_54 = arith.constant 1.000000e+00 : f32
    %171 = vector.broadcast %cst_54 : f32 to vector<8x128xf32>
    %172 = arith.addf %171, %170 : vector<8x128xf32>
    %173 = arith.divf %171, %172 : vector<8x128xf32>
    %174 = vector.extract_strided_slice %136 {offsets = [0, 128], sizes = [8, 128], strides = [1, 1]} : vector<8x384xf32> to vector<8x128xf32>
    %175 = vector.extract_strided_slice %165 {offsets = [0, 128], sizes = [8, 128], strides = [1, 1]} : vector<8x384xf32> to vector<8x128xf32>
    %176 = arith.addf %174, %175 : vector<8x128xf32>
    %177 = arith.negf %176 : vector<8x128xf32>
    %178 = math.exp %177 : vector<8x128xf32>
    %cst_55 = arith.constant 1.000000e+00 : f32
    %179 = vector.broadcast %cst_55 : f32 to vector<8x128xf32>
    %180 = arith.addf %179, %178 : vector<8x128xf32>
    %181 = arith.divf %179, %180 : vector<8x128xf32>
    %182 = vector.extract_strided_slice %136 {offsets = [0, 256], sizes = [8, 128], strides = [1, 1]} : vector<8x384xf32> to vector<8x128xf32>
    %183 = vector.extract_strided_slice %165 {offsets = [0, 256], sizes = [8, 128], strides = [1, 1]} : vector<8x384xf32> to vector<8x128xf32>
    %184 = arith.addf %183, %3 : vector<8x128xf32>
    %185 = arith.mulf %173, %184 : vector<8x128xf32>
    %186 = arith.addf %182, %185 : vector<8x128xf32>
    %187 = math.tanh %186 : vector<8x128xf32>
    %cst_56 = arith.constant 1.000000e+00 : f32
    %188 = vector.broadcast %cst_56 : f32 to vector<8x128xf32>
    %189 = arith.subf %188, %181 : vector<8x128xf32>
    %190 = arith.mulf %189, %187 : vector<8x128xf32>
    %191 = arith.mulf %181, %132 : vector<8x128xf32>
    %192 = arith.addf %190, %191 : vector<8x128xf32>
    %c16_57 = arith.constant 16 : index
    %c0_58 = arith.constant 0 : index
    %193 = vector.load %arg17[%c16_57, %c0_58] : memref<64x256xf32, #tpu.memory_space<vmem>>, vector<8x128xf32>
    tpu.vector_store %arg17[%c16_57, %c0_58], %164 {strides = array<i32>} : memref<64x256xf32, #tpu.memory_space<vmem>>, vector<8x128xf32>,
    %c40_59 = arith.constant 40 : index
    %c128_60 = arith.constant 128 : index
    %194 = vector.load %arg17[%c40_59, %c128_60] : memref<64x256xf32, #tpu.memory_space<vmem>>, vector<8x128xf32>
    tpu.vector_store %arg17[%c40_59, %c128_60], %192 {strides = array<i32>} : memref<64x256xf32, #tpu.memory_space<vmem>>, vector<8x128xf32>,
    %c24 = arith.constant 24 : index
    %c0_61 = arith.constant 0 : index
    %195 = vector.load %arg16[%c24, %c0_61] : memref<64x768xf32, #tpu.memory_space<vmem>>, vector<8x384xf32>
    %c32 = arith.constant 32 : index
    %c384_62 = arith.constant 384 : index
    %196 = vector.load %arg16[%c32, %c384_62] : memref<64x768xf32, #tpu.memory_space<vmem>>, vector<8x384xf32>
    %cst_63 = arith.constant dense<0.000000e+00> : vector<8x384xf32>
    %197 = tpu.matmul %164, %0, %cst_63 {dimension_numbers = #tpu.dot_dimension_numbers<[1], [0], [0], [1], [0, 0, 1, 1], [], []>} : vector<8x128xf32>, vector<128x384xf32>, vector<8x384xf32> -> vector<8x384xf32>
    %198 = vector.extract_strided_slice %195 {offsets = [0, 0], sizes = [8, 128], strides = [1, 1]} : vector<8x384xf32> to vector<8x128xf32>
    %199 = vector.extract_strided_slice %197 {offsets = [0, 0], sizes = [8, 128], strides = [1, 1]} : vector<8x384xf32> to vector<8x128xf32>
    %200 = arith.addf %198, %199 : vector<8x128xf32>
    %201 = arith.negf %200 : vector<8x128xf32>
    %202 = math.exp %201 : vector<8x128xf32>
    %cst_64 = arith.constant 1.000000e+00 : f32
    %203 = vector.broadcast %cst_64 : f32 to vector<8x128xf32>
    %204 = arith.addf %203, %202 : vector<8x128xf32>
    %205 = arith.divf %203, %204 : vector<8x128xf32>
    %206 = vector.extract_strided_slice %195 {offsets = [0, 128], sizes = [8, 128], strides = [1, 1]} : vector<8x384xf32> to vector<8x128xf32>
    %207 = vector.extract_strided_slice %197 {offsets = [0, 128], sizes = [8, 128], strides = [1, 1]} : vector<8x384xf32> to vector<8x128xf32>
    %208 = arith.addf %206, %207 : vector<8x128xf32>
    %209 = arith.negf %208 : vector<8x128xf32>
    %210 = math.exp %209 : vector<8x128xf32>
    %cst_65 = arith.constant 1.000000e+00 : f32
    %211 = vector.broadcast %cst_65 : f32 to vector<8x128xf32>
    %212 = arith.addf %211, %210 : vector<8x128xf32>
    %213 = arith.divf %211, %212 : vector<8x128xf32>
    %214 = vector.extract_strided_slice %195 {offsets = [0, 256], sizes = [8, 128], strides = [1, 1]} : vector<8x384xf32> to vector<8x128xf32>
    %215 = vector.extract_strided_slice %197 {offsets = [0, 256], sizes = [8, 128], strides = [1, 1]} : vector<8x384xf32> to vector<8x128xf32>
    %216 = arith.addf %215, %2 : vector<8x128xf32>
    %217 = arith.mulf %205, %216 : vector<8x128xf32>
    %218 = arith.addf %214, %217 : vector<8x128xf32>
    %219 = math.tanh %218 : vector<8x128xf32>
    %cst_66 = arith.constant 1.000000e+00 : f32
    %220 = vector.broadcast %cst_66 : f32 to vector<8x128xf32>
    %221 = arith.subf %220, %213 : vector<8x128xf32>
    %222 = arith.mulf %221, %219 : vector<8x128xf32>
    %223 = arith.mulf %213, %164 : vector<8x128xf32>
    %224 = arith.addf %222, %223 : vector<8x128xf32>
    %cst_67 = arith.constant dense<0.000000e+00> : vector<8x384xf32>
    %225 = tpu.matmul %192, %1, %cst_67 {dimension_numbers = #tpu.dot_dimension_numbers<[1], [0], [0], [1], [0, 0, 1, 1], [], []>} : vector<8x128xf32>, vector<128x384xf32>, vector<8x384xf32> -> vector<8x384xf32>
    %226 = vector.extract_strided_slice %196 {offsets = [0, 0], sizes = [8, 128], strides = [1, 1]} : vector<8x384xf32> to vector<8x128xf32>
    %227 = vector.extract_strided_slice %225 {offsets = [0, 0], sizes = [8, 128], strides = [1, 1]} : vector<8x384xf32> to vector<8x128xf32>
    %228 = arith.addf %226, %227 : vector<8x128xf32>
    %229 = arith.negf %228 : vector<8x128xf32>
    %230 = math.exp %229 : vector<8x128xf32>
    %cst_68 = arith.constant 1.000000e+00 : f32
    %231 = vector.broadcast %cst_68 : f32 to vector<8x128xf32>
    %232 = arith.addf %231, %230 : vector<8x128xf32>
    %233 = arith.divf %231, %232 : vector<8x128xf32>
    %234 = vector.extract_strided_slice %196 {offsets = [0, 128], sizes = [8, 128], strides = [1, 1]} : vector<8x384xf32> to vector<8x128xf32>
    %235 = vector.extract_strided_slice %225 {offsets = [0, 128], sizes = [8, 128], strides = [1, 1]} : vector<8x384xf32> to vector<8x128xf32>
    %236 = arith.addf %234, %235 : vector<8x128xf32>
    %237 = arith.negf %236 : vector<8x128xf32>
    %238 = math.exp %237 : vector<8x128xf32>
    %cst_69 = arith.constant 1.000000e+00 : f32
    %239 = vector.broadcast %cst_69 : f32 to vector<8x128xf32>
    %240 = arith.addf %239, %238 : vector<8x128xf32>
    %241 = arith.divf %239, %240 : vector<8x128xf32>
    %242 = vector.extract_strided_slice %196 {offsets = [0, 256], sizes = [8, 128], strides = [1, 1]} : vector<8x384xf32> to vector<8x128xf32>
    %243 = vector.extract_strided_slice %225 {offsets = [0, 256], sizes = [8, 128], strides = [1, 1]} : vector<8x384xf32> to vector<8x128xf32>
    %244 = arith.addf %243, %3 : vector<8x128xf32>
    %245 = arith.mulf %233, %244 : vector<8x128xf32>
    %246 = arith.addf %242, %245 : vector<8x128xf32>
    %247 = math.tanh %246 : vector<8x128xf32>
    %cst_70 = arith.constant 1.000000e+00 : f32
    %248 = vector.broadcast %cst_70 : f32 to vector<8x128xf32>
    %249 = arith.subf %248, %241 : vector<8x128xf32>
    %250 = arith.mulf %249, %247 : vector<8x128xf32>
    %251 = arith.mulf %241, %192 : vector<8x128xf32>
    %252 = arith.addf %250, %251 : vector<8x128xf32>
    %c24_71 = arith.constant 24 : index
    %c0_72 = arith.constant 0 : index
    %253 = vector.load %arg17[%c24_71, %c0_72] : memref<64x256xf32, #tpu.memory_space<vmem>>, vector<8x128xf32>
    tpu.vector_store %arg17[%c24_71, %c0_72], %224 {strides = array<i32>} : memref<64x256xf32, #tpu.memory_space<vmem>>, vector<8x128xf32>,
    %c32_73 = arith.constant 32 : index
    %c128_74 = arith.constant 128 : index
    %254 = vector.load %arg17[%c32_73, %c128_74] : memref<64x256xf32, #tpu.memory_space<vmem>>, vector<8x128xf32>
    tpu.vector_store %arg17[%c32_73, %c128_74], %252 {strides = array<i32>} : memref<64x256xf32, #tpu.memory_space<vmem>>, vector<8x128xf32>,
    %c32_75 = arith.constant 32 : index
    %c0_76 = arith.constant 0 : index
    %255 = vector.load %arg16[%c32_75, %c0_76] : memref<64x768xf32, #tpu.memory_space<vmem>>, vector<8x384xf32>
    %c24_77 = arith.constant 24 : index
    %c384_78 = arith.constant 384 : index
    %256 = vector.load %arg16[%c24_77, %c384_78] : memref<64x768xf32, #tpu.memory_space<vmem>>, vector<8x384xf32>
    %cst_79 = arith.constant dense<0.000000e+00> : vector<8x384xf32>
    %257 = tpu.matmul %224, %0, %cst_79 {dimension_numbers = #tpu.dot_dimension_numbers<[1], [0], [0], [1], [0, 0, 1, 1], [], []>} : vector<8x128xf32>, vector<128x384xf32>, vector<8x384xf32> -> vector<8x384xf32>
    %258 = vector.extract_strided_slice %255 {offsets = [0, 0], sizes = [8, 128], strides = [1, 1]} : vector<8x384xf32> to vector<8x128xf32>
    %259 = vector.extract_strided_slice %257 {offsets = [0, 0], sizes = [8, 128], strides = [1, 1]} : vector<8x384xf32> to vector<8x128xf32>
    %260 = arith.addf %258, %259 : vector<8x128xf32>
    %261 = arith.negf %260 : vector<8x128xf32>
    %262 = math.exp %261 : vector<8x128xf32>
    %cst_80 = arith.constant 1.000000e+00 : f32
    %263 = vector.broadcast %cst_80 : f32 to vector<8x128xf32>
    %264 = arith.addf %263, %262 : vector<8x128xf32>
    %265 = arith.divf %263, %264 : vector<8x128xf32>
    %266 = vector.extract_strided_slice %255 {offsets = [0, 128], sizes = [8, 128], strides = [1, 1]} : vector<8x384xf32> to vector<8x128xf32>
    %267 = vector.extract_strided_slice %257 {offsets = [0, 128], sizes = [8, 128], strides = [1, 1]} : vector<8x384xf32> to vector<8x128xf32>
    %268 = arith.addf %266, %267 : vector<8x128xf32>
    %269 = arith.negf %268 : vector<8x128xf32>
    %270 = math.exp %269 : vector<8x128xf32>
    %cst_81 = arith.constant 1.000000e+00 : f32
    %271 = vector.broadcast %cst_81 : f32 to vector<8x128xf32>
    %272 = arith.addf %271, %270 : vector<8x128xf32>
    %273 = arith.divf %271, %272 : vector<8x128xf32>
    %274 = vector.extract_strided_slice %255 {offsets = [0, 256], sizes = [8, 128], strides = [1, 1]} : vector<8x384xf32> to vector<8x128xf32>
    %275 = vector.extract_strided_slice %257 {offsets = [0, 256], sizes = [8, 128], strides = [1, 1]} : vector<8x384xf32> to vector<8x128xf32>
    %276 = arith.addf %275, %2 : vector<8x128xf32>
    %277 = arith.mulf %265, %276 : vector<8x128xf32>
    %278 = arith.addf %274, %277 : vector<8x128xf32>
    %279 = math.tanh %278 : vector<8x128xf32>
    %cst_82 = arith.constant 1.000000e+00 : f32
    %280 = vector.broadcast %cst_82 : f32 to vector<8x128xf32>
    %281 = arith.subf %280, %273 : vector<8x128xf32>
    %282 = arith.mulf %281, %279 : vector<8x128xf32>
    %283 = arith.mulf %273, %224 : vector<8x128xf32>
    %284 = arith.addf %282, %283 : vector<8x128xf32>
    %cst_83 = arith.constant dense<0.000000e+00> : vector<8x384xf32>
    %285 = tpu.matmul %252, %1, %cst_83 {dimension_numbers = #tpu.dot_dimension_numbers<[1], [0], [0], [1], [0, 0, 1, 1], [], []>} : vector<8x128xf32>, vector<128x384xf32>, vector<8x384xf32> -> vector<8x384xf32>
    %286 = vector.extract_strided_slice %256 {offsets = [0, 0], sizes = [8, 128], strides = [1, 1]} : vector<8x384xf32> to vector<8x128xf32>
    %287 = vector.extract_strided_slice %285 {offsets = [0, 0], sizes = [8, 128], strides = [1, 1]} : vector<8x384xf32> to vector<8x128xf32>
    %288 = arith.addf %286, %287 : vector<8x128xf32>
    %289 = arith.negf %288 : vector<8x128xf32>
    %290 = math.exp %289 : vector<8x128xf32>
    %cst_84 = arith.constant 1.000000e+00 : f32
    %291 = vector.broadcast %cst_84 : f32 to vector<8x128xf32>
    %292 = arith.addf %291, %290 : vector<8x128xf32>
    %293 = arith.divf %291, %292 : vector<8x128xf32>
    %294 = vector.extract_strided_slice %256 {offsets = [0, 128], sizes = [8, 128], strides = [1, 1]} : vector<8x384xf32> to vector<8x128xf32>
    %295 = vector.extract_strided_slice %285 {offsets = [0, 128], sizes = [8, 128], strides = [1, 1]} : vector<8x384xf32> to vector<8x128xf32>
    %296 = arith.addf %294, %295 : vector<8x128xf32>
    %297 = arith.negf %296 : vector<8x128xf32>
    %298 = math.exp %297 : vector<8x128xf32>
    %cst_85 = arith.constant 1.000000e+00 : f32
    %299 = vector.broadcast %cst_85 : f32 to vector<8x128xf32>
    %300 = arith.addf %299, %298 : vector<8x128xf32>
    %301 = arith.divf %299, %300 : vector<8x128xf32>
    %302 = vector.extract_strided_slice %256 {offsets = [0, 256], sizes = [8, 128], strides = [1, 1]} : vector<8x384xf32> to vector<8x128xf32>
    %303 = vector.extract_strided_slice %285 {offsets = [0, 256], sizes = [8, 128], strides = [1, 1]} : vector<8x384xf32> to vector<8x128xf32>
    %304 = arith.addf %303, %3 : vector<8x128xf32>
    %305 = arith.mulf %293, %304 : vector<8x128xf32>
    %306 = arith.addf %302, %305 : vector<8x128xf32>
    %307 = math.tanh %306 : vector<8x128xf32>
    %cst_86 = arith.constant 1.000000e+00 : f32
    %308 = vector.broadcast %cst_86 : f32 to vector<8x128xf32>
    %309 = arith.subf %308, %301 : vector<8x128xf32>
    %310 = arith.mulf %309, %307 : vector<8x128xf32>
    %311 = arith.mulf %301, %252 : vector<8x128xf32>
    %312 = arith.addf %310, %311 : vector<8x128xf32>
    %c32_87 = arith.constant 32 : index
    %c0_88 = arith.constant 0 : index
    %313 = vector.load %arg17[%c32_87, %c0_88] : memref<64x256xf32, #tpu.memory_space<vmem>>, vector<8x128xf32>
    tpu.vector_store %arg17[%c32_87, %c0_88], %284 {strides = array<i32>} : memref<64x256xf32, #tpu.memory_space<vmem>>, vector<8x128xf32>,
    %c24_89 = arith.constant 24 : index
    %c128_90 = arith.constant 128 : index
    %314 = vector.load %arg17[%c24_89, %c128_90] : memref<64x256xf32, #tpu.memory_space<vmem>>, vector<8x128xf32>
    tpu.vector_store %arg17[%c24_89, %c128_90], %312 {strides = array<i32>} : memref<64x256xf32, #tpu.memory_space<vmem>>, vector<8x128xf32>,
    %c40_91 = arith.constant 40 : index
    %c0_92 = arith.constant 0 : index
    %315 = vector.load %arg16[%c40_91, %c0_92] : memref<64x768xf32, #tpu.memory_space<vmem>>, vector<8x384xf32>
    %c16_93 = arith.constant 16 : index
    %c384_94 = arith.constant 384 : index
    %316 = vector.load %arg16[%c16_93, %c384_94] : memref<64x768xf32, #tpu.memory_space<vmem>>, vector<8x384xf32>
    %cst_95 = arith.constant dense<0.000000e+00> : vector<8x384xf32>
    %317 = tpu.matmul %284, %0, %cst_95 {dimension_numbers = #tpu.dot_dimension_numbers<[1], [0], [0], [1], [0, 0, 1, 1], [], []>} : vector<8x128xf32>, vector<128x384xf32>, vector<8x384xf32> -> vector<8x384xf32>
    %318 = vector.extract_strided_slice %315 {offsets = [0, 0], sizes = [8, 128], strides = [1, 1]} : vector<8x384xf32> to vector<8x128xf32>
    %319 = vector.extract_strided_slice %317 {offsets = [0, 0], sizes = [8, 128], strides = [1, 1]} : vector<8x384xf32> to vector<8x128xf32>
    %320 = arith.addf %318, %319 : vector<8x128xf32>
    %321 = arith.negf %320 : vector<8x128xf32>
    %322 = math.exp %321 : vector<8x128xf32>
    %cst_96 = arith.constant 1.000000e+00 : f32
    %323 = vector.broadcast %cst_96 : f32 to vector<8x128xf32>
    %324 = arith.addf %323, %322 : vector<8x128xf32>
    %325 = arith.divf %323, %324 : vector<8x128xf32>
    %326 = vector.extract_strided_slice %315 {offsets = [0, 128], sizes = [8, 128], strides = [1, 1]} : vector<8x384xf32> to vector<8x128xf32>
    %327 = vector.extract_strided_slice %317 {offsets = [0, 128], sizes = [8, 128], strides = [1, 1]} : vector<8x384xf32> to vector<8x128xf32>
    %328 = arith.addf %326, %327 : vector<8x128xf32>
    %329 = arith.negf %328 : vector<8x128xf32>
    %330 = math.exp %329 : vector<8x128xf32>
    %cst_97 = arith.constant 1.000000e+00 : f32
    %331 = vector.broadcast %cst_97 : f32 to vector<8x128xf32>
    %332 = arith.addf %331, %330 : vector<8x128xf32>
    %333 = arith.divf %331, %332 : vector<8x128xf32>
    %334 = vector.extract_strided_slice %315 {offsets = [0, 256], sizes = [8, 128], strides = [1, 1]} : vector<8x384xf32> to vector<8x128xf32>
    %335 = vector.extract_strided_slice %317 {offsets = [0, 256], sizes = [8, 128], strides = [1, 1]} : vector<8x384xf32> to vector<8x128xf32>
    %336 = arith.addf %335, %2 : vector<8x128xf32>
    %337 = arith.mulf %325, %336 : vector<8x128xf32>
    %338 = arith.addf %334, %337 : vector<8x128xf32>
    %339 = math.tanh %338 : vector<8x128xf32>
    %cst_98 = arith.constant 1.000000e+00 : f32
    %340 = vector.broadcast %cst_98 : f32 to vector<8x128xf32>
    %341 = arith.subf %340, %333 : vector<8x128xf32>
    %342 = arith.mulf %341, %339 : vector<8x128xf32>
    %343 = arith.mulf %333, %284 : vector<8x128xf32>
    %344 = arith.addf %342, %343 : vector<8x128xf32>
    %cst_99 = arith.constant dense<0.000000e+00> : vector<8x384xf32>
    %345 = tpu.matmul %312, %1, %cst_99 {dimension_numbers = #tpu.dot_dimension_numbers<[1], [0], [0], [1], [0, 0, 1, 1], [], []>} : vector<8x128xf32>, vector<128x384xf32>, vector<8x384xf32> -> vector<8x384xf32>
    %346 = vector.extract_strided_slice %316 {offsets = [0, 0], sizes = [8, 128], strides = [1, 1]} : vector<8x384xf32> to vector<8x128xf32>
    %347 = vector.extract_strided_slice %345 {offsets = [0, 0], sizes = [8, 128], strides = [1, 1]} : vector<8x384xf32> to vector<8x128xf32>
    %348 = arith.addf %346, %347 : vector<8x128xf32>
    %349 = arith.negf %348 : vector<8x128xf32>
    %350 = math.exp %349 : vector<8x128xf32>
    %cst_100 = arith.constant 1.000000e+00 : f32
    %351 = vector.broadcast %cst_100 : f32 to vector<8x128xf32>
    %352 = arith.addf %351, %350 : vector<8x128xf32>
    %353 = arith.divf %351, %352 : vector<8x128xf32>
    %354 = vector.extract_strided_slice %316 {offsets = [0, 128], sizes = [8, 128], strides = [1, 1]} : vector<8x384xf32> to vector<8x128xf32>
    %355 = vector.extract_strided_slice %345 {offsets = [0, 128], sizes = [8, 128], strides = [1, 1]} : vector<8x384xf32> to vector<8x128xf32>
    %356 = arith.addf %354, %355 : vector<8x128xf32>
    %357 = arith.negf %356 : vector<8x128xf32>
    %358 = math.exp %357 : vector<8x128xf32>
    %cst_101 = arith.constant 1.000000e+00 : f32
    %359 = vector.broadcast %cst_101 : f32 to vector<8x128xf32>
    %360 = arith.addf %359, %358 : vector<8x128xf32>
    %361 = arith.divf %359, %360 : vector<8x128xf32>
    %362 = vector.extract_strided_slice %316 {offsets = [0, 256], sizes = [8, 128], strides = [1, 1]} : vector<8x384xf32> to vector<8x128xf32>
    %363 = vector.extract_strided_slice %345 {offsets = [0, 256], sizes = [8, 128], strides = [1, 1]} : vector<8x384xf32> to vector<8x128xf32>
    %364 = arith.addf %363, %3 : vector<8x128xf32>
    %365 = arith.mulf %353, %364 : vector<8x128xf32>
    %366 = arith.addf %362, %365 : vector<8x128xf32>
    %367 = math.tanh %366 : vector<8x128xf32>
    %cst_102 = arith.constant 1.000000e+00 : f32
    %368 = vector.broadcast %cst_102 : f32 to vector<8x128xf32>
    %369 = arith.subf %368, %361 : vector<8x128xf32>
    %370 = arith.mulf %369, %367 : vector<8x128xf32>
    %371 = arith.mulf %361, %312 : vector<8x128xf32>
    %372 = arith.addf %370, %371 : vector<8x128xf32>
    %c40_103 = arith.constant 40 : index
    %c0_104 = arith.constant 0 : index
    %373 = vector.load %arg17[%c40_103, %c0_104] : memref<64x256xf32, #tpu.memory_space<vmem>>, vector<8x128xf32>
    tpu.vector_store %arg17[%c40_103, %c0_104], %344 {strides = array<i32>} : memref<64x256xf32, #tpu.memory_space<vmem>>, vector<8x128xf32>,
    %c16_105 = arith.constant 16 : index
    %c128_106 = arith.constant 128 : index
    %374 = vector.load %arg17[%c16_105, %c128_106] : memref<64x256xf32, #tpu.memory_space<vmem>>, vector<8x128xf32>
    tpu.vector_store %arg17[%c16_105, %c128_106], %372 {strides = array<i32>} : memref<64x256xf32, #tpu.memory_space<vmem>>, vector<8x128xf32>,
    %c48_107 = arith.constant 48 : index
    %c0_108 = arith.constant 0 : index
    %375 = vector.load %arg16[%c48_107, %c0_108] : memref<64x768xf32, #tpu.memory_space<vmem>>, vector<8x384xf32>
    %c8_109 = arith.constant 8 : index
    %c384_110 = arith.constant 384 : index
    %376 = vector.load %arg16[%c8_109, %c384_110] : memref<64x768xf32, #tpu.memory_space<vmem>>, vector<8x384xf32>
    %cst_111 = arith.constant dense<0.000000e+00> : vector<8x384xf32>
    %377 = tpu.matmul %344, %0, %cst_111 {dimension_numbers = #tpu.dot_dimension_numbers<[1], [0], [0], [1], [0, 0, 1, 1], [], []>} : vector<8x128xf32>, vector<128x384xf32>, vector<8x384xf32> -> vector<8x384xf32>
    %378 = vector.extract_strided_slice %375 {offsets = [0, 0], sizes = [8, 128], strides = [1, 1]} : vector<8x384xf32> to vector<8x128xf32>
    %379 = vector.extract_strided_slice %377 {offsets = [0, 0], sizes = [8, 128], strides = [1, 1]} : vector<8x384xf32> to vector<8x128xf32>
    %380 = arith.addf %378, %379 : vector<8x128xf32>
    %381 = arith.negf %380 : vector<8x128xf32>
    %382 = math.exp %381 : vector<8x128xf32>
    %cst_112 = arith.constant 1.000000e+00 : f32
    %383 = vector.broadcast %cst_112 : f32 to vector<8x128xf32>
    %384 = arith.addf %383, %382 : vector<8x128xf32>
    %385 = arith.divf %383, %384 : vector<8x128xf32>
    %386 = vector.extract_strided_slice %375 {offsets = [0, 128], sizes = [8, 128], strides = [1, 1]} : vector<8x384xf32> to vector<8x128xf32>
    %387 = vector.extract_strided_slice %377 {offsets = [0, 128], sizes = [8, 128], strides = [1, 1]} : vector<8x384xf32> to vector<8x128xf32>
    %388 = arith.addf %386, %387 : vector<8x128xf32>
    %389 = arith.negf %388 : vector<8x128xf32>
    %390 = math.exp %389 : vector<8x128xf32>
    %cst_113 = arith.constant 1.000000e+00 : f32
    %391 = vector.broadcast %cst_113 : f32 to vector<8x128xf32>
    %392 = arith.addf %391, %390 : vector<8x128xf32>
    %393 = arith.divf %391, %392 : vector<8x128xf32>
    %394 = vector.extract_strided_slice %375 {offsets = [0, 256], sizes = [8, 128], strides = [1, 1]} : vector<8x384xf32> to vector<8x128xf32>
    %395 = vector.extract_strided_slice %377 {offsets = [0, 256], sizes = [8, 128], strides = [1, 1]} : vector<8x384xf32> to vector<8x128xf32>
    %396 = arith.addf %395, %2 : vector<8x128xf32>
    %397 = arith.mulf %385, %396 : vector<8x128xf32>
    %398 = arith.addf %394, %397 : vector<8x128xf32>
    %399 = math.tanh %398 : vector<8x128xf32>
    %cst_114 = arith.constant 1.000000e+00 : f32
    %400 = vector.broadcast %cst_114 : f32 to vector<8x128xf32>
    %401 = arith.subf %400, %393 : vector<8x128xf32>
    %402 = arith.mulf %401, %399 : vector<8x128xf32>
    %403 = arith.mulf %393, %344 : vector<8x128xf32>
    %404 = arith.addf %402, %403 : vector<8x128xf32>
    %cst_115 = arith.constant dense<0.000000e+00> : vector<8x384xf32>
    %405 = tpu.matmul %372, %1, %cst_115 {dimension_numbers = #tpu.dot_dimension_numbers<[1], [0], [0], [1], [0, 0, 1, 1], [], []>} : vector<8x128xf32>, vector<128x384xf32>, vector<8x384xf32> -> vector<8x384xf32>
    %406 = vector.extract_strided_slice %376 {offsets = [0, 0], sizes = [8, 128], strides = [1, 1]} : vector<8x384xf32> to vector<8x128xf32>
    %407 = vector.extract_strided_slice %405 {offsets = [0, 0], sizes = [8, 128], strides = [1, 1]} : vector<8x384xf32> to vector<8x128xf32>
    %408 = arith.addf %406, %407 : vector<8x128xf32>
    %409 = arith.negf %408 : vector<8x128xf32>
    %410 = math.exp %409 : vector<8x128xf32>
    %cst_116 = arith.constant 1.000000e+00 : f32
    %411 = vector.broadcast %cst_116 : f32 to vector<8x128xf32>
    %412 = arith.addf %411, %410 : vector<8x128xf32>
    %413 = arith.divf %411, %412 : vector<8x128xf32>
    %414 = vector.extract_strided_slice %376 {offsets = [0, 128], sizes = [8, 128], strides = [1, 1]} : vector<8x384xf32> to vector<8x128xf32>
    %415 = vector.extract_strided_slice %405 {offsets = [0, 128], sizes = [8, 128], strides = [1, 1]} : vector<8x384xf32> to vector<8x128xf32>
    %416 = arith.addf %414, %415 : vector<8x128xf32>
    %417 = arith.negf %416 : vector<8x128xf32>
    %418 = math.exp %417 : vector<8x128xf32>
    %cst_117 = arith.constant 1.000000e+00 : f32
    %419 = vector.broadcast %cst_117 : f32 to vector<8x128xf32>
    %420 = arith.addf %419, %418 : vector<8x128xf32>
    %421 = arith.divf %419, %420 : vector<8x128xf32>
    %422 = vector.extract_strided_slice %376 {offsets = [0, 256], sizes = [8, 128], strides = [1, 1]} : vector<8x384xf32> to vector<8x128xf32>
    %423 = vector.extract_strided_slice %405 {offsets = [0, 256], sizes = [8, 128], strides = [1, 1]} : vector<8x384xf32> to vector<8x128xf32>
    %424 = arith.addf %423, %3 : vector<8x128xf32>
    %425 = arith.mulf %413, %424 : vector<8x128xf32>
    %426 = arith.addf %422, %425 : vector<8x128xf32>
    %427 = math.tanh %426 : vector<8x128xf32>
    %cst_118 = arith.constant 1.000000e+00 : f32
    %428 = vector.broadcast %cst_118 : f32 to vector<8x128xf32>
    %429 = arith.subf %428, %421 : vector<8x128xf32>
    %430 = arith.mulf %429, %427 : vector<8x128xf32>
    %431 = arith.mulf %421, %372 : vector<8x128xf32>
    %432 = arith.addf %430, %431 : vector<8x128xf32>
    %c48_119 = arith.constant 48 : index
    %c0_120 = arith.constant 0 : index
    %433 = vector.load %arg17[%c48_119, %c0_120] : memref<64x256xf32, #tpu.memory_space<vmem>>, vector<8x128xf32>
    tpu.vector_store %arg17[%c48_119, %c0_120], %404 {strides = array<i32>} : memref<64x256xf32, #tpu.memory_space<vmem>>, vector<8x128xf32>,
    %c8_121 = arith.constant 8 : index
    %c128_122 = arith.constant 128 : index
    %434 = vector.load %arg17[%c8_121, %c128_122] : memref<64x256xf32, #tpu.memory_space<vmem>>, vector<8x128xf32>
    tpu.vector_store %arg17[%c8_121, %c128_122], %432 {strides = array<i32>} : memref<64x256xf32, #tpu.memory_space<vmem>>, vector<8x128xf32>,
    %c56_123 = arith.constant 56 : index
    %c0_124 = arith.constant 0 : index
    %435 = vector.load %arg16[%c56_123, %c0_124] : memref<64x768xf32, #tpu.memory_space<vmem>>, vector<8x384xf32>
    %c0_125 = arith.constant 0 : index
    %c384_126 = arith.constant 384 : index
    %436 = vector.load %arg16[%c0_125, %c384_126] : memref<64x768xf32, #tpu.memory_space<vmem>>, vector<8x384xf32>
    %cst_127 = arith.constant dense<0.000000e+00> : vector<8x384xf32>
    %437 = tpu.matmul %404, %0, %cst_127 {dimension_numbers = #tpu.dot_dimension_numbers<[1], [0], [0], [1], [0, 0, 1, 1], [], []>} : vector<8x128xf32>, vector<128x384xf32>, vector<8x384xf32> -> vector<8x384xf32>
    %438 = vector.extract_strided_slice %435 {offsets = [0, 0], sizes = [8, 128], strides = [1, 1]} : vector<8x384xf32> to vector<8x128xf32>
    %439 = vector.extract_strided_slice %437 {offsets = [0, 0], sizes = [8, 128], strides = [1, 1]} : vector<8x384xf32> to vector<8x128xf32>
    %440 = arith.addf %438, %439 : vector<8x128xf32>
    %441 = arith.negf %440 : vector<8x128xf32>
    %442 = math.exp %441 : vector<8x128xf32>
    %cst_128 = arith.constant 1.000000e+00 : f32
    %443 = vector.broadcast %cst_128 : f32 to vector<8x128xf32>
    %444 = arith.addf %443, %442 : vector<8x128xf32>
    %445 = arith.divf %443, %444 : vector<8x128xf32>
    %446 = vector.extract_strided_slice %435 {offsets = [0, 128], sizes = [8, 128], strides = [1, 1]} : vector<8x384xf32> to vector<8x128xf32>
    %447 = vector.extract_strided_slice %437 {offsets = [0, 128], sizes = [8, 128], strides = [1, 1]} : vector<8x384xf32> to vector<8x128xf32>
    %448 = arith.addf %446, %447 : vector<8x128xf32>
    %449 = arith.negf %448 : vector<8x128xf32>
    %450 = math.exp %449 : vector<8x128xf32>
    %cst_129 = arith.constant 1.000000e+00 : f32
    %451 = vector.broadcast %cst_129 : f32 to vector<8x128xf32>
    %452 = arith.addf %451, %450 : vector<8x128xf32>
    %453 = arith.divf %451, %452 : vector<8x128xf32>
    %454 = vector.extract_strided_slice %435 {offsets = [0, 256], sizes = [8, 128], strides = [1, 1]} : vector<8x384xf32> to vector<8x128xf32>
    %455 = vector.extract_strided_slice %437 {offsets = [0, 256], sizes = [8, 128], strides = [1, 1]} : vector<8x384xf32> to vector<8x128xf32>
    %456 = arith.addf %455, %2 : vector<8x128xf32>
    %457 = arith.mulf %445, %456 : vector<8x128xf32>
    %458 = arith.addf %454, %457 : vector<8x128xf32>
    %459 = math.tanh %458 : vector<8x128xf32>
    %cst_130 = arith.constant 1.000000e+00 : f32
    %460 = vector.broadcast %cst_130 : f32 to vector<8x128xf32>
    %461 = arith.subf %460, %453 : vector<8x128xf32>
    %462 = arith.mulf %461, %459 : vector<8x128xf32>
    %463 = arith.mulf %453, %404 : vector<8x128xf32>
    %464 = arith.addf %462, %463 : vector<8x128xf32>
    %cst_131 = arith.constant dense<0.000000e+00> : vector<8x384xf32>
    %465 = tpu.matmul %432, %1, %cst_131 {dimension_numbers = #tpu.dot_dimension_numbers<[1], [0], [0], [1], [0, 0, 1, 1], [], []>} : vector<8x128xf32>, vector<128x384xf32>, vector<8x384xf32> -> vector<8x384xf32>
    %466 = vector.extract_strided_slice %436 {offsets = [0, 0], sizes = [8, 128], strides = [1, 1]} : vector<8x384xf32> to vector<8x128xf32>
    %467 = vector.extract_strided_slice %465 {offsets = [0, 0], sizes = [8, 128], strides = [1, 1]} : vector<8x384xf32> to vector<8x128xf32>
    %468 = arith.addf %466, %467 : vector<8x128xf32>
    %469 = arith.negf %468 : vector<8x128xf32>
    %470 = math.exp %469 : vector<8x128xf32>
    %cst_132 = arith.constant 1.000000e+00 : f32
    %471 = vector.broadcast %cst_132 : f32 to vector<8x128xf32>
    %472 = arith.addf %471, %470 : vector<8x128xf32>
    %473 = arith.divf %471, %472 : vector<8x128xf32>
    %474 = vector.extract_strided_slice %436 {offsets = [0, 128], sizes = [8, 128], strides = [1, 1]} : vector<8x384xf32> to vector<8x128xf32>
    %475 = vector.extract_strided_slice %465 {offsets = [0, 128], sizes = [8, 128], strides = [1, 1]} : vector<8x384xf32> to vector<8x128xf32>
    %476 = arith.addf %474, %475 : vector<8x128xf32>
    %477 = arith.negf %476 : vector<8x128xf32>
    %478 = math.exp %477 : vector<8x128xf32>
    %cst_133 = arith.constant 1.000000e+00 : f32
    %479 = vector.broadcast %cst_133 : f32 to vector<8x128xf32>
    %480 = arith.addf %479, %478 : vector<8x128xf32>
    %481 = arith.divf %479, %480 : vector<8x128xf32>
    %482 = vector.extract_strided_slice %436 {offsets = [0, 256], sizes = [8, 128], strides = [1, 1]} : vector<8x384xf32> to vector<8x128xf32>
    %483 = vector.extract_strided_slice %465 {offsets = [0, 256], sizes = [8, 128], strides = [1, 1]} : vector<8x384xf32> to vector<8x128xf32>
    %484 = arith.addf %483, %3 : vector<8x128xf32>
    %485 = arith.mulf %473, %484 : vector<8x128xf32>
    %486 = arith.addf %482, %485 : vector<8x128xf32>
    %487 = math.tanh %486 : vector<8x128xf32>
    %cst_134 = arith.constant 1.000000e+00 : f32
    %488 = vector.broadcast %cst_134 : f32 to vector<8x128xf32>
    %489 = arith.subf %488, %481 : vector<8x128xf32>
    %490 = arith.mulf %489, %487 : vector<8x128xf32>
    %491 = arith.mulf %481, %432 : vector<8x128xf32>
    %492 = arith.addf %490, %491 : vector<8x128xf32>
    %c56_135 = arith.constant 56 : index
    %c0_136 = arith.constant 0 : index
    %493 = vector.load %arg17[%c56_135, %c0_136] : memref<64x256xf32, #tpu.memory_space<vmem>>, vector<8x128xf32>
    tpu.vector_store %arg17[%c56_135, %c0_136], %464 {strides = array<i32>} : memref<64x256xf32, #tpu.memory_space<vmem>>, vector<8x128xf32>,
    %c0_137 = arith.constant 0 : index
    %c128_138 = arith.constant 128 : index
    %494 = vector.load %arg17[%c0_137, %c128_138] : memref<64x256xf32, #tpu.memory_space<vmem>>, vector<8x128xf32>
    tpu.vector_store %arg17[%c0_137, %c128_138], %492 {strides = array<i32>} : memref<64x256xf32, #tpu.memory_space<vmem>>, vector<8x128xf32>,
    %c0_139 = arith.constant 0 : index
    %c0_140 = arith.constant 0 : index
    %c0_141 = arith.constant 0 : index
    %495 = vector.load %arg15[%c0_139, %c0_140, %c0_141] : memref<2x8x128xf32, #tpu.memory_space<vmem>>, vector<1x8x128xf32>
    %496 = vector.shape_cast %495 : vector<1x8x128xf32> to vector<8x128xf32>
    %497 = vector.shape_cast %464 : vector<8x128xf32> to vector<1x8x128xf32>
    tpu.vector_store %arg15[%c0_139, %c0_140, %c0_141], %497 {strides = array<i32>} : memref<2x8x128xf32, #tpu.memory_space<vmem>>, vector<1x8x128xf32>,
    %c1_142 = arith.constant 1 : index
    %c0_143 = arith.constant 0 : index
    %c0_144 = arith.constant 0 : index
    %498 = vector.load %arg15[%c1_142, %c0_143, %c0_144] : memref<2x8x128xf32, #tpu.memory_space<vmem>>, vector<1x8x128xf32>
    %499 = vector.shape_cast %498 : vector<1x8x128xf32> to vector<8x128xf32>
    %500 = vector.shape_cast %492 : vector<8x128xf32> to vector<1x8x128xf32>
    tpu.vector_store %arg15[%c1_142, %c0_143, %c0_144], %500 {strides = array<i32>} : memref<2x8x128xf32, #tpu.memory_space<vmem>>, vector<1x8x128xf32>,
    %c0_145 = arith.constant 0 : index
    %c0_146 = arith.constant 0 : index
    %501 = vector.load %arg17[%c0_145, %c0_146] : memref<64x256xf32, #tpu.memory_space<vmem>>, vector<64x256xf32>
    %c0_147 = arith.constant 0 : index
    %c0_148 = arith.constant 0 : index
    %502 = vector.load %arg8[%c0_147, %c0_148] : memref<256x256xf32, #tpu.memory_space<vmem>>, vector<256x256xf32>
    %cst_149 = arith.constant dense<0.000000e+00> : vector<64x256xf32>
    %503 = tpu.matmul %501, %502, %cst_149 {dimension_numbers = #tpu.dot_dimension_numbers<[1], [0], [0], [1], [0, 0, 1, 1], [], []>} : vector<64x256xf32>, vector<256x256xf32>, vector<64x256xf32> -> vector<64x256xf32>
    %c0_150 = arith.constant 0 : index
    %c0_151 = arith.constant 0 : index
    %504 = vector.load %arg9[%c0_150, %c0_151] : memref<1x256xf32, #tpu.memory_space<vmem>>, vector<1x256xf32>
    %505 = vector.broadcast %504 : vector<1x256xf32> to vector<64x256xf32>
    %506 = arith.addf %503, %505 : vector<64x256xf32>
    %507 = math.tanh %506 : vector<64x256xf32>
    %508 = vector.shape_cast %507 : vector<64x256xf32> to vector<8x8x256xf32>
    %c0_152 = arith.constant 0 : index
    %c0_153 = arith.constant 0 : index
    %509 = vector.load %arg10[%c0_152, %c0_153] : memref<1x256xf32, #tpu.memory_space<vmem>>, vector<1x256xf32>
    %510 = vector.shape_cast %509 : vector<1x256xf32> to vector<1x1x256xf32>
    %511 = vector.broadcast %510 : vector<1x1x256xf32> to vector<8x8x256xf32>
    %512 = arith.mulf %508, %511 : vector<8x8x256xf32>
    %cst_154 = arith.constant dense<0.000000e+00> : vector<8x8xf32>
    %513 = vector.multi_reduction <add>, %512, %cst_154 [2] : vector<8x8x256xf32> to vector<8x8xf32>
    %514 = math.tanh %513 : vector<8x8xf32>
    %c0_155 = arith.constant 0 : index
    %c0_156 = arith.constant 0 : index
    %515 = vector.load %arg13[%c0_155, %c0_156] : memref<1x8xf32, #tpu.memory_space<vmem>>, vector<1x8xf32>
    %cst_157 = arith.constant 0.000000e+00 : f32
    %516 = vector.broadcast %cst_157 : f32 to vector<1x8xf32>
    %517 = arith.cmpf ogt, %515, %516 : vector<1x8xf32>
    %cst_158 = arith.constant -1.000000e+30 : f32
    %518 = vector.shape_cast %517 : vector<1x8xi1> to vector<1x8xi1>
    %519 = vector.broadcast %518 : vector<1x8xi1> to vector<8x8xi1>
    %520 = vector.broadcast %cst_158 : f32 to vector<8x8xf32>
    %521 = arith.select %519, %514, %520 : vector<8x8xi1>, vector<8x8xf32>
    %cst_159 = arith.constant dense<0xFF800000> : vector<8xf32>
    %522 = vector.multi_reduction <maximumf>, %521, %cst_159 [1] : vector<8x8xf32> to vector<8xf32>
    %523 = vector.shape_cast %522 : vector<8xf32> to vector<8x1xf32>
    %524 = vector.broadcast %523 : vector<8x1xf32> to vector<8x8xf32>
    %525 = arith.subf %521, %524 : vector<8x8xf32>
    %526 = math.exp %525 : vector<8x8xf32>
    %527 = vector.broadcast %515 : vector<1x8xf32> to vector<8x8xf32>
    %528 = arith.mulf %526, %527 : vector<8x8xf32>
    %cst_160 = arith.constant dense<0.000000e+00> : vector<8xf32>
    %529 = vector.multi_reduction <add>, %528, %cst_160 [1] : vector<8x8xf32> to vector<8xf32>
    %530 = vector.shape_cast %529 : vector<8xf32> to vector<8x1xf32>
    %531 = vector.broadcast %530 : vector<8x1xf32> to vector<8x8xf32>
    %532 = arith.divf %528, %531 : vector<8x8xf32>
    %533 = vector.shape_cast %501 : vector<64x256xf32> to vector<8x8x256xf32>
    %534 = vector.shape_cast %532 : vector<8x8xf32> to vector<8x8x1xf32>
    %535 = vector.broadcast %534 : vector<8x8x1xf32> to vector<8x8x256xf32>
    %536 = arith.mulf %533, %535 : vector<8x8x256xf32>
    %cst_161 = arith.constant dense<0.000000e+00> : vector<8x256xf32>
    %537 = vector.multi_reduction <add>, %536, %cst_161 [0] : vector<8x8x256xf32> to vector<8x256xf32>
    %c0_162 = arith.constant 0 : index
    %c0_163 = arith.constant 0 : index
    %538 = vector.load %arg11[%c0_162, %c0_163] : memref<256x128xf32, #tpu.memory_space<vmem>>, vector<256x128xf32>
    %cst_164 = arith.constant dense<0.000000e+00> : vector<8x128xf32>
    %539 = tpu.matmul %537, %538, %cst_164 {dimension_numbers = #tpu.dot_dimension_numbers<[1], [0], [0], [1], [0, 0, 1, 1], [], []>} : vector<8x256xf32>, vector<256x128xf32>, vector<8x128xf32> -> vector<8x128xf32>
    %c0_165 = arith.constant 0 : index
    %c0_166 = arith.constant 0 : index
    %540 = vector.load %arg12[%c0_165, %c0_166] : memref<1x128xf32, #tpu.memory_space<vmem>>, vector<1x128xf32>
    %541 = vector.broadcast %540 : vector<1x128xf32> to vector<8x128xf32>
    %542 = arith.addf %539, %541 : vector<8x128xf32>
    %c0_167 = arith.constant 0 : index
    %c0_168 = arith.constant 0 : index
    %543 = vector.load %arg14[%c0_167, %c0_168] : memref<8x128xf32, #tpu.memory_space<vmem>>, vector<8x128xf32>
    tpu.vector_store %arg14[%c0_167, %c0_168], %542 {strides = array<i32>} : memref<8x128xf32, #tpu.memory_space<vmem>>, vector<8x128xf32>,
    return
  }
}

</mosaic_0001>

<bundles_post_ra>
// kernel: attention_forward.1
= control target key start
LH: loop header
LB: loop body
LE: loop exit
PB: predicated region body
PF: predicated region fallthrough
CT: control target
= control target key end

     0   :  { %vm193_vm0 = vcmask 261120   ;;  %s6684_s2 = inlined_call_operand.vmem [shape: f32[32,768], index: 2, kind: input, shape index: {}]   ;;  %s6685_s0 = inlined_call_operand.vmem [shape: f32[64,32], index: 0, kind: input, shape index: {}]   ;;  %s6686_s4 = inlined_call_operand.vmem [shape: f32[128,384], index: 4, kind: input, shape index: {}]   ;;  %s6687_s6 = inlined_call_operand.vmem [shape: f32[128,384], index: 6, kind: input, shape index: {}]   ;;  %s6688_s1 = inlined_call_operand.vmem [shape: f32[2,8,128], index: 1, kind: input, shape index: {}]   ;;  %s6689_s3 = inlined_call_operand.vmem [shape: f32[1,768], index: 3, kind: input, shape index: {}]   ;;  %s6690_s5 = inlined_call_operand.vmem [shape: f32[8,128], index: 5, kind: input, shape index: {}]   ;;  %s6691_s7 = inlined_call_operand.vmem [shape: f32[8,128], index: 7, kind: input, shape index: {}]   ;;  %s6692_s8 = inlined_call_operand.vmem [shape: f32[256,256], index: 8, kind: input, shape index: {}]   ;;  %s6693_s15 = inlined_call_operand.vmem [shape: f32[2,8,128], index: 15, kind: output, shape index: {1}]   ;;  %s6694_s9 = inlined_call_operand.vmem [shape: f32[1,256], index: 9, kind: input, shape index: {}]   ;;  %s6695_s10 = inlined_call_operand.vmem [shape: f32[1,256], index: 10, kind: input, shape index: {}]   ;;  %s6696_s13 = inlined_call_operand.vmem [shape: f32[1,8], index: 13, kind: input, shape index: {}]   ;;  %s6697_s11 = inlined_call_operand.vmem [shape: f32[256,128], index: 11, kind: input, shape index: {}]   ;;  %s6698_s12 = inlined_call_operand.vmem [shape: f32[1,128], index: 12, kind: input, shape index: {}]   ;;  %s6699_s14 = inlined_call_operand.vmem [shape: f32[8,128], index: 14, kind: output, shape index: {0}]  }
   0x1   :  { %v173_v0 = vld [vmem:[%s6684_s2 + $0x90] sm:$0xff]  ;;  %v174_v1 = vld [vmem:[%s6684_s2 + $0x98] sm:$0xff]  ;;  %v175_v2 = vld [vmem:[%s6684_s2 + $0xa0] sm:$0xff] }
   0x2   :  { %230 = vmatpush.msra.mxu0 %v173_v0  ;;  %271 = vmatpush.msra.mxu1 %v174_v1  ;;  %v176_v3 = vld [vmem:[%s6684_s2 + $0xa8] sm:$0xff]  ;;  %v167_v4 = vld [vmem:[%s6684_s2 + $0x60] sm:$0xff]  ;;  %v169_v6 = vld [vmem:[%s6684_s2 + $0x70] sm:$0xff] }
   0x3   :  { %v168_v5 = vld [vmem:[%s6684_s2 + $0x68] sm:$0xff]  ;;  %312 = vmatpush.msra.mxu2 %v175_v2  ;;  %353 = vmatpush.msra.mxu3 %v176_v3  ;;  %v170_v7 = vld [vmem:[%s6684_s2 + $0x78] sm:$0xff]  ;;  %v161_v8 = vld [vmem:[%s6684_s2 + $0x30] sm:$0xff] }
   0x4   :  { %231 = vmatpush.msra.mxu0 %v167_v4  ;;  %272 = vmatpush.msra.mxu1 %v168_v5  ;;  %v162_v9 = vld [vmem:[%s6684_s2 + $0x38] sm:$0xff]  ;;  %v163_v10 = vld [vmem:[%s6684_s2 + $0x40] sm:$0xff]  ;;  %v164_v11 = vld [vmem:[%s6684_s2 + $0x48] sm:$0xff] }
   0x5   :  { %313 = vmatpush.msra.mxu2 %v169_v6  ;;  %354 = vmatpush.msra.mxu3 %v170_v7  ;;  %v155_v12 = vld [vmem:[%s6684_s2] sm:$0xff]  ;;  %v156_v13 = vld [vmem:[%s6684_s2 + $0x8] sm:$0xff]  ;;  %v157_v14 = vld [vmem:[%s6684_s2 + $0x10] sm:$0xff] }
   0x6   :  { %232 = vmatpush.msra.mxu0 %v161_v8  ;;  %273 = vmatpush.msra.mxu1 %v162_v9  ;;  %v158_v15 = vld [vmem:[%s6684_s2 + $0x18] sm:$0xff]  ;;  %v3497_v16 = vld [vmem:[%s6685_s0] sm:$0xff]  ;;  %v177_v17 = vld [vmem:[%s6684_s2 + $0xb0] sm:$0xff] }
   0x7   :  { %314 = vmatpush.msra.mxu2 %v163_v10  ;;  %355 = vmatpush.msra.mxu3 %v164_v11  ;;  %v178_v18 = vld [vmem:[%s6684_s2 + $0xb8] sm:$0xff]  ;;  %v3512_v19 = vld [vmem:[%s6686_s4 + $0x170] sm:$0xff]  ;;  %v3517_v20 = vld [vmem:[%s6686_s4 + $0x168] sm:$0xff] }
   0x8   :  { %233 = vmatpush.msra.mxu0 %v155_v12  ;;  %274 = vmatpush.msra.mxu1 %v156_v13  ;;  %v171_v21 = vld [vmem:[%s6684_s2 + $0x80] sm:$0xff]  ;;  %v3529_v22 = vld [vmem:[%s6686_s4 + $0x158] sm:$0xff]  ;;  %v3534_v23 = vld [vmem:[%s6686_s4 + $0x150] sm:$0xff] }
   0x9   :  { %315 = vmatpush.msra.mxu2 %v157_v14  ;;  %356 = vmatpush.msra.mxu3 %v158_v15  ;;  %v172_v24 = vld [vmem:[%s6684_s2 + $0x88] sm:$0xff]  ;;  %v165_v25 = vld [vmem:[%s6684_s2 + $0x50] sm:$0xff]  ;;  %v3547_v26 = vld [vmem:[%s6686_s4 + $0x140] sm:$0xff] }
   0xa   :  { %2869 = vmatmul.msk.f32.vlgmr.msra.gmra.mxu0 %vm193_vm0, %v3497_v16  ;;  %2877 = vmatmul.msk.f32.vlgmr.msra.gmra.mxu1 %vm193_vm0, %v3497_v16  ;;  %v3552_v27 = vld [vmem:[%s6686_s4 + $0x138] sm:$0xff]  ;;  %v3557_v28 = vld [vmem:[%s6685_s0 + $0x8] sm:$0xff]  ;;  %v3571_v30 = vld [vmem:[%s6686_s4 + $0x120] sm:$0xff] }
   0xb   :  { %2885 = vmatmul.msk.f32.vlgmr.msra.gmra.mxu2 %vm193_vm0, %v3497_v16  ;;  %2893 = vmatmul.msk.f32.vlgmr.msra.gmra.mxu3 %vm193_vm0, %v3497_v16  ;;  %v3565_v29 = vld [vmem:[%s6686_s4 + $0x128] sm:$0xff]  ;;  %v3584_v31 = vld [vmem:[%s6686_s4 + $0x110] sm:$0xff]  ;;  %v3596_v33 = vld [vmem:[%s6686_s4 + $0xf8] sm:$0xff] }
   0xc   :  { %394 = vmatpush.msrb.mxu0 %v177_v17  ;;  %435 = vmatpush.msrb.mxu1 %v178_v18  ;;  %v3589_v32 = vld [vmem:[%s6686_s4 + $0x108] sm:$0xff]  ;;  %v3601_v34 = vld [vmem:[%s6686_s4 + $0xf0] sm:$0xff]  ;;  %v3615_v36 = vld [vmem:[%s6686_s4 + $0xe0] sm:$0xff] }
   0xd   :  { %541 = vmatpush.msrb.mxu3 %v3512_v19  ;;  %521 = vmatpush.msrb.mxu2 %v3517_v20  ;;  %v3608_v35 = vld [vmem:[%s6685_s0 + $0x10] sm:$0xff]  ;;  %v3620_v37 = vld [vmem:[%s6686_s4 + $0xd8] sm:$0xff]  ;;  %v3633_v38 = vld [vmem:[%s6686_s4 + $0xc8] sm:$0xff] }
   0xe   :  { %395 = vmatpush.msrb.mxu0 %v171_v21  ;;  %436 = vmatpush.msrb.mxu1 %v172_v24  ;;  %v3638_v39 = vld [vmem:[%s6686_s4 + $0xc0] sm:$0xff]  ;;  %v166_v41 = vld [vmem:[%s6684_s2 + $0x58] sm:$0xff]  ;;  %v3651_v42 = vld [vmem:[%s6686_s4 + $0xb0] sm:$0xff] }
   0xf   :  { %542 = vmatpush.msrb.mxu3 %v3529_v22  ;;  %522 = vmatpush.msrb.mxu2 %v3534_v23  ;;  %v159_v40 = vld [vmem:[%s6684_s2 + $0x20] sm:$0xff]  ;;  %v3656_v43 = vld [vmem:[%s6686_s4 + $0xa8] sm:$0xff]  ;;  %v3663_v44 = vld [vmem:[%s6685_s0 + $0x18] sm:$0xff] }
  0x10   :  { %396 = vmatpush.msrb.mxu0 %v165_v25  ;;  %437 = vmatpush.msrb.mxu1 %v166_v41  ;;  %v3670_v45 = vld [vmem:[%s6686_s4 + $0x98] sm:$0xff]  ;;  %v3675_v46 = vld [vmem:[%s6686_s4 + $0x90] sm:$0xff]  ;;  %v3688_v47 = vld [vmem:[%s6686_s4 + $0x80] sm:$0xff] }
  0x11   :  { %543 = vmatpush.msrb.mxu3 %v3547_v26  ;;  %523 = vmatpush.msrb.mxu2 %v3552_v27  ;;  %v3693_v48 = vld [vmem:[%s6686_s4 + $0x78] sm:$0xff]  ;;  %v3700_v49 = vld [vmem:[%s6686_s4 + $0x68] sm:$0xff]  ;;  %v3705_v50 = vld [vmem:[%s6686_s4 + $0x60] sm:$0xff] }
  0x12   :  { %2870 = vmatmul.msk.f32.gmra.mxu0 %vm193_vm0, %v3557_v28  ;;  %2878 = vmatmul.msk.f32.gmra.mxu1 %vm193_vm0, %v3557_v28  ;;  %v160_v51 = vld [vmem:[%s6684_s2 + $0x28] sm:$0xff]  ;;  %v3715_v52 = vld [vmem:[%s6685_s0 + $0x20] sm:$0xff]  ;;  %v3722_v53 = vld [vmem:[%s6686_s4 + $0x50] sm:$0xff] }
  0x13   :  { %2886 = vmatmul.msk.f32.gmra.mxu2 %vm193_vm0, %v3557_v28  ;;  %2894 = vmatmul.msk.f32.gmra.mxu3 %vm193_vm0, %v3557_v28  ;;  %v3727_v54 = vld [vmem:[%s6686_s4 + $0x48] sm:$0xff]  ;;  %v3740_v55 = vld [vmem:[%s6686_s4 + $0x38] sm:$0xff]  ;;  %v3745_v56 = vld [vmem:[%s6686_s4 + $0x30] sm:$0xff] }
  0x14   :  { %544 = vmatpush.msrb.mxu3 %v3565_v29  ;;  %524 = vmatpush.msrb.mxu2 %v3571_v30  ;;  %v3750_v57 = vld [vmem:[%s6687_s6 + $0x170] sm:$0xff]  ;;  %v3757_v58 = vld [vmem:[%s6687_s6 + $0x158] sm:$0xff]  ;;  %v3762_v59 = vld [vmem:[%s6686_s4 + $0x20] sm:$0xff] }
  0x15   :  { %397 = vmatpush.msrb.mxu0 %v159_v40  ;;  %438 = vmatpush.msrb.mxu1 %v160_v51  ;;  %6962 = vst [vmem:[#allocation4_spill] sm:$0xff] %v3750_v57  ;;  %v3767_v60 = vld [vmem:[%s6686_s4 + $0x18] sm:$0xff]  ;;  %v3775_v61 = vld [vmem:[%s6685_s0 + $0x28] sm:$0xff]  ;;  %v3788_v63 = vld [vmem:[%s6686_s4] sm:$0xff] }
  0x16   :  { %545 = vmatpush.msrb.mxu3 %v3584_v31  ;;  %525 = vmatpush.msrb.mxu2 %v3589_v32  ;;  %6963 = vst [vmem:[#allocation5_spill] sm:$0xff] %v3757_v58  ;;  %v3783_v62 = vld [vmem:[%s6686_s4 + $0x8] sm:$0xff]  ;;  %v3802_v1 = vld [vmem:[%s6686_s4 + $0x178] sm:$0xff]  ;;  %v3811_v2 = vld [vmem:[%s6687_s6 + $0x140] sm:$0xff] }
  0x17   :  { %6964 = vst [vmem:[#allocation6_spill] sm:$0xff] %v3762_v59  ;;  %649 = vmatpush.msra.mxu0 %v3750_v57  ;;  %v3797_v0 = vld [vmem:[%s6687_s6 + $0x168] sm:$0xff]  ;;  %v3817_v3 = vld [vmem:[%s6687_s6 + $0x150] sm:$0xff]  ;;  %v3823_v4 = vld [vmem:[%s6686_s4 + $0x160] sm:$0xff] }
  0x18   :  { %546 = vmatpush.msrb.mxu3 %v3596_v33  ;;  %526 = vmatpush.msrb.mxu2 %v3601_v34  ;;  %6965 = vst [vmem:[#allocation7_spill] sm:$0xff] %v3783_v62  ;;  %v3830_v5 = vld [vmem:[%s6687_s6 + $0x128] sm:$0xff]  ;;  %v3835_v6 = vld [vmem:[%s6687_s6 + $0x138] sm:$0xff]  ;;  %v3846_v8 = vld [vmem:[%s6685_s0 + $0x30] sm:$0xff] }
  0x19   :  { %650 = vmatpush.msra.mxu0 %v3757_v58  ;;  %6966 = vst [vmem:[#allocation8_spill] sm:$0xff] %v3788_v63  ;;  %v3840_v7 = vld [vmem:[%s6686_s4 + $0x148] sm:$0xff]  ;;  %v3855_v9 = vld [vmem:[%s6687_s6 + $0x120] sm:$0xff]  ;;  %v3861_v10 = vld [vmem:[%s6686_s4 + $0x130] sm:$0xff] }
  0x1a   :  { %2871 = vmatmul.msk.f32.gmra.mxu0 %vm193_vm0, %v3608_v35  ;;  %2879 = vmatmul.msk.f32.gmra.mxu1 %vm193_vm0, %v3608_v35  ;;  %6967 = vst [vmem:[#allocation9_spill] sm:$0xff] %v3811_v2  ;;  %v3870_v11 = vld [vmem:[%s6687_s6 + $0x110] sm:$0xff]  ;;  %v3879_v12 = vld [vmem:[%s6687_s6 + $0x108] sm:$0xff]  ;;  %v3884_v13 = vld [vmem:[%s6686_s4 + $0x118] sm:$0xff] }
  0x1b   :  { %2887 = vmatmul.msk.f32.gmra.mxu2 %vm193_vm0, %v3608_v35  ;;  %2895 = vmatmul.msk.f32.gmra.mxu3 %vm193_vm0, %v3608_v35  ;;  %6968 = vst [vmem:[#allocation10_spill] sm:$0xff] %v3830_v5  ;;  %v3889_v14 = vld [vmem:[%s6687_s6 + $0x178] sm:$0xff]  ;;  %v3901_v17 = vld [vmem:[%s6687_s6 + $0xf0] sm:$0xff]  ;;  %v3906_v18 = vld [vmem:[%s6686_s4 + $0x100] sm:$0xff] }
  0x1c   :  { %547 = vmatpush.msrb.mxu3 %v3615_v36  ;;  %527 = vmatpush.msrb.mxu2 %v3620_v37  ;;  %6969 = vst [vmem:[#allocation11_spill] sm:$0xff] %v3870_v11  ;;  %v3896_v15 = vld [vmem:[%s6687_s6 + $0xf8] sm:$0xff]  ;;  %v3913_v21 = vld [vmem:[%s6687_s6 + $0x160] sm:$0xff]  ;;  %v3934_v40 = vld [vmem:[%s6686_s4 + $0xe8] sm:$0xff] }
  0x1d   :  { %651 = vmatpush.msra.mxu0 %v3811_v2  ;;  %6970 = vst [vmem:[#allocation12_spill] sm:$0xff] %v3879_v12  ;;  %669 = vmatpush.msra.mxu1 %v3889_v14  ;;  %v3920_v24 = vld [vmem:[%s6685_s0 + $0x38] sm:$0xff]  ;;  %v3943_v41 = vld [vmem:[%s6687_s6 + $0xe0] sm:$0xff]  ;;  %v3974_v2 = vld [vmem:[%s6687_s6 + $0x130] sm:$0xff] }
  0x1e   :  { %548 = vmatpush.msrb.mxu3 %v3633_v38  ;;  %528 = vmatpush.msrb.mxu2 %v3638_v39  ;;  %6971 = vst [vmem:[#allocation13_spill] sm:$0xff] %v3889_v14  ;;  %v3929_v25 = vld [vmem:[%s6687_s6 + $0xd8] sm:$0xff]  ;;  %v3952_v51 = vld [vmem:[%s6687_s6 + $0xc0] sm:$0xff] }
  0x1f   :  { %652 = vmatpush.msra.mxu0 %v3830_v5  ;;  %6972 = vst [vmem:[#allocation14_spill] sm:$0xff] %v3896_v15  ;;  %670 = vmatpush.msra.mxu1 %v3913_v21  ;;  %v3969_v5 = vld [vmem:[%s6687_s6 + $0xc8] sm:$0xff]  ;;  %v3984_v58 = vld [vmem:[%s6686_s4 + $0xb8] sm:$0xff]  ;;  %v3995_v14 = vld [vmem:[%s6688_s1] sm:$0xff] }
  0x20   :  { %549 = vmatpush.msrb.mxu3 %v3651_v42  ;;  %529 = vmatpush.msrb.mxu2 %v3656_v43  ;;  %6973 = vst [vmem:[#allocation15_spill] sm:$0xff] %v3901_v17  ;;  %v4028_v57 = vld [vmem:[%s6687_s6 + $0x78] sm:$0xff] }
  0x21   :  { %6974 = vst [vmem:[#allocation16_spill] sm:$0xff] %v3906_v18  ;;  %653 = vmatpush.msra.mxu0 %v3870_v11  ;;  %v3962_v11 = vld [vmem:[%s6687_s6 + $0x148] sm:$0xff] }
  0x22   :  { %2872 = vmatmul.msk.f32.gmra.mxu0 %vm193_vm0, %v3663_v44  ;;  %2880 = vmatmul.msk.f32.gmra.mxu1 %vm193_vm0, %v3663_v44  ;;  %6975 = vst [vmem:[#allocation17_spill] sm:$0xff] %v3913_v21  ;;  %v3979_v21 = vld [vmem:[%s6687_s6 + $0xa8] sm:$0xff] }
  0x23   :  { %2888 = vmatmul.msk.f32.gmra.mxu2 %vm193_vm0, %v3663_v44  ;;  %2896 = vmatmul.msk.f32.gmra.mxu3 %vm193_vm0, %v3663_v44  ;;  %6976 = vst [vmem:[#allocation18_spill] sm:$0xff] %v3920_v24 }
  0x24   :  { %550 = vmatpush.msrb.mxu3 %v3670_v45  ;;  %530 = vmatpush.msrb.mxu2 %v3675_v46  ;;  %6977 = vst [vmem:[#allocation19_spill] sm:$0xff] %v3929_v25 }
  0x25   :  { %654 = vmatpush.msra.mxu0 %v3896_v15  ;;  %6978 = vst [vmem:[#allocation20_spill] sm:$0xff] %v3934_v40  ;;  %v3957_v15 = vld [vmem:[%s6686_s4 + $0xd0] sm:$0xff]  ;;  %671 = vmatpush.msra.mxu1 %v3962_v11 }
  0x26   :  { %551 = vmatpush.msrb.mxu3 %v3688_v47  ;;  %531 = vmatpush.msrb.mxu2 %v3693_v48  ;;  %6979 = vst [vmem:[#allocation21_spill] sm:$0xff] %v3943_v41 }
  0x27   :  { %6980 = vst [vmem:[#allocation22_spill] sm:$0xff] %v3952_v51  ;;  %655 = vmatpush.msra.mxu0 %v3943_v41  ;;  %672 = vmatpush.msra.mxu1 %v3974_v2  ;;  %v4002_v41 = vld [vmem:[%s6687_s6 + $0x90] sm:$0xff] }
  0x28   :  { %552 = vmatpush.msrb.mxu3 %v3700_v49  ;;  %532 = vmatpush.msrb.mxu2 %v3705_v50  ;;  %6981 = vst [vmem:[#allocation23_spill] sm:$0xff] %v3957_v15 }
  0x29   :  { %6982 = vst [vmem:[#allocation24_spill] sm:$0xff] %v3962_v11  ;;  %656 = vmatpush.msra.mxu0 %v3969_v5  ;;  %v4021_v11 = vld [vmem:[%s6687_s6 + $0x118] sm:$0xff] }
  0x2a   :  { %2873 = vmatmul.msk.f32.gmra.mxu0 %vm193_vm0, %v3715_v52  ;;  %2881 = vmatmul.msk.f32.gmra.mxu1 %vm193_vm0, %v3715_v52  ;;  %6983 = vst [vmem:[#allocation25_spill] sm:$0xff] %v3969_v5  ;;  %v4007_v5 = vld [vmem:[%s6686_s4 + $0xa0] sm:$0xff] }
  0x2b   :  { %2889 = vmatmul.msk.f32.gmra.mxu2 %vm193_vm0, %v3715_v52  ;;  %2897 = vmatmul.msk.f32.gmra.mxu3 %vm193_vm0, %v3715_v52  ;;  %6984 = vst [vmem:[#allocation26_spill] sm:$0xff] %v3974_v2  ;;  %v4016_v2 = vld [vmem:[%s6687_s6 + $0xb0] sm:$0xff] }
  0x2c   :  { %553 = vmatpush.msrb.mxu3 %v3722_v53  ;;  %533 = vmatpush.msrb.mxu2 %v3727_v54  ;;  %6985 = vst [vmem:[#allocation27_spill] sm:$0xff] %v3979_v21 }
  0x2d   :  { %6986 = vst [vmem:[#allocation28_spill] sm:$0xff] %v3984_v58  ;;  %657 = vmatpush.msra.mxu0 %v4016_v2  ;;  %673 = vmatpush.msra.mxu1 %v4021_v11 }
  0x2e   :  { %554 = vmatpush.msrb.mxu3 %v3740_v55  ;;  %534 = vmatpush.msrb.mxu2 %v3745_v56  ;;  %6987 = vst [vmem:[#allocation29_spill] sm:$0xff] %v3995_v14 }
  0x2f   :  { %6988 = vst [vmem:[#allocation30_spill] sm:$0xff] %v4002_v41 }
  0x30   :  { %555 = vmatpush.msrb.mxu3 %v3762_v59  ;;  %535 = vmatpush.msrb.mxu2 %v3767_v60  ;;  %6989 = vst [vmem:[#allocation31_spill] sm:$0xff] %v4007_v5  ;;  %v4114_v59 = vld [vmem:[%s6687_s6 + $0x18] sm:$0xff] }
  0x31   :  { %6990 = vst [vmem:[#allocation32_spill] sm:$0xff] %v4016_v2  ;;  %v4073_v2 = vld [vmem:[%s6686_s4 + $0x58] sm:$0xff] }
  0x32   :  { %2874 = vmatmul.msk.f32.gmra.mxu0 %vm193_vm0, %v3775_v61  ;;  %2882 = vmatmul.msk.f32.gmra.mxu1 %vm193_vm0, %v3775_v61  ;;  %6991 = vst [vmem:[#allocation33_spill] sm:$0xff] %v4021_v11  ;;  %v4092_v11 = vld [vmem:[%s6687_s6 + $0x80] sm:$0xff] }
  0x33   :  { %2890 = vmatmul.msk.f32.gmra.mxu2 %vm193_vm0, %v3775_v61  ;;  %2898 = vmatmul.msk.f32.gmra.mxu3 %vm193_vm0, %v3775_v61  ;;  %6992 = vst [vmem:[#allocation34_spill] sm:$0xff] %v4028_v57 }
  0x34   :  { %556 = vmatpush.msrb.mxu3 %v3783_v62  ;;  %536 = vmatpush.msrb.mxu2 %v3788_v63  ;;  %v4045_v62 = vld [vmem:[%s6687_s6 + $0x100] sm:$0xff]  ;;  %v4067_v63 = vld [vmem:[%s6687_s6 + $0x48] sm:$0xff]  ;;  %6999 = vst [vmem:[#allocation41_spill] sm:$0xff] %v4073_v2 }
  0x35   :  { %6995 = vst [vmem:[#allocation37_spill] sm:$0xff] %v4045_v62  ;;  %674 = vmatpush.msra.mxu1 %v4045_v62  ;;  %v4087_v62 = vld [vmem:[%s6686_s4 + $0x40] sm:$0xff] }
  0x36   :  { %629 = vmatpush.msra.mxu3 %v3797_v0  ;;  %561 = vmatpush.msra.mxu2 %v3802_v1  ;;  %6998 = vst [vmem:[#allocation40_spill] sm:$0xff] %v4067_v63 }
  0x37   :  { %7000 = vst [vmem:[#allocation42_spill] sm:$0xff] %v4087_v62 }
  0x38   :  { %630 = vmatpush.msra.mxu3 %v3817_v3  ;;  %562 = vmatpush.msra.mxu2 %v3823_v4  ;;  %7001 = vst [vmem:[#allocation43_spill] sm:$0xff] %v4092_v11 }
  0x3a   :  { %631 = vmatpush.msra.mxu3 %v3835_v6  ;;  %563 = vmatpush.msra.mxu2 %v3840_v7 }
  0x3b   :  { %2875 = vmatmul.msk.f32.gmra.mxu0 %vm193_vm0, %v3846_v8  ;;  %2883 = vmatmul.msk.f32.gmra.mxu1 %vm193_vm0, %v3846_v8 }
  0x3c   :  { %2891 = vmatmul.msk.f32.gmra.mxu2 %vm193_vm0, %v3846_v8  ;;  %2899 = vmatmul.msk.f32.gmra.mxu3 %vm193_vm0, %v3846_v8 }
  0x3d   :  { %632 = vmatpush.msra.mxu3 %v3855_v9  ;;  %564 = vmatpush.msra.mxu2 %v3861_v10 }
  0x3f   :  { %633 = vmatpush.msra.mxu3 %v3879_v12  ;;  %565 = vmatpush.msra.mxu2 %v3884_v13 }
  0x41   :  { %634 = vmatpush.msra.mxu3 %v3901_v17  ;;  %566 = vmatpush.msra.mxu2 %v3906_v18 }
  0x43   :  { %2876 = vmatmul.msk.f32.gmra.mxu0 %vm193_vm0, %v3920_v24  ;;  %2884 = vmatmul.msk.f32.gmra.mxu1 %vm193_vm0, %v3920_v24 }
  0x44   :  { %2892 = vmatmul.msk.f32.gmra.mxu2 %vm193_vm0, %v3920_v24  ;;  %2900 = vmatmul.msk.f32.gmra.mxu3 %vm193_vm0, %v3920_v24  ;;  %v4040_v24 = vld [vmem:[%s6687_s6 + $0x98] sm:$0xff] }
  0x45   :  { %635 = vmatpush.msra.mxu3 %v3929_v25  ;;  %567 = vmatpush.msra.mxu2 %v3934_v40  ;;  %6994 = vst [vmem:[#allocation36_spill] sm:$0xff] %v4040_v24 }
  0x46   :  { %658 = vmatpush.msra.mxu0 %v4040_v24  ;;  %v4078_v24 = vld [vmem:[%s6687_s6 + $0x30] sm:$0xff] }
  0x47   :  { %636 = vmatpush.msra.mxu3 %v3952_v51  ;;  %568 = vmatpush.msra.mxu2 %v3957_v15  ;;  %v4133_v51 = vld [vmem:[%s6686_s4 + $0x10] sm:$0xff] }
  0x48   :  { %659 = vmatpush.msra.mxu0 %v4092_v11  ;;  %7007 = vst [vmem:[#allocation49_spill] sm:$0xff] %v4133_v51  ;;  %v4142_v11 = vld [vmem:[%s6688_s1 + $0x8] sm:$0xff] }
  0x49   :  { %637 = vmatpush.msra.mxu3 %v3979_v21  ;;  %569 = vmatpush.msra.mxu2 %v3984_v58  ;;  %v4050_v21 = vld [vmem:[%s6687_s6 + $0x60] sm:$0xff]  ;;  %7008 = vst [vmem:[#allocation50_spill] sm:$0xff] %v4142_v11 }
  0x4a   :  { %6996 = vst [vmem:[#allocation38_spill] sm:$0xff] %v4050_v21 }
  0x4b   :  { %2901 = vmatmul.msk.f32.vlgmr.msrb.gmra.mxu0 %vm193_vm0, %v3497_v16  ;;  %2909 = vmatmul.msk.f32.vlgmr.msrb.gmra.mxu1 %vm193_vm0, %v3497_v16  ;;  %v4033_v16 = vld [vmem:[%s6686_s4 + $0x88] sm:$0xff] }
  0x4c   :  { %537 = vmatmul.f32.vlgmr.msrb.gmra.mxu2 %v3995_v14  ;;  %557 = vmatmul.f32.vlgmr.msrb.gmra.mxu3 %v3995_v14  ;;  %6993 = vst [vmem:[#allocation35_spill] sm:$0xff] %v4033_v16 }
  0x4d   :  { %638 = vmatpush.msra.mxu3 %v4002_v41  ;;  %570 = vmatpush.msra.mxu2 %v4007_v5  ;;  %v4055_v41 = vld [vmem:[%s6686_s4 + $0x70] sm:$0xff] }
  0x4e   :  { %6997 = vst [vmem:[#allocation39_spill] sm:$0xff] %v4055_v41 }
  0x4f   :  { %639 = vmatpush.msra.mxu3 %v4028_v57  ;;  %571 = vmatpush.msra.mxu2 %v4033_v16  ;;  %v4109_v57 = vld [vmem:[%s6687_s6 + $0xd0] sm:$0xff] }
  0x50   :  { %7004 = vst [vmem:[#allocation46_spill] sm:$0xff] %v4109_v57 }
  0x51   :  { %640 = vmatpush.msra.mxu3 %v4050_v21  ;;  %572 = vmatpush.msra.mxu2 %v4055_v41  ;;  %v4097_v21 = vld [vmem:[%s6687_s6 + $0xe8] sm:$0xff] }
  0x52   :  { %7002 = vst [vmem:[#allocation44_spill] sm:$0xff] %v4097_v21  ;;  %675 = vmatpush.msra.mxu1 %v4097_v21  ;;  %v4177_v21 = vld [vmem:[%s6687_s6 + $0x88] sm:$0xff] }
  0x53   :  { %2902 = vmatmul.msk.f32.gmra.mxu0 %vm193_vm0, %v3557_v28  ;;  %2910 = vmatmul.msk.f32.gmra.mxu1 %vm193_vm0, %v3557_v28  ;;  %v4104_v28 = vld [vmem:[%s6687_s6 + $0x68] sm:$0xff]  ;;  %7011 = vst [vmem:[#allocation53_spill] sm:$0xff] %v4177_v21 }
  0x54   :  { %641 = vmatpush.msra.mxu3 %v4067_v63  ;;  %573 = vmatpush.msra.mxu2 %v4073_v2  ;;  %7003 = vst [vmem:[#allocation45_spill] sm:$0xff] %v4104_v28  ;;  %v4119_v63 = vld [vmem:[%s6686_s4 + $0x28] sm:$0xff]  ;;  %v4128_v2 = vld [vmem:[%s6687_s6] sm:$0xff] }
  0x55   :  { %7005 = vst [vmem:[#allocation47_spill] sm:$0xff] %v4119_v63  ;;  %660 = vmatpush.msra.mxu0 %v4104_v28  ;;  %676 = vmatpush.msra.mxu1 %v4109_v57  ;;  %v4153_v28 = vld [vmem:[%s6687_s6 + $0x50] sm:$0xff]  ;;  %v4158_v57 = vld [vmem:[%s6687_s6 + $0xb8] sm:$0xff] }
  0x56   :  { %642 = vmatpush.msra.mxu3 %v4078_v24  ;;  %574 = vmatpush.msra.mxu2 %v4087_v62  ;;  %7006 = vst [vmem:[#allocation48_spill] sm:$0xff] %v4128_v2 }
  0x57   :  { %7009 = vst [vmem:[#allocation51_spill] sm:$0xff] %v4153_v28  ;;  %661 = vmatpush.msra.mxu0 %v4153_v28  ;;  %677 = vmatpush.msra.mxu1 %v4158_v57  ;;  %v4205_v28 = vld [vmem:[%s6687_s6 + $0x58] sm:$0xff] }
  0x58   :  { %643 = vmatpush.msra.mxu3 %v4114_v59  ;;  %575 = vmatpush.msra.mxu2 %v4119_v63 }
  0x5a   :  { %644 = vmatpush.msra.mxu3 %v4128_v2  ;;  %576 = vmatpush.msra.mxu2 %v4133_v51  ;;  %v4165_v2 = vld [vmem:[%s6687_s6 + $0xa0] sm:$0xff] }
  0x5b   :  { %2903 = vmatmul.msk.f32.gmra.mxu0 %vm193_vm0, %v3608_v35  ;;  %2911 = vmatmul.msk.f32.gmra.mxu1 %vm193_vm0, %v3608_v35  ;;  %v4170_v35 = vld [vmem:[%s6687_s6 + $0x38] sm:$0xff] }
  0x5c   :  { %645 = vmatmul.f32.vlgmr.msra.gmra.mxu3 %v4142_v11  ;;  %577 = vmatmul.f32.vlgmr.msra.gmra.mxu2 %v3995_v14  ;;  %7010 = vst [vmem:[#allocation52_spill] sm:$0xff] %v4170_v35  ;;  %v4189_v14 = vld [vmem:[%s6687_s6 + $0x70] sm:$0xff] }
  0x5d   :  { %745 = vmatpush.msrb.mxu2 %v3517_v20  ;;  %765 = vmatpush.msrb.mxu3 %v3512_v19  ;;  %7012 = vst [vmem:[#allocation54_spill] sm:$0xff] %v4189_v14 }
  0x5e   :  { %678 = vmatpush.msra.mxu1 %v4165_v2  ;;  %662 = vmatpush.msra.mxu0 %v4170_v35  ;;  %v4200_v35 = vld [vmem:[%s6687_s6 + $0x20] sm:$0xff] }
  0x5f   :  { %746 = vmatpush.msrb.mxu2 %v3534_v23  ;;  %766 = vmatpush.msrb.mxu3 %v3529_v22  ;;  %7013 = vst [vmem:[#allocation55_spill] sm:$0xff] %v4200_v35 }
  0x60   :  { %679 = vmatpush.msra.mxu1 %v4177_v21  ;;  %663 = vmatpush.msra.mxu0 %v4200_v35  ;;  %v4212_v21 = vld [vmem:[%s6687_s6 + $0x8] sm:$0xff] }
  0x61   :  { %747 = vmatpush.msrb.mxu2 %v3552_v27  ;;  %767 = vmatpush.msrb.mxu3 %v3547_v26  ;;  %v4229_v35 = vld [vmem:[%s6687_s6 + $0x28] sm:$0xff] }
  0x62   :  { %680 = vmatpush.msra.mxu1 %v4189_v14  ;;  %664 = vmatpush.msra.mxu0 %v4212_v21  ;;  %v4235_v14 = vld [vmem:[%s6687_s6 + $0x10] sm:$0xff] }
  0x63   :  { %2904 = vmatmul.msk.f32.gmra.mxu0 %vm193_vm0, %v3663_v44  ;;  %2912 = vmatmul.msk.f32.gmra.mxu1 %vm193_vm0, %v3663_v44  ;;  %v4217_v44 = vld [vmem:[%s6687_s6 + $0x40] sm:$0xff] }
  0x64   :  { %748 = vmatpush.msrb.mxu2 %v3571_v30  ;;  %768 = vmatpush.msrb.mxu3 %v3565_v29 }
  0x65   :  { %681 = vmatpush.msra.mxu1 %v4205_v28  ;;  %785 = vmatpush.msrb.mxu0 %v3802_v1 }
  0x66   :  { %749 = vmatpush.msrb.mxu2 %v3589_v32  ;;  %769 = vmatpush.msrb.mxu3 %v3584_v31 }
  0x67   :  { %682 = vmatpush.msra.mxu1 %v4217_v44  ;;  %786 = vmatpush.msrb.mxu0 %v3823_v4 }
  0x68   :  { %750 = vmatpush.msrb.mxu2 %v3601_v34  ;;  %770 = vmatpush.msrb.mxu3 %v3596_v33 }
  0x69   :  { %683 = vmatpush.msra.mxu1 %v4229_v35  ;;  %787 = vmatpush.msrb.mxu0 %v3840_v7 }
  0x6a   :  { %751 = vmatpush.msrb.mxu2 %v3620_v37  ;;  %771 = vmatpush.msrb.mxu3 %v3615_v36 }
  0x6b   :  { %2905 = vmatmul.msk.f32.gmra.mxu0 %vm193_vm0, %v3715_v52  ;;  %2913 = vmatmul.msk.f32.gmra.mxu1 %vm193_vm0, %v3715_v52  ;;  %v7014_v52 = vld [vmem:[#allocation22_spill] sm:$0xff] }
  0x6c   :  { %684 = vmatpush.msra.mxu1 %v4235_v14  ;;  %788 = vmatpush.msrb.mxu0 %v3861_v10 }
  0x6d   :  { %752 = vmatpush.msrb.mxu2 %v3638_v39  ;;  %772 = vmatpush.msrb.mxu3 %v3633_v38 }
  0x6e   :  { %853 = vmatpush.msrb.mxu1 %v3797_v0  ;;  %789 = vmatpush.msrb.mxu0 %v3884_v13 }
  0x6f   :  { %753 = vmatpush.msrb.mxu2 %v3656_v43  ;;  %773 = vmatpush.msrb.mxu3 %v3651_v42 }
  0x70   :  { %854 = vmatpush.msrb.mxu1 %v3817_v3  ;;  %790 = vmatpush.msrb.mxu0 %v3906_v18  ;;  %v7029_v18 = vld [vmem:[#allocation38_spill] sm:$0xff] }
  0x71   :  { %754 = vmatpush.msrb.mxu2 %v3675_v46  ;;  %774 = vmatpush.msrb.mxu3 %v3670_v45 }
  0x72   :  { %855 = vmatpush.msrb.mxu1 %v3835_v6  ;;  %791 = vmatpush.msrb.mxu0 %v3934_v40 }
  0x73   :  { %2906 = vmatmul.msk.f32.gmra.mxu0 %vm193_vm0, %v3775_v61  ;;  %2914 = vmatmul.msk.f32.gmra.mxu1 %vm193_vm0, %v3775_v61  ;;  %v7015_v61 = vld [vmem:[#allocation41_spill] sm:$0xff] }
  0x74   :  { %856 = vmatpush.msrb.mxu1 %v3855_v9  ;;  %792 = vmatpush.msrb.mxu0 %v3957_v15  ;;  %v7020_v15 = vld [vmem:[#allocation18_spill] sm:$0xff] }
  0x75   :  { %755 = vmatpush.msrb.mxu2 %v3693_v48  ;;  %775 = vmatpush.msrb.mxu3 %v3688_v47 }
  0x76   :  { %857 = vmatpush.msrb.mxu1 %v3879_v12  ;;  %793 = vmatpush.msrb.mxu0 %v3984_v58  ;;  %v7019_v58 = vld [vmem:[#allocation7_spill] sm:$0xff]  ;;  %v7035_v12 = vld [vmem:[#allocation14_spill] sm:$0xff] }
  0x77   :  { %756 = vmatpush.msrb.mxu2 %v3705_v50  ;;  %776 = vmatpush.msrb.mxu3 %v3700_v49 }
  0x78   :  { %858 = vmatpush.msrb.mxu1 %v3901_v17  ;;  %794 = vmatpush.msrb.mxu0 %v4007_v5  ;;  %v7016_v5 = vld [vmem:[#allocation6_spill] sm:$0xff] }
  0x79   :  { %757 = vmatpush.msrb.mxu2 %v3727_v54  ;;  %777 = vmatpush.msrb.mxu3 %v3722_v53 }
  0x7a   :  { %795 = vmatpush.msrb.mxu0 %v4033_v16  ;;  %859 = vmatpush.msrb.mxu1 %v3929_v25  ;;  %v7018_v16 = vld [vmem:[#allocation27_spill] sm:$0xff]  ;;  %v7026_v25 = vld [vmem:[#allocation34_spill] sm:$0xff] }
  0x7b   :  { %2907 = vmatmul.msk.f32.gmra.mxu0 %vm193_vm0, %v3846_v8  ;;  %2915 = vmatmul.msk.f32.gmra.mxu1 %vm193_vm0, %v3846_v8  ;;  %v7017_v8 = vld [vmem:[#allocation8_spill] sm:$0xff] }
  0x7c   :  { %758 = vmatpush.msrb.mxu2 %v3745_v56  ;;  %796 = vmatpush.msrb.mxu0 %v4055_v41  ;;  %v7021_v41 = vld [vmem:[#allocation4_spill] sm:$0xff] }
  0x7d   :  { %778 = vmatpush.msrb.mxu3 %v3740_v55  ;;  %860 = vmatpush.msrb.mxu1 %v7014_v52  ;;  %v7023_v52 = vld [vmem:[#allocation30_spill] sm:$0xff] }
  0x7e   :  { %759 = vmatpush.msrb.mxu2 %v3767_v60  ;;  %797 = vmatpush.msrb.mxu0 %v7015_v61  ;;  %v7022_v61 = vld [vmem:[#allocation13_spill] sm:$0xff] }
  0x7f   :  { %779 = vmatpush.msrb.mxu3 %v7016_v5  ;;  %861 = vmatpush.msrb.mxu1 %v7018_v16  ;;  %v7024_v16 = vld [vmem:[#allocation5_spill] sm:$0xff] }
  0x80   :  { %760 = vmatpush.msrb.mxu2 %v7017_v8  ;;  %798 = vmatpush.msrb.mxu0 %v4087_v62  ;;  %v7025_v62 = vld [vmem:[#allocation17_spill] sm:$0xff] }
  0x81   :  { %780 = vmatpush.msrb.mxu3 %v7019_v58  ;;  %862 = vmatpush.msrb.mxu1 %v7023_v52  ;;  %v7034_v52 = vld [vmem:[#allocation33_spill] sm:$0xff] }
  0x82   :  { %799 = vmatpush.msrb.mxu0 %v4119_v63  ;;  %873 = vmatpush.msra.mxu2 %v7021_v41  ;;  %v7028_v63 = vld [vmem:[#allocation24_spill] sm:$0xff] }
  0x83   :  { %2908 = vmatmul.msk.f32.gmra.mxu0 %vm193_vm0, %v7020_v15  ;;  %2916 = vmatmul.msk.f32.gmra.mxu1 %vm193_vm0, %v7020_v15  ;;  %v7027_v15 = vld [vmem:[#allocation9_spill] sm:$0xff] }
  0x84   :  { %893 = vmatpush.msra.mxu3 %v7022_v61  ;;  %800 = vmatpush.msrb.mxu0 %v4133_v51  ;;  %v7030_v61 = vld [vmem:[#allocation10_spill] sm:$0xff] }
  0x85   :  { %874 = vmatpush.msra.mxu2 %v7024_v16  ;;  %863 = vmatpush.msrb.mxu1 %v7026_v25  ;;  %v7031_v51 = vld [vmem:[#allocation26_spill] sm:$0xff]  ;;  %v7033_v25 = vld [vmem:[#allocation40_spill] sm:$0xff] }
  0x86   :  { %894 = vmatpush.msra.mxu3 %v7025_v62  ;;  %v7032_v62 = vld [vmem:[#allocation11_spill] sm:$0xff] }
  0x87   :  { %v4307_v40 = vpop.f32.mrf.mxu0  ;;  %v4309_v17 = vpop.f32.mrf.mxu1  ;;  %875 = vmatpush.msra.mxu2 %v7027_v15  ;;  %864 = vmatpush.msrb.mxu1 %v7029_v18 }
  0x88   :  { %895 = vmatpush.msra.mxu3 %v7028_v63 }
  0x89   :  { %876 = vmatpush.msra.mxu2 %v7030_v61  ;;  %865 = vmatpush.msrb.mxu1 %v7033_v25  ;;  %v7040_v25 = vld [vmem:[#allocation21_spill] sm:$0xff] }
  0x8a   :  { %896 = vmatpush.msra.mxu3 %v7031_v51 }
  0x8b   :  { %665 = vmatmul.f32.vlgmr.msra.gmra.mxu0 %v4142_v11  ;;  %685 = vmatmul.f32.vlgmr.msra.gmra.mxu1 %v4142_v11 }
  0x8c   :  { %877 = vmatpush.msra.mxu2 %v7032_v62  ;;  %969 = vmatpush.msra.mxu0 %v3517_v20  ;;  %v7039_v62 = vld [vmem:[#allocation37_spill] sm:$0xff]  ;;  %v7041_v20 = vld [vmem:[#allocation44_spill] sm:$0xff] }
  0x8d   :  { %897 = vmatpush.msra.mxu3 %v7034_v52  ;;  %866 = vmatpush.msrb.mxu1 %v4078_v24  ;;  %v7042_v52 = vld [vmem:[#allocation25_spill] sm:$0xff] }
  0x8e   :  { %878 = vmatpush.msra.mxu2 %v7035_v12  ;;  %v4323_v63 = vpop.f32.mrf.mxu2  ;;  %v4325_v18 = vpop.f32.mrf.mxu3  ;;  %970 = vmatpush.msra.mxu0 %v3534_v23  ;;  %v7044_v23 = vld [vmem:[#allocation46_spill] sm:$0xff] }
  0x8f   :  { %7036 = vst [vmem:[#allocation6_spill] sm:$0xff] %v4325_v18  ;;  %v4329_v11 = vpop.f32.mrf.mxu0  ;;  %v4331_v51 = vpop.f32.mrf.mxu1  ;;  %898 = vmatpush.msra.mxu3 %v7039_v62  ;;  %867 = vmatpush.msrb.mxu1 %v4114_v59  ;;  %v7043_v18 = vld [vmem:[#allocation48_spill] sm:$0xff] }
  0x90   :  { %7037 = vst [vmem:[#allocation8_spill] sm:$0xff] %v4329_v11  ;;  %879 = vmatpush.msra.mxu2 %v7040_v25  ;;  %971 = vmatpush.msra.mxu0 %v3552_v27  ;;  %v7045_v11 = vld [vmem:[#allocation32_spill] sm:$0xff] }
  0x91   :  { %7038 = vst [vmem:[#allocation7_spill] sm:$0xff] %v4331_v51  ;;  %899 = vmatpush.msra.mxu3 %v7041_v20  ;;  %868 = vmatpush.msrb.mxu1 %v7043_v18  ;;  %v7046_v51 = vld [vmem:[#allocation36_spill] sm:$0xff] }
  0x92   :  { %880 = vmatpush.msra.mxu2 %v7042_v52  ;;  %972 = vmatpush.msra.mxu0 %v3571_v30 }
  0x93   :  { %900 = vmatpush.msra.mxu3 %v7044_v23  ;;  %989 = vmatpush.msra.mxu1 %v3512_v19  ;;  %v7051_v19 = vld [vmem:[#allocation43_spill] sm:$0xff] }
  0x94   :  { %881 = vmatpush.msra.mxu2 %v7045_v11  ;;  %973 = vmatpush.msra.mxu0 %v3589_v32  ;;  %v7052_v32 = vld [vmem:[#allocation53_spill] sm:$0xff] }
  0x95   :  { %901 = vmatpush.msra.mxu3 %v4158_v57  ;;  %990 = vmatpush.msra.mxu1 %v3529_v22  ;;  %v7054_v22 = vld [vmem:[#allocation54_spill] sm:$0xff] }
  0x96   :  { %882 = vmatpush.msra.mxu2 %v7046_v51  ;;  %v4347_v27 = vpop.f32.mrf.mxu2  ;;  %v4349_v20 = vpop.f32.mrf.mxu3  ;;  %974 = vmatpush.msra.mxu0 %v3601_v34  ;;  %v7055_v34 = vld [vmem:[#allocation51_spill] sm:$0xff] }
  0x97   :  { %7047 = vst [vmem:[#allocation18_spill] sm:$0xff] %v4347_v27  ;;  %v4353_v30 = vpop.f32.mrf.mxu0  ;;  %v4355_v23 = vpop.f32.mrf.mxu1  ;;  %902 = vmatpush.msra.mxu3 %v4165_v2  ;;  %991 = vmatpush.msra.mxu1 %v3547_v26  ;;  %v7053_v27 = vld [vmem:[#allocation45_spill] sm:$0xff]  ;;  %v7056_v26 = vld [vmem:[#allocation52_spill] sm:$0xff] }
  0x98   :  { %7048 = vst [vmem:[#allocation4_spill] sm:$0xff] %v4349_v20  ;;  %883 = vmatpush.msra.mxu2 %v7051_v19  ;;  %975 = vmatpush.msra.mxu0 %v3620_v37 }
  0x99   :  { %7049 = vst [vmem:[#allocation5_spill] sm:$0xff] %v4353_v30  ;;  %903 = vmatpush.msra.mxu3 %v7052_v32  ;;  %992 = vmatpush.msra.mxu1 %v3565_v29 }
  0x9a   :  { %7050 = vst [vmem:[#allocation9_spill] sm:$0xff] %v4355_v23  ;;  %884 = vmatpush.msra.mxu2 %v7053_v27  ;;  %976 = vmatpush.msra.mxu0 %v3638_v39 }
  0x9b   :  { %904 = vmatpush.msra.mxu3 %v7054_v22  ;;  %993 = vmatpush.msra.mxu1 %v3584_v31  ;;  %v7061_v31 = vld [vmem:[#allocation55_spill] sm:$0xff] }
  0x9c   :  { %885 = vmatpush.msra.mxu2 %v7055_v34  ;;  %977 = vmatpush.msra.mxu0 %v3656_v43 }
  0x9d   :  { %905 = vmatpush.msra.mxu3 %v4205_v28  ;;  %994 = vmatpush.msra.mxu1 %v3596_v33 }
  0x9e   :  { %886 = vmatpush.msra.mxu2 %v7056_v26  ;;  %v4371_v37 = vpop.f32.mrf.mxu2  ;;  %v4373_v20 = vpop.f32.mrf.mxu3  ;;  %978 = vmatpush.msra.mxu0 %v3675_v46 }
  0x9f   :  { %7057 = vst [vmem:[#allocation10_spill] sm:$0xff] %v4371_v37  ;;  %v4377_v29 = vpop.f32.mrf.mxu0  ;;  %v4379_v39 = vpop.f32.mrf.mxu1  ;;  %906 = vmatpush.msra.mxu3 %v4217_v44  ;;  %995 = vmatpush.msra.mxu1 %v3615_v36 }
  0xa0   :  { %7058 = vst [vmem:[#allocation14_spill] sm:$0xff] %v4373_v20  ;;  %887 = vmatpush.msra.mxu2 %v7061_v31  ;;  %979 = vmatpush.msra.mxu0 %v3693_v48 }
  0xa1   :  { %7059 = vst [vmem:[#allocation37_spill] sm:$0xff] %v4377_v29  ;;  %907 = vmatpush.msra.mxu3 %v4229_v35  ;;  %996 = vmatpush.msra.mxu1 %v3633_v38 }
  0xa2   :  { %7060 = vst [vmem:[#allocation21_spill] sm:$0xff] %v4379_v39  ;;  %888 = vmatpush.msra.mxu2 %v4212_v21  ;;  %980 = vmatpush.msra.mxu0 %v3705_v50 }
  0xa3   :  { %908 = vmatpush.msra.mxu3 %v4235_v14  ;;  %997 = vmatpush.msra.mxu1 %v3651_v42 }
  0xa4   :  { %981 = vmatpush.msra.mxu0 %v3727_v54 }
  0xa5   :  { %998 = vmatpush.msra.mxu1 %v3670_v45 }
  0xa6   :  { %v4392_v33 = vpop.f32.mrf.mxu2  ;;  %v4394_v43 = vpop.f32.mrf.mxu3  ;;  %982 = vmatpush.msra.mxu0 %v3745_v56 }
  0xa7   :  { %7062 = vst [vmem:[#allocation25_spill] sm:$0xff] %v4392_v33  ;;  %v4398_v36 = vpop.f32.mrf.mxu0  ;;  %v4400_v46 = vpop.f32.mrf.mxu1  ;;  %999 = vmatpush.msra.mxu1 %v3688_v47  ;;  %v179_v47 = vld [vmem:[%s6689_s3] sm:$0x3f] }
  0xa8   :  { %7063 = vst [vmem:[#allocation48_spill] sm:$0xff] %v4394_v43  ;;  %983 = vmatpush.msra.mxu0 %v3767_v60  ;;  %v4423_v50 = vperm.slane %v179_v47, 3 }
  0xa9   :  { %7064 = vst [vmem:[#allocation32_spill] sm:$0xff] %v4398_v36  ;;  %1000 = vmatpush.msra.mxu1 %v3700_v49  ;;  %v4421_v49 = vperm.slane %v179_v47, 2 }
  0xaa   :  { %7065 = vst [vmem:[#allocation36_spill] sm:$0xff] %v4400_v46  ;;  %984 = vmatpush.msra.mxu0 %v7017_v8 }
  0xab   :  { %1001 = vmatpush.msra.mxu1 %v3722_v53  ;;  %7070 = vst [vmem:[#allocation51_spill] sm:$0xff] %v4423_v50 }
  0xad   :  { %1002 = vmatpush.msra.mxu1 %v3740_v55 }
  0xae   :  { %v4407_v38 = vpop.f32.mrf.mxu2  ;;  %v4409_v42 = vpop.f32.mrf.mxu3 }
  0xaf   :  { %7066 = vst [vmem:[#allocation43_spill] sm:$0xff] %v4407_v38  ;;  %v4412_v45 = vpop.f32.mrf.mxu0  ;;  %v4414_v48 = vpop.f32.mrf.mxu1  ;;  %1003 = vmatpush.msra.mxu1 %v7016_v5  ;;  %v4452_v38 = vperm.slane %v179_v47, 0 }
  0xb0   :  { %7067 = vst [vmem:[#allocation53_spill] sm:$0xff] %v4409_v42 }
  0xb1   :  { %7068 = vst [vmem:[#allocation45_spill] sm:$0xff] %v4412_v45  ;;  %1004 = vmatpush.msra.mxu1 %v7019_v58 }
  0xb2   :  { %7069 = vst [vmem:[#allocation54_spill] sm:$0xff] %v4414_v48 }
  0xb3   :  { %7082 = vst [vmem:[#allocation65_spill] sm:$0xff] %v4452_v38 }
  0xb6   :  { %v332_v53 = vpop.f32.mrf.mxu2  ;;  %v373_v54 = vpop.f32.mrf.mxu3 }
  0xb7   :  { %v4426_v55 = vadd.f32 %v332_v53, %v4421_v49  ;;  %v4429_v56 = vadd.f32 %v373_v54, %v4423_v50 }
  0xb8   :  { %v4431_v60 = vpop.f32.mrf.mxu0  ;;  %v4433_v5 = vpop.f32.mrf.mxu1 }
  0xb9   :  { %7071 = vst [vmem:[#allocation52_spill] sm:$0xff] %v4426_v55 }
  0xba   :  { %7072 = vst [vmem:[#allocation55_spill] sm:$0xff] %v4429_v56 }
  0xbb   :  { %7073 = vst [vmem:[#allocation56_spill] sm:$0xff] %v4431_v60 }
  0xbc   :  { %7074 = vst [vmem:[#allocation57_spill] sm:$0xff] %v4433_v5 }
  0xbf   :  { %v335_v58 = vpop.f32.mrf.mxu2  ;;  %v376_v8 = vpop.f32.mrf.mxu3 }
  0xc0   :  { %v4436_v20 = vadd.f32 %v335_v58, %v4421_v49  ;;  %v4439_v48 = vadd.f32 %v376_v8, %v4423_v50  ;;  %v4441_v45 = vpop.f32.mrf.mxu0  ;;  %v4443_v43 = vpop.f32.mrf.mxu1  ;;  %v4454_v58 = vperm.slane %v179_v47, 1  ;;  %v236_v8 = vadd.f32 %v4307_v40, %v4452_v38 }
  0xc1   :  { %7077 = vst [vmem:[#allocation60_spill] sm:$0xff] %v4441_v45 }
  0xc2   :  { %7075 = vst [vmem:[#allocation58_spill] sm:$0xff] %v4436_v20  ;;  %v277_v45 = vadd.f32 %v4309_v17, %v4454_v58 }
  0xc3   :  { %7076 = vst [vmem:[#allocation59_spill] sm:$0xff] %v4439_v48 }
  0xc4   :  { %7078 = vst [vmem:[#allocation61_spill] sm:$0xff] %v4443_v43 }
  0xc5   :  { %7083 = vst [vmem:[#allocation66_spill] sm:$0xff] %v4454_v58 }
  0xc7   :  { %v338_v53 = vpop.f32.mrf.mxu2  ;;  %v379_v55 = vpop.f32.mrf.mxu3 }
  0xc8   :  { %v4446_v54 = vadd.f32 %v338_v53, %v4421_v49  ;;  %v4448_v60 = vpop.f32.mrf.mxu0  ;;  %v4450_v5 = vpop.f32.mrf.mxu1 }
  0xc9   :  { %7080 = vst [vmem:[#allocation63_spill] sm:$0xff] %v4448_v60 }
  0xca   :  { %7079 = vst [vmem:[#allocation62_spill] sm:$0xff] %v4446_v54 }
  0xcb   :  { %7081 = vst [vmem:[#allocation64_spill] sm:$0xff] %v4450_v5 }
  0xcf   :  { %v538_v43 = vpop.f32.mrf.mxu2  ;;  %v558_v20 = vpop.f32.mrf.mxu3 }
  0xd0   :  { %v581_v46 = vadd.f32 %v538_v43, %v236_v8  ;;  %v601_v36 = vadd.f32 %v558_v20, %v277_v45  ;;  %v4460_v53 = vpop.f32.mrf.mxu0  ;;  %v4462_v54 = vpop.f32.mrf.mxu1 }
  0xd1   :  { %7084 = vst [vmem:[#allocation67_spill] sm:$0xff] %v4460_v53 }
  0xd2   :  { %7085 = vst [vmem:[#allocation68_spill] sm:$0xff] %v4462_v54  ;;  %v2918_v60 = vmul.f32 -1.442695, %v581_v46  ;;  %v2919_v5 = vmul.f32 -1.442695, %v601_v36  ;;  %v380_v46 = vadd.f32 %v379_v55, %v4423_v50  ;;  %v4473_v54 = vperm.slane %v179_v47, 4 }
  0xd4   :  { %2957 = vpow2.f32 %v2918_v60  ;;  %7090 = vst [vmem:[#allocation73_spill] sm:$0xff] %v4473_v54 }
  0xd5   :  { %2959 = vpow2.f32 %v2919_v5 }
  0xd8   :  { %v4464_v42 = vpop.f32.mrf.mxu0  ;;  %v4466_v33 = vpop.f32.mrf.mxu1 }
  0xd9   :  { %7086 = vst [vmem:[#allocation69_spill] sm:$0xff] %v4464_v42  ;;  %v4480_v42 = vld [vmem:[%s6690_s5] sm:$0xff] }
  0xda   :  { %7087 = vst [vmem:[#allocation70_spill] sm:$0xff] %v4466_v33  ;;  %v2958_v40 = vpop.eup %2957  ;;  %v4475_v33 = vperm.slane %v179_v47, 5 }
  0xdb   :  { %v2960_v39 = vpop.eup %2959  ;;  %v585_v29 = vadd.f32 1.0, %v2958_v40 }
  0xdc   :  { %v605_v17 = vadd.f32 1.0, %v2960_v39  ;;  %7091 = vst [vmem:[#allocation74_spill] sm:$0xff] %v4475_v33 }
  0xdd   :  { %2961 = vrcp.f32 %v585_v29  ;;  %v595_v37 = vand.u32 2147483647, %v585_v29  ;;  %vm591_vm2 = vweird.f32 %v585_v29 }
  0xde   :  { %2963 = vrcp.f32 %v605_v17  ;;  %vm611_vm6 = vweird.f32 %v605_v17 }
  0xdf   :  { %v646_v60 = vpop.f32.mrf.mxu3  ;;  %vm596_vm4 = vcmp.eq.f32.partialorder %v595_v37, 8.507059e+37 }
  0xe0   :  { %v4468_v43 = vpop.f32.mrf.mxu0  ;;  %v4470_v20 = vpop.f32.mrf.mxu1  ;;  %v689_v39 = vadd.f32 %v646_v60, %v380_v46 }
  0xe1   :  { %7088 = vst [vmem:[#allocation71_spill] sm:$0xff] %v4468_v43  ;;  %v597_v43 = vand.u32 2147483648, %v585_v29 }
  0xe2   :  { %7089 = vst [vmem:[#allocation72_spill] sm:$0xff] %v4470_v20  ;;  %v578_v20 = vpop.f32.mrf.mxu2 }
  0xe3   :  { %v2962_v45 = vpop.eup %2961  ;;  %v621_v60 = vadd.f32 %v578_v20, %v4480_v42 }
  0xe4   :  { %v2964_v36 = vpop.eup %2963  ;;  %v587_v5 = vmul.f32 %v2962_v45, %v585_v29  ;;  %vm592_vm1 = vweird.f32 %v2962_v45 }
  0xe5   :  { %v607_v8 = vmul.f32 %v2964_v36, %v605_v17  ;;  %vm593_vm3 = vmor %vm591_vm2, %vm592_vm1  ;;  %vm612_vm5 = vweird.f32 %v2964_v36 }
  0xe6   :  { %v588_v53 = vsub.f32 1.0, %v587_v5  ;;  %v2920_v5 = vmul.f32 -1.442695, %v689_v39  ;;  %vm613_vm7 = vmor %vm611_vm6, %vm612_vm5 }
  0xe7   :  { %v608_v40 = vsub.f32 1.0, %v607_v8  ;;  %v598_v8 = vor.u32 1.1754944e-38, %v597_v43 }
  0xe8   :  { %v411_v56 = vpop.f32.mrf.mxu0  ;;  %v452_v55 = vpop.f32.mrf.mxu1  ;;  %v589_v50 = vmul.f32 %v2962_v45, %v588_v53  ;;  %2965 = vpow2.f32 %v2920_v5 }
  0xe9   :  { %v609_v23 = vmul.f32 %v2964_v36, %v608_v40  ;;  %v4483_v30 = vadd.f32 %v411_v56, %v4473_v54  ;;  %v4486_v47 = vadd.f32 %v452_v55, %v4475_v33  ;;  %v318_v40 = vadd.f32 %v4323_v63, %v4421_v49 }
  0xea   :  { %v590_v46 = vadd.f32 %v2962_v45, %v589_v50  ;;  %v617_v56 = vand.u32 2147483648, %v605_v17  ;;  %v615_v55 = vand.u32 2147483647, %v605_v17 }
  0xeb   :  { %7092 = vst [vmem:[#allocation75_spill] sm:$0xff] %v4483_v30  ;;  %v610_v58 = vadd.f32 %v2964_v36, %v609_v23 }
  0xec   :  { %7093 = vst [vmem:[#allocation76_spill] sm:$0xff] %v4486_v47  ;;  %v594_v48 = vsel %vm593_vm3, %v2962_v45, %v590_v46  ;;  %v618_v37 = vor.u32 1.1754944e-38, %v617_v56  ;;  %vm616_vm8 = vcmp.eq.f32.partialorder %v615_v55, 8.507059e+37 }
  0xed   :  { %v599_v53 = vsel %vm596_vm4, %v598_v8, %v594_v48  ;;  %v614_v39 = vsel %vm613_vm7, %v2964_v36, %v610_v58  ;;  %v7095_v8 = vld [vmem:[#allocation29_spill] sm:$0xff] }
  0xee   :  { %v622_v30 = vmul.f32 %v621_v60, %v599_v53  ;;  %v619_v63 = vsel %vm616_vm8, %v618_v37, %v614_v39  ;;  %v2966_v48 = vpop.eup %2965  ;;  %v7105_v39 = vld [vmem:[#allocation28_spill] sm:$0xff]  ;;  %v7106_v37 = vld [vmem:[#allocation27_spill] sm:$0xff] }
  0xef   :  { %v625_v45 = vsub.f32 1.0, %v619_v63  ;;  %v4497_v17 = vadd.f32 1.0, %v2966_v48  ;;  %v627_v58 = vmul.f32 %v619_v63, %v7095_v8  ;;  %v7108_v63 = vld [vmem:[#allocation30_spill] sm:$0xff]  ;;  %v7114_v8 = vld [vmem:[#allocation39_spill] sm:$0xff] }
  0xf0   :  { %v623_v29 = vadd.f32 %v622_v30, %v318_v40  ;;  %v414_v50 = vpop.f32.mrf.mxu0  ;;  %v455_v20 = vpop.f32.mrf.mxu1 }
  0xf1   :  { %v4492_v43 = vadd.f32 %v414_v50, %v4473_v54  ;;  %v4495_v23 = vadd.f32 %v455_v20, %v4475_v33  ;;  %v7104_v50 = vld [vmem:[#allocation22_spill] sm:$0xff]  ;;  %vm699_vm9 = vweird.f32 %v4497_v17 }
  0xf2   :  { %2967 = vtanh.f32 %v623_v29  ;;  %v7103_v29 = vld [vmem:[#allocation23_spill] sm:$0xff] }
  0xf3   :  { %7094 = vst [vmem:[#allocation77_spill] sm:$0xff] %v4495_v23  ;;  %2969 = vrcp.f32 %v4497_v17 }
  0xf8   :  { %v2968_v46 = vpop.eup %2967  ;;  %v417_v60 = vpop.f32.mrf.mxu0 }
  0xf9   :  { %v458_v30 = vpop.f32.mrf.mxu1  ;;  %v626_v5 = vmul.f32 %v2968_v46, %v625_v45  ;;  %v4501_v36 = vadd.f32 %v417_v60, %v4473_v54  ;;  %v2970_v55 = vpop.eup %2969  ;;  %v7109_v45 = vld [vmem:[#allocation35_spill] sm:$0xff] }
  0xfa   :  { %v4504_v53 = vadd.f32 %v458_v30, %v4475_v33  ;;  %vm700_vm10 = vweird.f32 %v2970_v55  ;;  %v4627_v30 = vld [vmem:[%s6686_s4 + $0x120] sm:$0xff] }
  0xfb   :  { %v4506_v40 = vadd.f32 %v627_v58, %v626_v5  ;;  %vm4553_vm11 = vmor %vm699_vm9, %vm700_vm10  ;;  %v7113_v5 = vld [vmem:[#allocation34_spill] sm:$0xff] }
  0xfc   :  { %v7115_v58 = vld [vmem:[#allocation38_spill] sm:$0xff] }
  0xfd   :  { %7096 = vst [vmem:[#allocation29_spill] sm:$0xff] %v4506_v40  ;;  %761 = vmatmul.f32.vlgmr.msrb.gmra.mxu2 %v4506_v40  ;;  %781 = vmatmul.f32.vlgmr.msrb.gmra.mxu3 %v4506_v40 }
  0xfe   :  { %801 = vmatmul.f32.vlgmr.msrb.gmra.mxu0 %v4506_v40  ;;  %1009 = vmatpush.msrb.mxu2 %v3802_v1 }
  0xff   :  { %1077 = vmatpush.msrb.mxu3 %v3797_v0  ;;  %1097 = vmatpush.msrb.mxu0 %v7021_v41  ;;  %v695_v0 = vmul.f32 %v2970_v55, %v4497_v17 }
 0x100   :  { %v420_v56 = vpop.f32.mrf.mxu0  ;;  %1010 = vmatpush.msrb.mxu2 %v3823_v4  ;;  %v7098_v4 = vld [vmem:[#allocation11_spill] sm:$0xff] }
 0x101   :  { %1078 = vmatpush.msrb.mxu3 %v3817_v3  ;;  %1098 = vmatpush.msrb.mxu0 %v7024_v16  ;;  %v421_v1 = vadd.f32 %v420_v56, %v4473_v54  ;;  %v7097_v3 = vld [vmem:[#allocation12_spill] sm:$0xff]  ;;  %v461_v41 = vpop.f32.mrf.mxu1 }
 0x102   :  { %1011 = vmatpush.msrb.mxu2 %v3840_v7 }
 0x103   :  { %1079 = vmatpush.msrb.mxu3 %v3835_v6  ;;  %1099 = vmatpush.msrb.mxu0 %v7027_v15  ;;  %v7099_v6 = vld [vmem:[#allocation16_spill] sm:$0xff] }
 0x104   :  { %1012 = vmatpush.msrb.mxu2 %v3861_v10  ;;  %v7100_v10 = vld [vmem:[#allocation15_spill] sm:$0xff] }
 0x105   :  { %1080 = vmatpush.msrb.mxu3 %v3855_v9  ;;  %1100 = vmatpush.msrb.mxu0 %v7030_v61  ;;  %v696_v9 = vsub.f32 1.0, %v695_v0  ;;  %v7101_v61 = vld [vmem:[#allocation20_spill] sm:$0xff] }
 0x106   :  { %1013 = vmatpush.msrb.mxu2 %v3884_v13  ;;  %v7102_v13 = vld [vmem:[#allocation19_spill] sm:$0xff] }
 0x107   :  { %1081 = vmatpush.msrb.mxu3 %v7097_v3  ;;  %1101 = vmatpush.msrb.mxu0 %v7098_v4  ;;  %v697_v20 = vmul.f32 %v2970_v55, %v696_v9  ;;  %v7117_v3 = vld [vmem:[#allocation40_spill] sm:$0xff] }
 0x108   :  { %v666_v7 = vpop.f32.mrf.mxu0  ;;  %1014 = vmatpush.msrb.mxu2 %v7099_v6 }
 0x109   :  { %v709_v16 = vadd.f32 %v666_v7, %v421_v1  ;;  %1082 = vmatpush.msrb.mxu3 %v7100_v10  ;;  %1102 = vmatpush.msrb.mxu0 %v7035_v12  ;;  %v7107_v12 = vld [vmem:[#allocation31_spill] sm:$0xff]  ;;  %v698_v48 = vadd.f32 %v2970_v55, %v697_v20  ;;  %v686_v60 = vpop.f32.mrf.mxu1  ;;  %v7116_v1 = vld [vmem:[#allocation41_spill] sm:$0xff] }
 0x10a   :  { %1015 = vmatpush.msrb.mxu2 %v7101_v61 }
 0x10b   :  { %v2921_v15 = vmul.f32 -1.442695, %v709_v16  ;;  %1083 = vmatpush.msrb.mxu3 %v7102_v13  ;;  %1103 = vmatpush.msrb.mxu0 %v7040_v25  ;;  %v705_v25 = vand.u32 2147483648, %v4497_v17  ;;  %v702_v56 = vsel %vm4553_vm11, %v2970_v55, %v698_v48  ;;  %v7119_v55 = vld [vmem:[#allocation47_spill] sm:$0xff]  ;;  %v7120_v16 = vld [vmem:[#allocation49_spill] sm:$0xff] }
 0x10c   :  { %1016 = vmatpush.msrb.mxu2 %v7103_v29  ;;  %v4607_v48 = vld [vmem:[%s6686_s4 + $0x158] sm:$0xff] }
 0x10d   :  { %2971 = vpow2.f32 %v2921_v15  ;;  %1084 = vmatpush.msrb.mxu3 %v7104_v50  ;;  %1104 = vmatpush.msrb.mxu0 %v7042_v52  ;;  %v703_v52 = vand.u32 2147483647, %v4497_v17  ;;  %v706_v17 = vor.u32 1.1754944e-38, %v705_v25  ;;  %v7124_v25 = vld [vmem:[#allocation17_spill] sm:$0xff] }
 0x10e   :  { %1017 = vmatpush.msrb.mxu2 %v7105_v39  ;;  %v7123_v39 = vld [vmem:[#allocation13_spill] sm:$0xff] }
 0x10f   :  { %1085 = vmatpush.msrb.mxu3 %v7106_v37  ;;  %1105 = vmatpush.msrb.mxu0 %v7045_v11  ;;  %v4551_v11 = vld [vmem:[%s6691_s7] sm:$0xff]  ;;  %vm704_vm12 = vcmp.eq.f32.partialorder %v703_v52, 8.507059e+37  ;;  %v4588_v37 = vld [vmem:[%s6686_s4 + $0x168] sm:$0xff] }
 0x110   :  { %1018 = vmatpush.msrb.mxu2 %v7107_v12  ;;  %7110 = vst [vmem:[#allocation12_spill] sm:$0xff] %v4551_v11  ;;  %v729_v0 = vadd.f32 %v686_v60, %v4551_v11  ;;  %v707_v4 = vsel %vm704_vm12, %v706_v17, %v702_v56  ;;  %v4594_v12 = vld [vmem:[%s6686_s4 + $0x170] sm:$0xff]  ;;  %v7125_v52 = vld [vmem:[#allocation24_spill] sm:$0xff]  ;;  %v4659_v56 = vld [vmem:[%s6686_s4 + $0xf8] sm:$0xff] }
 0x111   :  { %1086 = vmatpush.msrb.mxu3 %v7108_v63  ;;  %1106 = vmatpush.msrb.mxu0 %v7046_v51  ;;  %v4601_v63 = vld [vmem:[%s6686_s4 + $0x150] sm:$0xff] }
 0x112   :  { %1019 = vmatpush.msrb.mxu2 %v7109_v45  ;;  %v730_v7 = vmul.f32 %v729_v0, %v707_v4  ;;  %v4614_v45 = vld [vmem:[%s6686_s4 + $0x138] sm:$0xff]  ;;  %v7126_v60 = vld [vmem:[#allocation26_spill] sm:$0xff]  ;;  %v7128_v0 = vld [vmem:[#allocation44_spill] sm:$0xff] }
 0x113   :  { %v2972_v46 = vpop.eup %2971  ;;  %1087 = vmatpush.msrb.mxu3 %v7113_v5  ;;  %1107 = vmatpush.msrb.mxu0 %v7051_v19  ;;  %v7118_v19 = vld [vmem:[#allocation42_spill] sm:$0xff]  ;;  %v4633_v5 = vld [vmem:[%s6686_s4 + $0x128] sm:$0xff] }
 0x114   :  { %v713_v51 = vadd.f32 1.0, %v2972_v46  ;;  %1020 = vmatpush.msrb.mxu2 %v7114_v8  ;;  %v4620_v46 = vld [vmem:[%s6686_s4 + $0x140] sm:$0xff]  ;;  %v4640_v8 = vld [vmem:[%s6686_s4 + $0x108] sm:$0xff]  ;;  %v4646_v17 = vld [vmem:[%s6686_s4 + $0x110] sm:$0xff] }
 0x115   :  { %1088 = vmatpush.msrb.mxu3 %v7115_v58  ;;  %1108 = vmatpush.msrb.mxu0 %v7053_v27  ;;  %v462_v27 = vadd.f32 %v461_v41, %v4475_v33  ;;  %v4653_v58 = vld [vmem:[%s6686_s4 + $0xf0] sm:$0xff]  ;;  %v4685_v4 = vld [vmem:[%s6686_s4 + $0xc8] sm:$0xff] }
 0x116   :  { %2973 = vrcp.f32 %v713_v51  ;;  %1021 = vmatpush.msrb.mxu2 %v7116_v1  ;;  %v723_v41 = vand.u32 2147483647, %v713_v51  ;;  %vm719_vm14 = vweird.f32 %v713_v51  ;;  %v4672_v1 = vld [vmem:[%s6686_s4 + $0xe0] sm:$0xff]  ;;  %7131 = vst [vmem:[#allocation15_spill] sm:$0xff] %v4685_v4 }
 0x117   :  { %1089 = vmatpush.msrb.mxu3 %v7117_v3  ;;  %1109 = vmatpush.msrb.mxu0 %v7055_v34  ;;  %7129 = vst [vmem:[#allocation16_spill] sm:$0xff] %v4672_v1  ;;  %v7130_v3 = vld [vmem:[#allocation46_spill] sm:$0xff] }
 0x118   :  { %1022 = vmatpush.msrb.mxu2 %v7118_v19  ;;  %vm724_vm0 = vcmp.eq.f32.partialorder %v723_v41, 8.507059e+37  ;;  %v4679_v19 = vld [vmem:[%s6686_s4 + $0xc0] sm:$0xff] }
 0x119   :  { %1090 = vmatpush.msrb.mxu3 %v4078_v24  ;;  %1110 = vmatpush.msrb.mxu0 %v7056_v26  ;;  %v731_v24 = vadd.f32 %v730_v7, %v462_v27  ;;  %v725_v26 = vand.u32 2147483648, %v713_v51  ;;  %v4692_v27 = vld [vmem:[%s6686_s4 + $0xa8] sm:$0xff]  ;;  %v4698_v7 = vld [vmem:[%s6686_s4 + $0xb0] sm:$0xff] }
 0x11a   :  { %1023 = vmatpush.msrb.mxu2 %v7119_v55  ;;  %7132 = vst [vmem:[#allocation20_spill] sm:$0xff] %v4692_v27  ;;  %v4711_v55 = vld [vmem:[%s6686_s4 + $0x98] sm:$0xff] }
 0x11b   :  { %1091 = vmatpush.msrb.mxu3 %v4114_v59  ;;  %1111 = vmatpush.msrb.mxu0 %v7061_v31  ;;  %2975 = vtanh.f32 %v731_v24  ;;  %v726_v59 = vor.u32 1.1754944e-38, %v725_v26  ;;  %7133 = vst [vmem:[#allocation19_spill] sm:$0xff] %v4698_v7  ;;  %v4763_v24 = vld [vmem:[%s6686_s4 + $0x38] sm:$0xff]  ;;  %v4789_v26 = vld [vmem:[%s6686_s4 + $0x8] sm:$0xff] }
 0x11c   :  { %v2974_v6 = vpop.eup %2973  ;;  %1024 = vmatpush.msrb.mxu2 %v7120_v16  ;;  %7135 = vst [vmem:[#allocation22_spill] sm:$0xff] %v4711_v55  ;;  %v4737_v16 = vld [vmem:[%s6686_s4 + $0x68] sm:$0xff] }
 0x11d   :  { %v715_v34 = vmul.f32 %v2974_v6, %v713_v51  ;;  %1092 = vmatpush.msrb.mxu3 %v7043_v18  ;;  %1112 = vmatpush.msrb.mxu0 %v4212_v21  ;;  %vm720_vm13 = vweird.f32 %v2974_v6  ;;  %v7121_v18 = vld [vmem:[#allocation50_spill] sm:$0xff]  ;;  %v7127_v51 = vld [vmem:[#allocation33_spill] sm:$0xff]  ;;  %7139 = vst [vmem:[#allocation30_spill] sm:$0xff] %v4737_v16 }
 0x11e   :  { %vm721_vm15 = vmor %vm719_vm14, %vm720_vm13  ;;  %7143 = vst [vmem:[#allocation38_spill] sm:$0xff] %v4763_v24 }
 0x11f   :  { %v716_v10 = vsub.f32 1.0, %v715_v34  ;;  %v4750_v34 = vld [vmem:[%s6686_s4 + $0x50] sm:$0xff]  ;;  %7147 = vst [vmem:[#allocation47_spill] sm:$0xff] %v4789_v26 }
 0x120   :  { %7141 = vst [vmem:[#allocation34_spill] sm:$0xff] %v4750_v34 }
 0x121   :  { %v717_v9 = vmul.f32 %v2974_v6, %v716_v10  ;;  %v2976_v29 = vpop.eup %2975  ;;  %v4776_v10 = vld [vmem:[%s6686_s4 + $0x20] sm:$0xff] }
 0x122   :  { %7145 = vst [vmem:[#allocation40_spill] sm:$0xff] %v4776_v10 }
 0x123   :  { %v718_v61 = vadd.f32 %v2974_v6, %v717_v9  ;;  %v7148_v9 = vld [vmem:[#allocation8_spill] sm:$0xff] }
 0x124   :  { %v239_v41 = vadd.f32 %v7148_v9, %v4452_v38 }
 0x125   :  { %v722_v31 = vsel %vm721_vm15, %v2974_v6, %v718_v61  ;;  %v4724_v6 = vld [vmem:[%s6686_s4 + $0x80] sm:$0xff]  ;;  %v7149_v61 = vld [vmem:[#allocation66_spill] sm:$0xff] }
 0x126   :  { %v727_v15 = vsel %vm724_vm0, %v726_v59, %v722_v31  ;;  %7137 = vst [vmem:[#allocation27_spill] sm:$0xff] %v4724_v6  ;;  %v7150_v59 = vld [vmem:[#allocation7_spill] sm:$0xff] }
 0x127   :  { %v733_v13 = vsub.f32 1.0, %v727_v15  ;;  %v735_v20 = vmul.f32 %v7121_v18, %v727_v15 }
 0x129   :  { %v734_v50 = vmul.f32 %v2976_v29, %v733_v13 }
 0x12b   :  { %v4579_v21 = vadd.f32 %v735_v20, %v734_v50 }
 0x12d   :  { %7122 = vst [vmem:[#allocation11_spill] sm:$0xff] %v4579_v21  ;;  %869 = vmatmul.f32.vlgmr.msrb.gmra.mxu1 %v4579_v21  ;;  %889 = vmatmul.f32.vlgmr.msra.gmra.mxu2 %v4579_v21 }
 0x12e   :  { %909 = vmatmul.f32.vlgmr.msra.gmra.mxu3 %v4579_v21  ;;  %1117 = vmatpush.msrb.mxu1 %v7123_v39 }
 0x12f   :  { %1193 = vmatpush.msra.mxu2 %v4588_v37  ;;  %1213 = vmatpush.msra.mxu3 %v4594_v12 }
 0x130   :  { %1118 = vmatpush.msrb.mxu1 %v7124_v25 }
 0x131   :  { %1194 = vmatpush.msra.mxu2 %v4601_v63  ;;  %1214 = vmatpush.msra.mxu3 %v4607_v48 }
 0x132   :  { %1119 = vmatpush.msrb.mxu1 %v7125_v52 }
 0x133   :  { %1195 = vmatpush.msra.mxu2 %v4614_v45  ;;  %1215 = vmatpush.msra.mxu3 %v4620_v46 }
 0x134   :  { %1120 = vmatpush.msrb.mxu1 %v7126_v60 }
 0x135   :  { %1196 = vmatpush.msra.mxu2 %v4627_v30  ;;  %1216 = vmatpush.msra.mxu3 %v4633_v5 }
 0x136   :  { %1121 = vmatpush.msrb.mxu1 %v7127_v51 }
 0x137   :  { %1197 = vmatpush.msra.mxu2 %v4640_v8  ;;  %1217 = vmatpush.msra.mxu3 %v4646_v17 }
 0x138   :  { %1122 = vmatpush.msrb.mxu1 %v7039_v62  ;;  %v4666_v62 = vld [vmem:[%s6686_s4 + $0xd8] sm:$0xff] }
 0x139   :  { %1198 = vmatpush.msra.mxu2 %v4653_v58  ;;  %1218 = vmatpush.msra.mxu3 %v4659_v56 }
 0x13a   :  { %1123 = vmatpush.msrb.mxu1 %v7128_v0 }
 0x13b   :  { %1199 = vmatpush.msra.mxu2 %v4666_v62  ;;  %1219 = vmatpush.msra.mxu3 %v4672_v1 }
 0x13c   :  { %1124 = vmatpush.msrb.mxu1 %v7130_v3 }
 0x13d   :  { %1200 = vmatpush.msra.mxu2 %v4679_v19  ;;  %1220 = vmatpush.msra.mxu3 %v4685_v4 }
 0x13e   :  { %1125 = vmatpush.msrb.mxu1 %v4158_v57  ;;  %v4705_v57 = vld [vmem:[%s6686_s4 + $0x90] sm:$0xff] }
 0x13f   :  { %1201 = vmatpush.msra.mxu2 %v4692_v27  ;;  %1221 = vmatpush.msra.mxu3 %v4698_v7  ;;  %7134 = vst [vmem:[#allocation23_spill] sm:$0xff] %v4705_v57 }
 0x140   :  { %1126 = vmatpush.msrb.mxu1 %v4165_v2  ;;  %v4718_v2 = vld [vmem:[%s6686_s4 + $0x78] sm:$0xff] }
 0x141   :  { %1202 = vmatpush.msra.mxu2 %v4705_v57  ;;  %1222 = vmatpush.msra.mxu3 %v4711_v55  ;;  %7136 = vst [vmem:[#allocation28_spill] sm:$0xff] %v4718_v2 }
 0x142   :  { %1127 = vmatpush.msrb.mxu1 %v7052_v32  ;;  %v4731_v32 = vld [vmem:[%s6686_s4 + $0x60] sm:$0xff] }
 0x143   :  { %1203 = vmatpush.msra.mxu2 %v4718_v2  ;;  %1223 = vmatpush.msra.mxu3 %v4724_v6  ;;  %7138 = vst [vmem:[#allocation31_spill] sm:$0xff] %v4731_v32 }
 0x144   :  { %1128 = vmatpush.msrb.mxu1 %v7054_v22  ;;  %v4744_v22 = vld [vmem:[%s6686_s4 + $0x48] sm:$0xff] }
 0x145   :  { %1204 = vmatpush.msra.mxu2 %v4731_v32  ;;  %1224 = vmatpush.msra.mxu3 %v4737_v16  ;;  %7140 = vst [vmem:[#allocation35_spill] sm:$0xff] %v4744_v22 }
 0x146   :  { %1129 = vmatpush.msrb.mxu1 %v4205_v28  ;;  %v4757_v28 = vld [vmem:[%s6686_s4 + $0x30] sm:$0xff] }
 0x147   :  { %1205 = vmatpush.msra.mxu2 %v4744_v22  ;;  %1225 = vmatpush.msra.mxu3 %v4750_v34  ;;  %7142 = vst [vmem:[#allocation39_spill] sm:$0xff] %v4757_v28 }
 0x148   :  { %1130 = vmatpush.msrb.mxu1 %v4217_v44  ;;  %v4770_v44 = vld [vmem:[%s6686_s4 + $0x18] sm:$0xff] }
 0x149   :  { %1206 = vmatpush.msra.mxu2 %v4757_v28  ;;  %1226 = vmatpush.msra.mxu3 %v4763_v24  ;;  %7144 = vst [vmem:[#allocation41_spill] sm:$0xff] %v4770_v44 }
 0x14a   :  { %1131 = vmatpush.msrb.mxu1 %v4229_v35  ;;  %v4783_v35 = vld [vmem:[%s6686_s4] sm:$0xff] }
 0x14b   :  { %1207 = vmatpush.msra.mxu2 %v4770_v44  ;;  %1227 = vmatpush.msra.mxu3 %v4776_v10  ;;  %7146 = vst [vmem:[#allocation42_spill] sm:$0xff] %v4783_v35 }
 0x14c   :  { %1132 = vmatpush.msrb.mxu1 %v4235_v14  ;;  %v280_v14 = vadd.f32 %v7150_v59, %v7149_v61 }
 0x14d   :  { %1208 = vmatpush.msra.mxu2 %v4783_v35  ;;  %1228 = vmatpush.msra.mxu3 %v4789_v26 }
 0x180   :  { %v762_v31 = vpop.f32.mrf.mxu2  ;;  %v782_v15 = vpop.f32.mrf.mxu3 }
 0x181   :  { %v805_v13 = vadd.f32 %v762_v31, %v239_v41  ;;  %v825_v29 = vadd.f32 %v782_v15, %v280_v14  ;;  %v802_v14 = vpop.f32.mrf.mxu0 }
 0x183   :  { %v2922_v50 = vmul.f32 -1.442695, %v805_v13  ;;  %v2923_v18 = vmul.f32 -1.442695, %v825_v29  ;;  %v845_v29 = vadd.f32 %v802_v14, %v4480_v42 }
 0x185   :  { %2977 = vpow2.f32 %v2922_v50 }
 0x186   :  { %2979 = vpow2.f32 %v2923_v18 }
 0x18b   :  { %v2978_v20 = vpop.eup %2977 }
 0x18c   :  { %v2980_v39 = vpop.eup %2979  ;;  %v809_v25 = vadd.f32 1.0, %v2978_v20 }
 0x18d   :  { %v829_v52 = vadd.f32 1.0, %v2980_v39  ;;  %v7151_v39 = vld [vmem:[#allocation18_spill] sm:$0xff] }
 0x18e   :  { %2981 = vrcp.f32 %v809_v25  ;;  %v821_v59 = vand.u32 2147483648, %v809_v25  ;;  %v819_v41 = vand.u32 2147483647, %v809_v25  ;;  %vm815_vm2 = vweird.f32 %v809_v25 }
 0x18f   :  { %2983 = vrcp.f32 %v829_v52  ;;  %vm835_vm6 = vweird.f32 %v829_v52  ;;  %v839_v47 = vand.u32 2147483647, %v829_v52 }
 0x190   :  { %v822_v13 = vor.u32 1.1754944e-38, %v821_v59  ;;  %vm820_vm4 = vcmp.eq.f32.partialorder %v819_v41, 8.507059e+37 }
 0x191   :  { %vm840_vm8 = vcmp.eq.f32.partialorder %v839_v47, 8.507059e+37  ;;  %v4809_v47 = vld [vmem:[%s6686_s4 + $0x178] sm:$0xff] }
 0x194   :  { %v2982_v60 = vpop.eup %2981 }
 0x195   :  { %v2984_v51 = vpop.eup %2983  ;;  %v811_v0 = vmul.f32 %v2982_v60, %v809_v25  ;;  %vm816_vm1 = vweird.f32 %v2982_v60 }
 0x196   :  { %v831_v3 = vmul.f32 %v2984_v51, %v829_v52  ;;  %vm817_vm3 = vmor %vm815_vm2, %vm816_vm1  ;;  %vm836_vm5 = vweird.f32 %v2984_v51 }
 0x197   :  { %v812_v9 = vsub.f32 1.0, %v811_v0  ;;  %v321_v0 = vadd.f32 %v7151_v39, %v4421_v49  ;;  %vm837_vm7 = vmor %vm835_vm6, %vm836_vm5  ;;  %v4834_v39 = vld [vmem:[%s6687_s6 + $0x150] sm:$0xff] }
 0x198   :  { %v832_v33 = vsub.f32 1.0, %v831_v3 }
 0x199   :  { %v813_v54 = vmul.f32 %v2982_v60, %v812_v9  ;;  %v841_v9 = vand.u32 2147483648, %v829_v52  ;;  %v4815_v52 = vld [vmem:[%s6687_s6 + $0x168] sm:$0xff] }
 0x19a   :  { %v833_v31 = vmul.f32 %v2984_v51, %v832_v33 }
 0x19b   :  { %v814_v15 = vadd.f32 %v2982_v60, %v813_v54  ;;  %v842_v54 = vor.u32 1.1754944e-38, %v841_v9  ;;  %v4852_v9 = vld [vmem:[%s6687_s6 + $0x138] sm:$0xff] }
 0x19c   :  { %v834_v20 = vadd.f32 %v2984_v51, %v833_v31 }
 0x19d   :  { %v818_v50 = vsel %vm817_vm3, %v2982_v60, %v814_v15  ;;  %v7152_v15 = vld [vmem:[#allocation59_spill] sm:$0xff] }
 0x19e   :  { %v823_v18 = vsel %vm820_vm4, %v822_v13, %v818_v50  ;;  %v838_v33 = vsel %vm837_vm7, %v2984_v51, %v834_v20  ;;  %v4821_v51 = vld [vmem:[%s6687_s6 + $0x170] sm:$0xff]  ;;  %v4828_v20 = vld [vmem:[%s6686_s4 + $0x160] sm:$0xff] }
 0x19f   :  { %v846_v3 = vmul.f32 %v845_v29, %v823_v18  ;;  %v843_v25 = vsel %vm840_vm8, %v842_v54, %v838_v33  ;;  %v4858_v33 = vld [vmem:[%s6687_s6 + $0x140] sm:$0xff] }
 0x1a0   :  { %v849_v59 = vsub.f32 1.0, %v843_v25  ;;  %v851_v14 = vmul.f32 %v843_v25, %v4506_v40  ;;  %7154 = vst [vmem:[#allocation50_spill] sm:$0xff] %v4858_v33  ;;  %v4864_v25 = vld [vmem:[%s6686_s4 + $0x130] sm:$0xff]  ;;  %v4929_v40 = vld [vmem:[%s6687_s6 + $0xd8] sm:$0xff] }
 0x1a1   :  { %v847_v23 = vadd.f32 %v846_v3, %v321_v0  ;;  %v4840_v0 = vld [vmem:[%s6687_s6 + $0x158] sm:$0xff]  ;;  %v4846_v3 = vld [vmem:[%s6686_s4 + $0x148] sm:$0xff]  ;;  %7155 = vst [vmem:[#allocation13_spill] sm:$0xff] %v4864_v25 }
 0x1a2   :  { %7165 = vst [vmem:[#allocation59_spill] sm:$0xff] %v4929_v40 }
 0x1a3   :  { %2985 = vtanh.f32 %v847_v23 }
 0x1a9   :  { %v2986_v60 = vpop.eup %2985 }
 0x1aa   :  { %v850_v41 = vmul.f32 %v2986_v60, %v849_v59  ;;  %v870_v31 = vpop.f32.mrf.mxu1  ;;  %v4872_v60 = vld [vmem:[%s6687_s6 + $0x120] sm:$0xff] }
 0x1ab   :  { %v913_v13 = vadd.f32 %v870_v31, %v7152_v15  ;;  %7156 = vst [vmem:[#allocation17_spill] sm:$0xff] %v4872_v60  ;;  %v4891_v31 = vld [vmem:[%s6687_s6 + $0x108] sm:$0xff]  ;;  %v4897_v15 = vld [vmem:[%s6687_s6 + $0x110] sm:$0xff] }
 0x1ac   :  { %v4801_v50 = vadd.f32 %v851_v14, %v850_v41  ;;  %v4878_v41 = vld [vmem:[%s6687_s6 + $0x128] sm:$0xff]  ;;  %v4884_v14 = vld [vmem:[%s6686_s4 + $0x118] sm:$0xff]  ;;  %7159 = vst [vmem:[#allocation33_spill] sm:$0xff] %v4891_v31 }
 0x1ad   :  { %v2924_v29 = vmul.f32 -1.442695, %v913_v13  ;;  %7157 = vst [vmem:[#allocation24_spill] sm:$0xff] %v4878_v41  ;;  %v4903_v13 = vld [vmem:[%s6686_s4 + $0x100] sm:$0xff] }
 0x1ae   :  { %7153 = vst [vmem:[#allocation49_spill] sm:$0xff] %v4801_v50  ;;  %985 = vmatmul.f32.vlgmr.msra.gmra.mxu0 %v4801_v50  ;;  %1005 = vmatmul.f32.vlgmr.msra.gmra.mxu1 %v4801_v50 }
 0x1af   :  { %2987 = vpow2.f32 %v2924_v29  ;;  %1025 = vmatmul.f32.vlgmr.msrb.gmra.mxu2 %v4801_v50  ;;  %1233 = vmatpush.msra.mxu0 %v4809_v47  ;;  %7158 = vst [vmem:[#allocation26_spill] sm:$0xff] %v4884_v14  ;;  %v4909_v29 = vld [vmem:[%s6687_s6 + $0xf0] sm:$0xff] }
 0x1b0   :  { %v890_v23 = vpop.f32.mrf.mxu2  ;;  %1301 = vmatpush.msra.mxu1 %v4815_v52  ;;  %1321 = vmatpush.msrb.mxu2 %v4821_v51  ;;  %7160 = vst [vmem:[#allocation44_spill] sm:$0xff] %v4897_v15 }
 0x1b1   :  { %v933_v18 = vadd.f32 %v890_v23, %v4501_v36  ;;  %1234 = vmatpush.msra.mxu0 %v4828_v20  ;;  %7161 = vst [vmem:[#allocation46_spill] sm:$0xff] %v4903_v13  ;;  %v4915_v23 = vld [vmem:[%s6687_s6 + $0xf8] sm:$0xff] }
 0x1b2   :  { %1302 = vmatpush.msra.mxu1 %v4834_v39  ;;  %1322 = vmatpush.msrb.mxu2 %v4840_v0  ;;  %7162 = vst [vmem:[#allocation8_spill] sm:$0xff] %v4909_v29 }
 0x1b3   :  { %v2925_v36 = vmul.f32 -1.442695, %v933_v18  ;;  %1235 = vmatpush.msra.mxu0 %v4846_v3  ;;  %7163 = vst [vmem:[#allocation7_spill] sm:$0xff] %v4915_v23 }
 0x1b4   :  { %1303 = vmatpush.msra.mxu1 %v4852_v9  ;;  %1323 = vmatpush.msrb.mxu2 %v4858_v33  ;;  %v5045_v33 = vld [vmem:[%s6687_s6 + $0x48] sm:$0xff] }
 0x1b5   :  { %v2988_v54 = vpop.eup %2987  ;;  %2989 = vpow2.f32 %v2925_v36  ;;  %1236 = vmatpush.msra.mxu0 %v4864_v25  ;;  %v4921_v36 = vld [vmem:[%s6686_s4 + $0xe8] sm:$0xff]  ;;  %v5026_v25 = vld [vmem:[%s6687_s6 + $0x60] sm:$0xff]  ;;  %7183 = vst [vmem:[#allocation95_spill] sm:$0xff] %v5045_v33 }
 0x1b6   :  { %v4867_v59 = vadd.f32 1.0, %v2988_v54  ;;  %1304 = vmatpush.msra.mxu1 %v4872_v60  ;;  %1324 = vmatpush.msrb.mxu2 %v4878_v41  ;;  %7164 = vst [vmem:[#allocation18_spill] sm:$0xff] %v4921_v36  ;;  %v5005_v41 = vld [vmem:[%s6687_s6 + $0x78] sm:$0xff] }
 0x1b7   :  { %1237 = vmatpush.msra.mxu0 %v4884_v14  ;;  %7177 = vst [vmem:[#allocation89_spill] sm:$0xff] %v5005_v41 }
 0x1b8   :  { %2991 = vrcp.f32 %v4867_v59  ;;  %1305 = vmatpush.msra.mxu1 %v4891_v31  ;;  %1325 = vmatpush.msrb.mxu2 %v4897_v15  ;;  %v4979_v15 = vld [vmem:[%s6686_s4 + $0xa0] sm:$0xff]  ;;  %v4999_v31 = vld [vmem:[%s6686_s4 + $0x88] sm:$0xff]  ;;  %vm923_vm10 = vweird.f32 %v4867_v59  ;;  %7180 = vst [vmem:[#allocation92_spill] sm:$0xff] %v5026_v25 }
 0x1b9   :  { %1238 = vmatpush.msra.mxu0 %v4903_v13  ;;  %7173 = vst [vmem:[#allocation85_spill] sm:$0xff] %v4979_v15 }
 0x1ba   :  { %1306 = vmatpush.msra.mxu1 %v4909_v29  ;;  %1326 = vmatpush.msrb.mxu2 %v4915_v23  ;;  %v4935_v23 = vld [vmem:[%s6687_s6 + $0xe0] sm:$0xff]  ;;  %7176 = vst [vmem:[#allocation88_spill] sm:$0xff] %v4999_v31 }
 0x1bb   :  { %v2990_v18 = vpop.eup %2989  ;;  %1239 = vmatpush.msra.mxu0 %v4921_v36  ;;  %7166 = vst [vmem:[#allocation78_spill] sm:$0xff] %v4935_v23  ;;  %v4941_v36 = vld [vmem:[%s6686_s4 + $0xd0] sm:$0xff] }
 0x1bc   :  { %v4924_v54 = vadd.f32 1.0, %v2990_v18  ;;  %1307 = vmatpush.msra.mxu1 %v4929_v40  ;;  %1327 = vmatpush.msrb.mxu2 %v4935_v23  ;;  %7167 = vst [vmem:[#allocation79_spill] sm:$0xff] %v4941_v36  ;;  %v4948_v40 = vld [vmem:[%s6687_s6 + $0xc0] sm:$0xff]  ;;  %v4954_v23 = vld [vmem:[%s6687_s6 + $0xc8] sm:$0xff] }
 0x1bd   :  { %1240 = vmatpush.msra.mxu0 %v4941_v36  ;;  %7168 = vst [vmem:[#allocation80_spill] sm:$0xff] %v4948_v40  ;;  %v4961_v36 = vld [vmem:[%s6686_s4 + $0xb8] sm:$0xff] }
 0x1be   :  { %v2992_v18 = vpop.eup %2991  ;;  %2993 = vrcp.f32 %v4924_v54  ;;  %1308 = vmatpush.msra.mxu1 %v4948_v40  ;;  %7169 = vst [vmem:[#allocation81_spill] sm:$0xff] %v4954_v23  ;;  %1328 = vmatpush.msrb.mxu2 %v4954_v23  ;;  %v4967_v40 = vld [vmem:[%s6687_s6 + $0xa8] sm:$0xff]  ;;  %v4973_v23 = vld [vmem:[%s6687_s6 + $0xb0] sm:$0xff]  ;;  %vm943_vm14 = vweird.f32 %v4924_v54 }
 0x1bf   :  { %v919_v29 = vmul.f32 %v2992_v18, %v4867_v59  ;;  %7170 = vst [vmem:[#allocation82_spill] sm:$0xff] %v4961_v36  ;;  %1241 = vmatpush.msra.mxu0 %v4961_v36  ;;  %v929_v36 = vand.u32 2147483648, %v4867_v59  ;;  %vm924_vm9 = vweird.f32 %v2992_v18 }
 0x1c0   :  { %7171 = vst [vmem:[#allocation83_spill] sm:$0xff] %v4967_v40  ;;  %1309 = vmatpush.msra.mxu1 %v4967_v40  ;;  %1329 = vmatpush.msrb.mxu2 %v4973_v23  ;;  %v4986_v40 = vld [vmem:[%s6687_s6 + $0x90] sm:$0xff]  ;;  %vm925_vm11 = vmor %vm923_vm10, %vm924_vm9 }
 0x1c1   :  { %7172 = vst [vmem:[#allocation84_spill] sm:$0xff] %v4973_v23  ;;  %v920_v13 = vsub.f32 1.0, %v919_v29  ;;  %1242 = vmatpush.msra.mxu0 %v4979_v15  ;;  %v4992_v29 = vld [vmem:[%s6687_s6 + $0x98] sm:$0xff]  ;;  %v927_v15 = vand.u32 2147483647, %v4867_v59  ;;  %v5032_v59 = vld [vmem:[%s6687_s6 + $0x68] sm:$0xff] }
 0x1c2   :  { %7174 = vst [vmem:[#allocation86_spill] sm:$0xff] %v4986_v40  ;;  %1310 = vmatpush.msra.mxu1 %v4986_v40  ;;  %1330 = vmatpush.msrb.mxu2 %v4992_v29  ;;  %v910_v40 = vpop.f32.mrf.mxu3 }
 0x1c3   :  { %7175 = vst [vmem:[#allocation87_spill] sm:$0xff] %v4992_v29  ;;  %v921_v23 = vmul.f32 %v2992_v18, %v920_v13  ;;  %1243 = vmatpush.msra.mxu0 %v4999_v31  ;;  %v5011_v13 = vld [vmem:[%s6687_s6 + $0x80] sm:$0xff]  ;;  %v5019_v31 = vld [vmem:[%s6686_s4 + $0x70] sm:$0xff]  ;;  %vm928_vm12 = vcmp.eq.f32.partialorder %v927_v15, 8.507059e+37  ;;  %v949_v15 = vand.u32 2147483648, %v4924_v54 }
 0x1c4   :  { %v2994_v14 = vpop.eup %2993  ;;  %1311 = vmatpush.msra.mxu1 %v5005_v41  ;;  %7178 = vst [vmem:[#allocation90_spill] sm:$0xff] %v5011_v13  ;;  %1331 = vmatpush.msrb.mxu2 %v5011_v13  ;;  %v930_v41 = vor.u32 1.1754944e-38, %v929_v36  ;;  %v5039_v36 = vld [vmem:[%s6686_s4 + $0x58] sm:$0xff] }
 0x1c5   :  { %v939_v29 = vmul.f32 %v2994_v14, %v4924_v54  ;;  %v922_v60 = vadd.f32 %v2992_v18, %v921_v23  ;;  %7179 = vst [vmem:[#allocation91_spill] sm:$0xff] %v5019_v31  ;;  %1244 = vmatpush.msra.mxu0 %v5019_v31  ;;  %v953_v31 = vadd.f32 %v910_v40, %v4551_v11  ;;  %vm944_vm13 = vweird.f32 %v2994_v14  ;;  %v5079_v11 = vld [vmem:[%s6686_s4 + $0x28] sm:$0xff] }
 0x1c6   :  { %1312 = vmatpush.msra.mxu1 %v5026_v25  ;;  %7181 = vst [vmem:[#allocation93_spill] sm:$0xff] %v5032_v59  ;;  %1332 = vmatpush.msrb.mxu2 %v5032_v59  ;;  %vm5083_vm15 = vmor %vm943_vm14, %vm944_vm13 }
 0x1c7   :  { %v940_v23 = vsub.f32 1.0, %v939_v29  ;;  %v926_v13 = vsel %vm925_vm11, %v2992_v18, %v922_v60  ;;  %7182 = vst [vmem:[#allocation94_spill] sm:$0xff] %v5039_v36  ;;  %1245 = vmatpush.msra.mxu0 %v5039_v36  ;;  %v5051_v60 = vld [vmem:[%s6687_s6 + $0x50] sm:$0xff]  ;;  %v947_v29 = vand.u32 2147483647, %v4924_v54  ;;  %v950_v54 = vor.u32 1.1754944e-38, %v949_v15 }
 0x1c8   :  { %v931_v25 = vsel %vm928_vm12, %v930_v41, %v926_v13  ;;  %1313 = vmatpush.msra.mxu1 %v5045_v33  ;;  %7184 = vst [vmem:[#allocation96_spill] sm:$0xff] %v5051_v60  ;;  %1333 = vmatpush.msrb.mxu2 %v5051_v60  ;;  %v5058_v41 = vld [vmem:[%s6686_s4 + $0x40] sm:$0xff]  ;;  %v5065_v13 = vld [vmem:[%s6687_s6 + $0x30] sm:$0xff] }
 0x1c9   :  { %v941_v40 = vmul.f32 %v2994_v14, %v940_v23  ;;  %v954_v18 = vmul.f32 %v953_v31, %v931_v25  ;;  %7185 = vst [vmem:[#allocation97_spill] sm:$0xff] %v5058_v41  ;;  %1246 = vmatpush.msra.mxu0 %v5058_v41  ;;  %v5071_v25 = vld [vmem:[%s6687_s6 + $0x38] sm:$0xff]  ;;  %vm948_vm0 = vcmp.eq.f32.partialorder %v947_v29, 8.507059e+37 }
 0x1ca   :  { %7186 = vst [vmem:[#allocation98_spill] sm:$0xff] %v5065_v13  ;;  %1314 = vmatpush.msra.mxu1 %v5065_v13  ;;  %1334 = vmatpush.msrb.mxu2 %v5071_v25 }
 0x1cb   :  { %7187 = vst [vmem:[#allocation99_spill] sm:$0xff] %v5071_v25  ;;  %v942_v31 = vadd.f32 %v2994_v14, %v941_v40  ;;  %v955_v23 = vadd.f32 %v954_v18, %v4504_v53  ;;  %1247 = vmatpush.msra.mxu0 %v5079_v11  ;;  %v5090_v40 = vld [vmem:[%s6687_s6 + $0x18] sm:$0xff]  ;;  %v5096_v53 = vld [vmem:[%s6687_s6 + $0x20] sm:$0xff] }
 0x1cc   :  { %7188 = vst [vmem:[#allocation100_spill] sm:$0xff] %v5079_v11  ;;  %1315 = vmatpush.msra.mxu1 %v5090_v40  ;;  %1335 = vmatpush.msrb.mxu2 %v5096_v53  ;;  %v5104_v11 = vld [vmem:[%s6686_s4 + $0x10] sm:$0xff] }
 0x1cd   :  { %7191 = vst [vmem:[#allocation101_spill] sm:$0xff] %v5090_v40  ;;  %v946_v18 = vsel %vm5083_vm15, %v2994_v14, %v942_v31  ;;  %2995 = vtanh.f32 %v955_v23  ;;  %1248 = vmatpush.msra.mxu0 %v5104_v11  ;;  %v5110_v40 = vld [vmem:[%s6687_s6] sm:$0xff]  ;;  %v5116_v14 = vld [vmem:[%s6687_s6 + $0x8] sm:$0xff] }
 0x1ce   :  { %7192 = vst [vmem:[#allocation102_spill] sm:$0xff] %v5104_v11  ;;  %1316 = vmatpush.msra.mxu1 %v5110_v40  ;;  %1336 = vmatpush.msrb.mxu2 %v5116_v14  ;;  %v951_v15 = vsel %vm948_vm0, %v950_v54, %v946_v18  ;;  %v5136_v54 = vld [vmem:[%s6687_s6 + $0x160] sm:$0xff]  ;;  %v5144_v18 = vld [vmem:[%s6687_s6 + $0x148] sm:$0xff] }
 0x1cf   :  { %7193 = vst [vmem:[#allocation103_spill] sm:$0xff] %v5110_v40  ;;  %v957_v13 = vsub.f32 1.0, %v951_v15  ;;  %v959_v29 = vmul.f32 %v951_v15, %v4579_v21  ;;  %v5128_v40 = vld [vmem:[%s6687_s6 + $0x178] sm:$0xff]  ;;  %v5152_v15 = vld [vmem:[%s6687_s6 + $0x130] sm:$0xff] }
 0x1d0   :  { %7194 = vst [vmem:[#allocation104_spill] sm:$0xff] %v5116_v14  ;;  %v5192_v21 = vld [vmem:[%s6687_s6 + $0xb8] sm:$0xff] }
 0x1d1   :  { %7196 = vst [vmem:[#allocation106_spill] sm:$0xff] %v5192_v21 }
 0x1d3   :  { %v2996_v31 = vpop.eup %2995 }
 0x1d4   :  { %v958_v23 = vmul.f32 %v2996_v31, %v957_v13  ;;  %v5160_v13 = vld [vmem:[%s6687_s6 + $0x118] sm:$0xff]  ;;  %v5168_v31 = vld [vmem:[%s6687_s6 + $0x100] sm:$0xff] }
 0x1d6   :  { %v5120_v11 = vadd.f32 %v959_v29, %v958_v23  ;;  %v5176_v23 = vld [vmem:[%s6687_s6 + $0xe8] sm:$0xff]  ;;  %v5184_v29 = vld [vmem:[%s6687_s6 + $0xd0] sm:$0xff] }
 0x1d8   :  { %7195 = vst [vmem:[#allocation105_spill] sm:$0xff] %v5120_v11  ;;  %1093 = vmatmul.f32.vlgmr.msrb.gmra.mxu3 %v5120_v11  ;;  %1113 = vmatmul.f32.vlgmr.msrb.gmra.mxu0 %v5120_v11 }
 0x1d9   :  { %1133 = vmatmul.f32.vlgmr.msrb.gmra.mxu1 %v5120_v11  ;;  %1341 = vmatpush.msrb.mxu3 %v5128_v40 }
 0x1da   :  { %1417 = vmatpush.msrb.mxu0 %v4588_v37  ;;  %1437 = vmatpush.msrb.mxu1 %v4594_v12 }
 0x1db   :  { %1342 = vmatpush.msrb.mxu3 %v5136_v54 }
 0x1dc   :  { %1418 = vmatpush.msrb.mxu0 %v4601_v63  ;;  %1438 = vmatpush.msrb.mxu1 %v4607_v48 }
 0x1dd   :  { %1343 = vmatpush.msrb.mxu3 %v5144_v18 }
 0x1de   :  { %1419 = vmatpush.msrb.mxu0 %v4614_v45  ;;  %1439 = vmatpush.msrb.mxu1 %v4620_v46 }
 0x1df   :  { %1344 = vmatpush.msrb.mxu3 %v5152_v15 }
 0x1e0   :  { %1420 = vmatpush.msrb.mxu0 %v4627_v30  ;;  %1440 = vmatpush.msrb.mxu1 %v4633_v5 }
 0x1e1   :  { %1345 = vmatpush.msrb.mxu3 %v5160_v13 }
 0x1e2   :  { %1421 = vmatpush.msrb.mxu0 %v4640_v8  ;;  %1441 = vmatpush.msrb.mxu1 %v4646_v17 }
 0x1e3   :  { %1346 = vmatpush.msrb.mxu3 %v5168_v31 }
 0x1e4   :  { %1422 = vmatpush.msrb.mxu0 %v4653_v58  ;;  %1442 = vmatpush.msrb.mxu1 %v4659_v56 }
 0x1e5   :  { %1347 = vmatpush.msrb.mxu3 %v5176_v23 }
 0x1e6   :  { %1423 = vmatpush.msrb.mxu0 %v4666_v62  ;;  %1443 = vmatpush.msrb.mxu1 %v4672_v1  ;;  %v5200_v1 = vld [vmem:[%s6687_s6 + $0xa0] sm:$0xff] }
 0x1e7   :  { %1348 = vmatpush.msrb.mxu3 %v5184_v29  ;;  %7197 = vst [vmem:[#allocation107_spill] sm:$0xff] %v5200_v1 }
 0x1e8   :  { %1424 = vmatpush.msrb.mxu0 %v4679_v19  ;;  %1444 = vmatpush.msrb.mxu1 %v4685_v4  ;;  %v5208_v4 = vld [vmem:[%s6687_s6 + $0x88] sm:$0xff] }
 0x1e9   :  { %1349 = vmatpush.msrb.mxu3 %v5192_v21  ;;  %7198 = vst [vmem:[#allocation108_spill] sm:$0xff] %v5208_v4 }
 0x1ea   :  { %1425 = vmatpush.msrb.mxu0 %v4692_v27  ;;  %1445 = vmatpush.msrb.mxu1 %v4698_v7  ;;  %v5216_v7 = vld [vmem:[%s6687_s6 + $0x70] sm:$0xff] }
 0x1eb   :  { %1350 = vmatpush.msrb.mxu3 %v5200_v1  ;;  %7199 = vst [vmem:[#allocation109_spill] sm:$0xff] %v5216_v7 }
 0x1ec   :  { %1426 = vmatpush.msrb.mxu0 %v4705_v57  ;;  %1446 = vmatpush.msrb.mxu1 %v4711_v55  ;;  %v5224_v55 = vld [vmem:[%s6687_s6 + $0x58] sm:$0xff] }
 0x1ed   :  { %1351 = vmatpush.msrb.mxu3 %v5208_v4  ;;  %7200 = vst [vmem:[#allocation110_spill] sm:$0xff] %v5224_v55 }
 0x1ee   :  { %1427 = vmatpush.msrb.mxu0 %v4718_v2  ;;  %1447 = vmatpush.msrb.mxu1 %v4724_v6  ;;  %v5232_v6 = vld [vmem:[%s6687_s6 + $0x40] sm:$0xff] }
 0x1ef   :  { %1352 = vmatpush.msrb.mxu3 %v5216_v7  ;;  %7201 = vst [vmem:[#allocation111_spill] sm:$0xff] %v5232_v6 }
 0x1f0   :  { %1428 = vmatpush.msrb.mxu0 %v4731_v32  ;;  %1448 = vmatpush.msrb.mxu1 %v4737_v16  ;;  %v5240_v16 = vld [vmem:[%s6687_s6 + $0x28] sm:$0xff] }
 0x1f1   :  { %1353 = vmatpush.msrb.mxu3 %v5224_v55  ;;  %7202 = vst [vmem:[#allocation112_spill] sm:$0xff] %v5240_v16 }
 0x1f2   :  { %1429 = vmatpush.msrb.mxu0 %v4744_v22  ;;  %1449 = vmatpush.msrb.mxu1 %v4750_v34  ;;  %v5248_v34 = vld [vmem:[%s6687_s6 + $0x10] sm:$0xff] }
 0x1f3   :  { %1354 = vmatpush.msrb.mxu3 %v5232_v6  ;;  %7203 = vst [vmem:[#allocation113_spill] sm:$0xff] %v5248_v34 }
 0x1f4   :  { %1430 = vmatpush.msrb.mxu0 %v4757_v28  ;;  %1450 = vmatpush.msrb.mxu1 %v4763_v24  ;;  %v7204_v24 = vld [vmem:[#allocation5_spill] sm:$0xff] }
 0x1f5   :  { %1355 = vmatpush.msrb.mxu3 %v5240_v16  ;;  %v242_v28 = vadd.f32 %v7204_v24, %v4452_v38  ;;  %v7205_v16 = vld [vmem:[#allocation9_spill] sm:$0xff] }
 0x1f6   :  { %1431 = vmatpush.msrb.mxu0 %v4770_v44  ;;  %1451 = vmatpush.msrb.mxu1 %v4776_v10  ;;  %v283_v6 = vadd.f32 %v7205_v16, %v7149_v61 }
 0x1f7   :  { %1356 = vmatpush.msrb.mxu3 %v5248_v34 }
 0x1f8   :  { %1432 = vmatpush.msrb.mxu0 %v4783_v35  ;;  %1452 = vmatpush.msrb.mxu1 %v4789_v26 }
 0x22b   :  { %v986_v44 = vpop.f32.mrf.mxu0  ;;  %v1006_v22 = vpop.f32.mrf.mxu1 }
 0x22c   :  { %v1029_v10 = vadd.f32 %v986_v44, %v242_v28  ;;  %v1049_v55 = vadd.f32 %v1006_v22, %v283_v6 }
 0x22e   :  { %v2926_v32 = vmul.f32 -1.442695, %v1029_v10  ;;  %v2927_v7 = vmul.f32 -1.442695, %v1049_v55  ;;  %v7206_v10 = vld [vmem:[#allocation10_spill] sm:$0xff] }
 0x230   :  { %2997 = vpow2.f32 %v2926_v32 }
 0x231   :  { %2999 = vpow2.f32 %v2927_v7 }
 0x232   :  { %v1026_v55 = vpop.f32.mrf.mxu2 }
 0x236   :  { %v2998_v2 = vpop.eup %2997 }
 0x237   :  { %v3000_v34 = vpop.eup %2999  ;;  %v1033_v4 = vadd.f32 1.0, %v2998_v2 }
 0x238   :  { %v1053_v35 = vadd.f32 1.0, %v3000_v34  ;;  %v1069_v34 = vadd.f32 %v1026_v55, %v4480_v42 }
 0x239   :  { %3001 = vrcp.f32 %v1033_v4  ;;  %v1045_v61 = vand.u32 2147483648, %v1033_v4  ;;  %v1043_v6 = vand.u32 2147483647, %v1033_v4  ;;  %vm1039_vm2 = vweird.f32 %v1033_v4 }
 0x23a   :  { %3003 = vrcp.f32 %v1053_v35  ;;  %vm1059_vm6 = vweird.f32 %v1053_v35  ;;  %v1063_v21 = vand.u32 2147483647, %v1053_v35 }
 0x23b   :  { %v1046_v7 = vor.u32 1.1754944e-38, %v1045_v61  ;;  %vm1044_vm4 = vcmp.eq.f32.partialorder %v1043_v6, 8.507059e+37 }
 0x23c   :  { %vm1064_vm8 = vcmp.eq.f32.partialorder %v1063_v21, 8.507059e+37 }
 0x23f   :  { %v3002_v26 = vpop.eup %3001 }
 0x240   :  { %v3004_v57 = vpop.eup %3003  ;;  %v1035_v24 = vmul.f32 %v3002_v26, %v1033_v4  ;;  %vm1040_vm1 = vweird.f32 %v3002_v26 }
 0x241   :  { %v1055_v38 = vmul.f32 %v3004_v57, %v1053_v35  ;;  %vm1041_vm3 = vmor %vm1039_vm2, %vm1040_vm1  ;;  %vm1060_vm5 = vweird.f32 %v3004_v57 }
 0x242   :  { %v1036_v1 = vsub.f32 1.0, %v1035_v24  ;;  %v1065_v24 = vand.u32 2147483648, %v1053_v35  ;;  %vm1061_vm7 = vmor %vm1059_vm6, %vm1060_vm5 }
 0x243   :  { %v1056_v16 = vsub.f32 1.0, %v1055_v38  ;;  %v324_v38 = vadd.f32 %v7206_v10, %v4421_v49 }
 0x244   :  { %v1037_v27 = vmul.f32 %v3002_v26, %v1036_v1  ;;  %v1066_v4 = vor.u32 1.1754944e-38, %v1065_v24  ;;  %v7212_v24 = vld [vmem:[#allocation24_spill] sm:$0xff] }
 0x245   :  { %v1057_v22 = vmul.f32 %v3004_v57, %v1056_v16 }
 0x246   :  { %v1038_v32 = vadd.f32 %v3002_v26, %v1037_v27 }
 0x247   :  { %v1058_v28 = vadd.f32 %v3004_v57, %v1057_v22 }
 0x248   :  { %v1042_v2 = vsel %vm1041_vm3, %v3002_v26, %v1038_v32 }
 0x249   :  { %v1047_v44 = vsel %vm1044_vm4, %v1046_v7, %v1042_v2  ;;  %v1062_v27 = vsel %vm1061_vm7, %v3004_v57, %v1058_v28  ;;  %v7208_v57 = vld [vmem:[#allocation55_spill] sm:$0xff] }
 0x24a   :  { %v1070_v1 = vmul.f32 %v1069_v34, %v1047_v44  ;;  %v1067_v26 = vsel %vm1064_vm8, %v1066_v4, %v1062_v27  ;;  %v7209_v34 = vld [vmem:[#allocation50_spill] sm:$0xff]  ;;  %v7210_v44 = vld [vmem:[#allocation13_spill] sm:$0xff]  ;;  %v7215_v27 = vld [vmem:[#allocation44_spill] sm:$0xff] }
 0x24b   :  { %v1073_v61 = vsub.f32 1.0, %v1067_v26  ;;  %v1075_v22 = vmul.f32 %v1067_v26, %v4801_v50  ;;  %v7216_v4 = vld [vmem:[#allocation46_spill] sm:$0xff]  ;;  %v7217_v26 = vld [vmem:[#allocation8_spill] sm:$0xff] }
 0x24c   :  { %v1071_v16 = vadd.f32 %v1070_v1, %v324_v38  ;;  %v7211_v38 = vld [vmem:[#allocation17_spill] sm:$0xff]  ;;  %v7213_v1 = vld [vmem:[#allocation26_spill] sm:$0xff]  ;;  %v7227_v50 = vld [vmem:[#allocation84_spill] sm:$0xff] }
 0x24e   :  { %3005 = vtanh.f32 %v1071_v16  ;;  %v7214_v16 = vld [vmem:[#allocation33_spill] sm:$0xff] }
 0x254   :  { %v3006_v6 = vpop.eup %3005 }
 0x255   :  { %v1074_v42 = vmul.f32 %v3006_v6, %v1073_v61  ;;  %v1114_v55 = vpop.f32.mrf.mxu0  ;;  %v7218_v61 = vld [vmem:[#allocation7_spill] sm:$0xff] }
 0x256   :  { %v1157_v32 = vadd.f32 %v1114_v55, %v4492_v43  ;;  %v7220_v55 = vld [vmem:[#allocation59_spill] sm:$0xff] }
 0x257   :  { %v5262_v7 = vadd.f32 %v1075_v22, %v1074_v42  ;;  %v7219_v42 = vld [vmem:[#allocation18_spill] sm:$0xff] }
 0x258   :  { %v2929_v2 = vmul.f32 -1.442695, %v1157_v32  ;;  %v7221_v32 = vld [vmem:[#allocation78_spill] sm:$0xff] }
 0x259   :  { %7207 = vst [vmem:[#allocation5_spill] sm:$0xff] %v5262_v7  ;;  %1209 = vmatmul.f32.vlgmr.msra.gmra.mxu2 %v5262_v7  ;;  %1229 = vmatmul.f32.vlgmr.msra.gmra.mxu3 %v5262_v7 }
 0x25a   :  { %3007 = vpow2.f32 %v2929_v2  ;;  %1249 = vmatmul.f32.vlgmr.msra.gmra.mxu0 %v5262_v7  ;;  %1457 = vmatpush.msra.mxu2 %v4809_v47  ;;  %v7222_v2 = vld [vmem:[#allocation79_spill] sm:$0xff] }
 0x25b   :  { %v1094_v21 = vpop.f32.mrf.mxu3  ;;  %1525 = vmatpush.msra.mxu3 %v4815_v52  ;;  %1545 = vmatpush.msra.mxu0 %v4821_v51 }
 0x25c   :  { %v1137_v35 = vadd.f32 %v1094_v21, %v7208_v57  ;;  %1458 = vmatpush.msra.mxu2 %v4828_v20  ;;  %v7223_v21 = vld [vmem:[#allocation80_spill] sm:$0xff]  ;;  %v7224_v57 = vld [vmem:[#allocation81_spill] sm:$0xff] }
 0x25d   :  { %1526 = vmatpush.msra.mxu3 %v4834_v39  ;;  %1546 = vmatpush.msra.mxu0 %v4840_v0 }
 0x25e   :  { %v2928_v43 = vmul.f32 -1.442695, %v1137_v35  ;;  %1459 = vmatpush.msra.mxu2 %v4846_v3 }
 0x25f   :  { %1527 = vmatpush.msra.mxu3 %v4852_v9  ;;  %1547 = vmatpush.msra.mxu0 %v7209_v34 }
 0x260   :  { %v3008_v28 = vpop.eup %3007  ;;  %3009 = vpow2.f32 %v2928_v43  ;;  %1460 = vmatpush.msra.mxu2 %v7210_v44  ;;  %v7225_v43 = vld [vmem:[#allocation82_spill] sm:$0xff] }
 0x261   :  { %v5278_v10 = vadd.f32 1.0, %v3008_v28  ;;  %1528 = vmatpush.msra.mxu3 %v7211_v38  ;;  %1548 = vmatpush.msra.mxu0 %v7212_v24  ;;  %v7226_v28 = vld [vmem:[#allocation83_spill] sm:$0xff] }
 0x262   :  { %1461 = vmatpush.msra.mxu2 %v7213_v1 }
 0x263   :  { %1529 = vmatpush.msra.mxu3 %v7214_v16  ;;  %1549 = vmatpush.msra.mxu0 %v7215_v27  ;;  %3011 = vrcp.f32 %v5278_v10  ;;  %vm1167_vm14 = vweird.f32 %v5278_v10 }
 0x264   :  { %1462 = vmatpush.msra.mxu2 %v7216_v4 }
 0x265   :  { %1530 = vmatpush.msra.mxu3 %v7217_v26  ;;  %1550 = vmatpush.msra.mxu0 %v7218_v61  ;;  %v7232_v61 = vld [vmem:[#allocation89_spill] sm:$0xff]  ;;  %v7234_v26 = vld [vmem:[#allocation91_spill] sm:$0xff] }
 0x266   :  { %v3010_v6 = vpop.eup %3009  ;;  %1463 = vmatpush.msra.mxu2 %v7219_v42  ;;  %v7228_v42 = vld [vmem:[#allocation85_spill] sm:$0xff] }
 0x267   :  { %v1141_v22 = vadd.f32 1.0, %v3010_v6  ;;  %1531 = vmatpush.msra.mxu3 %v7220_v55  ;;  %1551 = vmatpush.msra.mxu0 %v7221_v32  ;;  %v7229_v55 = vld [vmem:[#allocation86_spill] sm:$0xff]  ;;  %v7230_v32 = vld [vmem:[#allocation87_spill] sm:$0xff] }
 0x268   :  { %1464 = vmatpush.msra.mxu2 %v7222_v2  ;;  %v7231_v2 = vld [vmem:[#allocation88_spill] sm:$0xff] }
 0x269   :  { %3013 = vrcp.f32 %v1141_v22  ;;  %1532 = vmatpush.msra.mxu3 %v7223_v21  ;;  %1552 = vmatpush.msra.mxu0 %v7224_v57  ;;  %v3012_v35 = vpop.eup %3011  ;;  %v7233_v57 = vld [vmem:[#allocation90_spill] sm:$0xff]  ;;  %vm1147_vm10 = vweird.f32 %v1141_v22 }
 0x26a   :  { %1465 = vmatpush.msra.mxu2 %v7225_v43  ;;  %v1163_v6 = vmul.f32 %v3012_v35, %v5278_v10  ;;  %vm1168_vm13 = vweird.f32 %v3012_v35 }
 0x26b   :  { %1533 = vmatpush.msra.mxu3 %v7226_v28  ;;  %1553 = vmatpush.msra.mxu0 %v7227_v50  ;;  %v7235_v50 = vld [vmem:[#allocation92_spill] sm:$0xff]  ;;  %vm1169_vm15 = vmor %vm1167_vm14, %vm1168_vm13 }
 0x26c   :  { %1466 = vmatpush.msra.mxu2 %v7228_v42  ;;  %v1164_v28 = vsub.f32 1.0, %v1163_v6  ;;  %v7236_v6 = vld [vmem:[#allocation98_spill] sm:$0xff] }
 0x26d   :  { %1534 = vmatpush.msra.mxu3 %v7229_v55  ;;  %1554 = vmatpush.msra.mxu0 %v7230_v32  ;;  %v1153_v55 = vand.u32 2147483648, %v1141_v22 }
 0x26e   :  { %1467 = vmatpush.msra.mxu2 %v7231_v2 }
 0x26f   :  { %v3014_v21 = vpop.eup %3013  ;;  %1535 = vmatpush.msra.mxu3 %v7232_v61  ;;  %1555 = vmatpush.msra.mxu0 %v7233_v57  ;;  %v1151_v61 = vand.u32 2147483647, %v1141_v22  ;;  %v1165_v57 = vmul.f32 %v3012_v35, %v1164_v28  ;;  %v7240_v28 = vld [vmem:[#allocation102_spill] sm:$0xff] }
 0x270   :  { %v1143_v43 = vmul.f32 %v3014_v21, %v1141_v22  ;;  %1468 = vmatpush.msra.mxu2 %v7234_v26  ;;  %vm1148_vm9 = vweird.f32 %v3014_v21  ;;  %v1134_v26 = vpop.f32.mrf.mxu1  ;;  %v1173_v22 = vand.u32 2147483648, %v5278_v10 }
 0x271   :  { %1536 = vmatpush.msra.mxu3 %v7235_v50  ;;  %1556 = vmatpush.msra.mxu0 %v5032_v59  ;;  %vm1149_vm11 = vmor %vm1147_vm10, %vm1148_vm9  ;;  %vm1152_vm12 = vcmp.eq.f32.partialorder %v1151_v61, 8.507059e+37 }
 0x272   :  { %v1144_v42 = vsub.f32 1.0, %v1143_v43  ;;  %1469 = vmatpush.msra.mxu2 %v5039_v36  ;;  %v7237_v43 = vld [vmem:[#allocation100_spill] sm:$0xff]  ;;  %v1154_v36 = vor.u32 1.1754944e-38, %v1153_v55 }
 0x273   :  { %1537 = vmatpush.msra.mxu3 %v5045_v33  ;;  %1557 = vmatpush.msra.mxu0 %v5051_v60  ;;  %v7238_v33 = vld [vmem:[#allocation101_spill] sm:$0xff] }
 0x274   :  { %v1145_v2 = vmul.f32 %v3014_v21, %v1144_v42  ;;  %1470 = vmatpush.msra.mxu2 %v5058_v41  ;;  %v7239_v42 = vld [vmem:[#allocation12_spill] sm:$0xff]  ;;  %v1166_v41 = vadd.f32 %v3012_v35, %v1165_v57 }
 0x275   :  { %1538 = vmatpush.msra.mxu3 %v7236_v6  ;;  %1558 = vmatpush.msra.mxu0 %v5071_v25  ;;  %v1177_v60 = vadd.f32 %v1134_v26, %v7239_v42  ;;  %v7241_v25 = vld [vmem:[#allocation103_spill] sm:$0xff]  ;;  %v7242_v26 = vld [vmem:[#allocation77_spill] sm:$0xff] }
 0x276   :  { %v1146_v59 = vadd.f32 %v3014_v21, %v1145_v2  ;;  %1471 = vmatpush.msra.mxu2 %v7237_v43  ;;  %v1171_v2 = vand.u32 2147483647, %v5278_v10  ;;  %v1170_v61 = vsel %vm1169_vm15, %v3012_v35, %v1166_v41  ;;  %v7259_v41 = vld [vmem:[#allocation35_spill] sm:$0xff] }
 0x277   :  { %1539 = vmatpush.msra.mxu3 %v7238_v33  ;;  %1559 = vmatpush.msra.mxu0 %v5096_v53  ;;  %v7261_v10 = vld [vmem:[#allocation111_spill] sm:$0xff] }
 0x278   :  { %v1150_v50 = vsel %vm1149_vm11, %v3014_v21, %v1146_v59  ;;  %1472 = vmatpush.msra.mxu2 %v7240_v28  ;;  %v1174_v21 = vor.u32 1.1754944e-38, %v1173_v22  ;;  %vm1172_vm0 = vcmp.eq.f32.partialorder %v1171_v2, 8.507059e+37  ;;  %v7262_v35 = vld [vmem:[#allocation39_spill] sm:$0xff]  ;;  %v7264_v22 = vld [vmem:[#allocation112_spill] sm:$0xff] }
 0x279   :  { %v1155_v6 = vsel %vm1152_vm12, %v1154_v36, %v1150_v50  ;;  %1540 = vmatpush.msra.mxu3 %v7241_v25  ;;  %1560 = vmatpush.msra.mxu0 %v5116_v14  ;;  %v7266_v2 = vld [vmem:[#allocation40_spill] sm:$0xff] }
 0x27a   :  { %v1178_v55 = vmul.f32 %v1177_v60, %v1155_v6  ;;  %v1175_v57 = vsel %vm1172_vm0, %v1174_v21, %v1170_v61  ;;  %v7258_v60 = vld [vmem:[#allocation110_spill] sm:$0xff]  ;;  %v7269_v61 = vld [vmem:[#allocation47_spill] sm:$0xff]  ;;  %v7270_v21 = vld [vmem:[#allocation65_spill] sm:$0xff] }
 0x27b   :  { %v1181_v50 = vsub.f32 1.0, %v1175_v57  ;;  %v1183_v42 = vmul.f32 %v1175_v57, %v5120_v11  ;;  %v7263_v6 = vld [vmem:[#allocation38_spill] sm:$0xff]  ;;  %v7271_v57 = vld [vmem:[#allocation37_spill] sm:$0xff] }
 0x27c   :  { %v1179_v59 = vadd.f32 %v1178_v55, %v7242_v26  ;;  %v7265_v55 = vld [vmem:[#allocation41_spill] sm:$0xff] }
 0x27d   :  { %v7267_v26 = vld [vmem:[#allocation113_spill] sm:$0xff] }
 0x27e   :  { %3015 = vtanh.f32 %v1179_v59  ;;  %v7268_v59 = vld [vmem:[#allocation42_spill] sm:$0xff] }
 0x284   :  { %v3016_v36 = vpop.eup %3015 }
 0x285   :  { %v1182_v14 = vmul.f32 %v3016_v36, %v1181_v50  ;;  %v245_v50 = vadd.f32 %v7271_v57, %v7270_v21  ;;  %v7272_v36 = vld [vmem:[#allocation66_spill] sm:$0xff] }
 0x287   :  { %v5326_v25 = vadd.f32 %v1183_v42, %v1182_v14  ;;  %v7260_v14 = vld [vmem:[#allocation34_spill] sm:$0xff]  ;;  %v7273_v42 = vld [vmem:[#allocation21_spill] sm:$0xff] }
 0x289   :  { %7243 = vst [vmem:[#allocation9_spill] sm:$0xff] %v5326_v25  ;;  %1317 = vmatmul.f32.vlgmr.msra.gmra.mxu1 %v5326_v25  ;;  %1337 = vmatmul.f32.vlgmr.msrb.gmra.mxu2 %v5326_v25 }
 0x28a   :  { %1357 = vmatmul.f32.vlgmr.msrb.gmra.mxu3 %v5326_v25  ;;  %1565 = vmatpush.msra.mxu1 %v5128_v40 }
 0x28b   :  { %1641 = vmatpush.msrb.mxu2 %v4588_v37  ;;  %1661 = vmatpush.msrb.mxu3 %v4594_v12  ;;  %v7244_v37 = vld [vmem:[#allocation16_spill] sm:$0xff]  ;;  %v7245_v12 = vld [vmem:[#allocation15_spill] sm:$0xff] }
 0x28c   :  { %1566 = vmatpush.msra.mxu1 %v5136_v54 }
 0x28d   :  { %1642 = vmatpush.msrb.mxu2 %v4601_v63  ;;  %1662 = vmatpush.msrb.mxu3 %v4607_v48  ;;  %v7246_v63 = vld [vmem:[#allocation106_spill] sm:$0xff]  ;;  %v7247_v48 = vld [vmem:[#allocation20_spill] sm:$0xff] }
 0x28e   :  { %1567 = vmatpush.msra.mxu1 %v5144_v18 }
 0x28f   :  { %1643 = vmatpush.msrb.mxu2 %v4614_v45  ;;  %1663 = vmatpush.msrb.mxu3 %v4620_v46  ;;  %v7248_v45 = vld [vmem:[#allocation19_spill] sm:$0xff] }
 0x290   :  { %1568 = vmatpush.msra.mxu1 %v5152_v15  ;;  %v7249_v46 = vld [vmem:[#allocation107_spill] sm:$0xff] }
 0x291   :  { %1644 = vmatpush.msrb.mxu2 %v4627_v30  ;;  %1664 = vmatpush.msrb.mxu3 %v4633_v5  ;;  %v7250_v30 = vld [vmem:[#allocation23_spill] sm:$0xff]  ;;  %v7251_v5 = vld [vmem:[#allocation22_spill] sm:$0xff] }
 0x292   :  { %1569 = vmatpush.msra.mxu1 %v5160_v13 }
 0x293   :  { %1645 = vmatpush.msrb.mxu2 %v4640_v8  ;;  %1665 = vmatpush.msrb.mxu3 %v4646_v17  ;;  %v7252_v8 = vld [vmem:[#allocation108_spill] sm:$0xff] }
 0x294   :  { %1570 = vmatpush.msra.mxu1 %v5168_v31  ;;  %v7253_v17 = vld [vmem:[#allocation28_spill] sm:$0xff] }
 0x295   :  { %1646 = vmatpush.msrb.mxu2 %v4653_v58  ;;  %1666 = vmatpush.msrb.mxu3 %v4659_v56  ;;  %v7254_v58 = vld [vmem:[#allocation27_spill] sm:$0xff]  ;;  %v7255_v56 = vld [vmem:[#allocation109_spill] sm:$0xff] }
 0x296   :  { %1571 = vmatpush.msra.mxu1 %v5176_v23 }
 0x297   :  { %1647 = vmatpush.msrb.mxu2 %v4666_v62  ;;  %1667 = vmatpush.msrb.mxu3 %v7244_v37  ;;  %v7256_v62 = vld [vmem:[#allocation31_spill] sm:$0xff]  ;;  %v286_v37 = vadd.f32 %v7273_v42, %v7272_v36 }
 0x298   :  { %1572 = vmatpush.msra.mxu1 %v5184_v29 }
 0x299   :  { %1648 = vmatpush.msrb.mxu2 %v4679_v19  ;;  %1668 = vmatpush.msrb.mxu3 %v7245_v12  ;;  %v7257_v19 = vld [vmem:[#allocation30_spill] sm:$0xff] }
 0x29a   :  { %1573 = vmatpush.msra.mxu1 %v7246_v63 }
 0x29b   :  { %1649 = vmatpush.msrb.mxu2 %v7247_v48  ;;  %1669 = vmatpush.msrb.mxu3 %v7248_v45 }
 0x29c   :  { %1574 = vmatpush.msra.mxu1 %v7249_v46 }
 0x29d   :  { %1650 = vmatpush.msrb.mxu2 %v7250_v30  ;;  %1670 = vmatpush.msrb.mxu3 %v7251_v5 }
 0x29e   :  { %1575 = vmatpush.msra.mxu1 %v7252_v8 }
 0x29f   :  { %1651 = vmatpush.msrb.mxu2 %v7253_v17  ;;  %1671 = vmatpush.msrb.mxu3 %v7254_v58 }
 0x2a0   :  { %1576 = vmatpush.msra.mxu1 %v7255_v56 }
 0x2a1   :  { %1652 = vmatpush.msrb.mxu2 %v7256_v62  ;;  %1672 = vmatpush.msrb.mxu3 %v7257_v19 }
 0x2a2   :  { %1577 = vmatpush.msra.mxu1 %v7258_v60 }
 0x2a3   :  { %1653 = vmatpush.msrb.mxu2 %v7259_v41  ;;  %1673 = vmatpush.msrb.mxu3 %v7260_v14 }
 0x2a4   :  { %1578 = vmatpush.msra.mxu1 %v7261_v10 }
 0x2a5   :  { %1654 = vmatpush.msrb.mxu2 %v7262_v35  ;;  %1674 = vmatpush.msrb.mxu3 %v7263_v6 }
 0x2a6   :  { %1579 = vmatpush.msra.mxu1 %v7264_v22 }
 0x2a7   :  { %1655 = vmatpush.msrb.mxu2 %v7265_v55  ;;  %1675 = vmatpush.msrb.mxu3 %v7266_v2 }
 0x2a8   :  { %1580 = vmatpush.msra.mxu1 %v7267_v26 }
 0x2a9   :  { %1656 = vmatpush.msrb.mxu2 %v7268_v59  ;;  %1676 = vmatpush.msrb.mxu3 %v7269_v61 }
 0x2d7   :  { %v1250_v42 = vpop.f32.mrf.mxu0 }
 0x2dc   :  { %v1210_v12 = vpop.f32.mrf.mxu2  ;;  %v1230_v48 = vpop.f32.mrf.mxu3 }
 0x2dd   :  { %v1253_v45 = vadd.f32 %v1210_v12, %v245_v50  ;;  %v1273_v30 = vadd.f32 %v1230_v48, %v286_v37 }
 0x2df   :  { %v2930_v5 = vmul.f32 -1.442695, %v1253_v45  ;;  %v2931_v17 = vmul.f32 -1.442695, %v1273_v30  ;;  %v5386_v45 = vld [vmem:[%s6690_s5] sm:$0xff] }
 0x2e0   :  { %v1293_v30 = vadd.f32 %v5386_v45, %v1250_v42 }
 0x2e1   :  { %3017 = vpow2.f32 %v2930_v5 }
 0x2e2   :  { %3019 = vpow2.f32 %v2931_v17 }
 0x2e7   :  { %v3018_v58 = vpop.eup %3017 }
 0x2e8   :  { %v3020_v62 = vpop.eup %3019  ;;  %v1257_v19 = vadd.f32 1.0, %v3018_v58 }
 0x2e9   :  { %v1277_v41 = vadd.f32 1.0, %v3020_v62  ;;  %v7274_v62 = vld [vmem:[#allocation25_spill] sm:$0xff] }
 0x2ea   :  { %3021 = vrcp.f32 %v1257_v19  ;;  %v1269_v59 = vand.u32 2147483648, %v1257_v19  ;;  %v1267_v50 = vand.u32 2147483647, %v1257_v19  ;;  %vm1263_vm2 = vweird.f32 %v1257_v19 }
 0x2eb   :  { %3023 = vrcp.f32 %v1277_v41  ;;  %vm1283_vm6 = vweird.f32 %v1277_v41 }
 0x2ec   :  { %v1270_v48 = vor.u32 1.1754944e-38, %v1269_v59  ;;  %vm1268_vm4 = vcmp.eq.f32.partialorder %v1267_v50, 8.507059e+37  ;;  %v7275_v50 = vld [vmem:[#allocation51_spill] sm:$0xff] }
 0x2f0   :  { %v3022_v14 = vpop.eup %3021 }
 0x2f1   :  { %v3024_v35 = vpop.eup %3023  ;;  %v1259_v6 = vmul.f32 %v3022_v14, %v1257_v19  ;;  %vm1264_vm1 = vweird.f32 %v3022_v14  ;;  %v1287_v19 = vand.u32 2147483647, %v1277_v41 }
 0x2f2   :  { %v1279_v55 = vmul.f32 %v3024_v35, %v1277_v41  ;;  %vm1265_vm3 = vmor %vm1263_vm2, %vm1264_vm1  ;;  %vm1284_vm5 = vweird.f32 %v3024_v35 }
 0x2f3   :  { %v1260_v2 = vsub.f32 1.0, %v1259_v6  ;;  %v327_v6 = vadd.f32 %v7274_v62, %v4421_v49  ;;  %vm1285_vm7 = vmor %vm1283_vm6, %vm1284_vm5  ;;  %vm1288_vm8 = vcmp.eq.f32.partialorder %v1287_v19, 8.507059e+37  ;;  %v7290_v19 = vld [vmem:[#allocation85_spill] sm:$0xff] }
 0x2f4   :  { %v1280_v61 = vsub.f32 1.0, %v1279_v55 }
 0x2f5   :  { %v1261_v57 = vmul.f32 %v3022_v14, %v1260_v2  ;;  %v1289_v2 = vand.u32 2147483648, %v1277_v41 }
 0x2f6   :  { %v1281_v37 = vmul.f32 %v3024_v35, %v1280_v61 }
 0x2f7   :  { %v1262_v12 = vadd.f32 %v3022_v14, %v1261_v57  ;;  %v1290_v57 = vor.u32 1.1754944e-38, %v1289_v2 }
 0x2f8   :  { %v1282_v58 = vadd.f32 %v3024_v35, %v1281_v37 }
 0x2f9   :  { %v1266_v5 = vsel %vm1265_vm3, %v3022_v14, %v1262_v12  ;;  %v7276_v12 = vld [vmem:[#allocation53_spill] sm:$0xff] }
 0x2fa   :  { %v1271_v17 = vsel %vm1268_vm4, %v1270_v48, %v1266_v5  ;;  %v1286_v61 = vsel %vm1285_vm7, %v3024_v35, %v1282_v58  ;;  %v371_v37 = vadd.f32 %v7276_v12, %v7275_v50 }
 0x2fb   :  { %v1294_v55 = vmul.f32 %v1293_v30, %v1271_v17  ;;  %v1291_v11 = vsel %vm1288_vm8, %v1290_v57, %v1286_v61  ;;  %v7291_v61 = vld [vmem:[#allocation86_spill] sm:$0xff] }
 0x2fc   :  { %v1297_v42 = vsub.f32 1.0, %v1291_v11  ;;  %v1299_v5 = vmul.f32 %v1291_v11, %v5262_v7  ;;  %v7278_v11 = vld [vmem:[#allocation75_spill] sm:$0xff]  ;;  %v5814_v7 = vld [vmem:[%s6687_s6 + $0xe0] sm:$0xff] }
 0x2fd   :  { %v1295_v59 = vadd.f32 %v1294_v55, %v327_v6  ;;  %v7289_v55 = vld [vmem:[#allocation84_spill] sm:$0xff]  ;;  %7327 = vst [vmem:[#allocation77_spill] sm:$0xff] %v5814_v7 }
 0x2ff   :  { %3025 = vtanh.f32 %v1295_v59 }
 0x305   :  { %v3026_v14 = vpop.eup %3025 }
 0x306   :  { %v1298_v48 = vmul.f32 %v3026_v14, %v1297_v42  ;;  %v1318_v62 = vpop.f32.mrf.mxu1  ;;  %v7292_v14 = vld [vmem:[#allocation88_spill] sm:$0xff] }
 0x307   :  { %v1361_v30 = vadd.f32 %v1318_v62, %v371_v37 }
 0x308   :  { %v5394_v17 = vadd.f32 %v1299_v5, %v1298_v48  ;;  %v7293_v48 = vld [vmem:[#allocation89_spill] sm:$0xff]  ;;  %v7294_v5 = vld [vmem:[#allocation90_spill] sm:$0xff] }
 0x309   :  { %v2932_v41 = vmul.f32 -1.442695, %v1361_v30 }
 0x30a   :  { %7277 = vst [vmem:[#allocation10_spill] sm:$0xff] %v5394_v17  ;;  %1433 = vmatmul.f32.vlgmr.msrb.gmra.mxu0 %v5394_v17  ;;  %1453 = vmatmul.f32.vlgmr.msrb.gmra.mxu1 %v5394_v17 }
 0x30b   :  { %3027 = vpow2.f32 %v2932_v41  ;;  %1473 = vmatmul.f32.vlgmr.msra.gmra.mxu2 %v5394_v17  ;;  %1681 = vmatpush.msrb.mxu0 %v4809_v47  ;;  %v7295_v41 = vld [vmem:[#allocation91_spill] sm:$0xff] }
 0x30c   :  { %v1338_v35 = vpop.f32.mrf.mxu2  ;;  %1749 = vmatpush.msrb.mxu1 %v4815_v52  ;;  %1769 = vmatpush.msra.mxu2 %v4821_v51  ;;  %v7279_v51 = vld [vmem:[#allocation8_spill] sm:$0xff] }
 0x30d   :  { %v1381_v58 = vadd.f32 %v1338_v35, %v7278_v11  ;;  %1682 = vmatpush.msrb.mxu0 %v4828_v20  ;;  %v7280_v20 = vld [vmem:[#allocation7_spill] sm:$0xff]  ;;  %v1358_v37 = vpop.f32.mrf.mxu3  ;;  %v7296_v11 = vld [vmem:[#allocation92_spill] sm:$0xff] }
 0x30e   :  { %1750 = vmatpush.msrb.mxu1 %v4834_v39  ;;  %1770 = vmatpush.msra.mxu2 %v4840_v0  ;;  %v7281_v0 = vld [vmem:[#allocation18_spill] sm:$0xff] }
 0x30f   :  { %v2933_v6 = vmul.f32 -1.442695, %v1381_v58  ;;  %1683 = vmatpush.msrb.mxu0 %v4846_v3 }
 0x310   :  { %1751 = vmatpush.msrb.mxu1 %v4852_v9  ;;  %1771 = vmatpush.msra.mxu2 %v7209_v34  ;;  %v7282_v9 = vld [vmem:[#allocation59_spill] sm:$0xff]  ;;  %v7283_v34 = vld [vmem:[#allocation78_spill] sm:$0xff] }
 0x311   :  { %v3028_v47 = vpop.eup %3027  ;;  %3029 = vpow2.f32 %v2933_v6  ;;  %1684 = vmatpush.msrb.mxu0 %v7210_v44  ;;  %v7284_v44 = vld [vmem:[#allocation79_spill] sm:$0xff] }
 0x312   :  { %v1365_v52 = vadd.f32 1.0, %v3028_v47  ;;  %1752 = vmatpush.msrb.mxu1 %v7211_v38  ;;  %1772 = vmatpush.msra.mxu2 %v7212_v24  ;;  %v7285_v24 = vld [vmem:[#allocation80_spill] sm:$0xff] }
 0x313   :  { %1685 = vmatpush.msrb.mxu0 %v7213_v1  ;;  %v7286_v1 = vld [vmem:[#allocation81_spill] sm:$0xff]  ;;  %v5439_v47 = vld [vmem:[%s6691_s7] sm:$0xff] }
 0x314   :  { %3031 = vrcp.f32 %v1365_v52  ;;  %1753 = vmatpush.msrb.mxu1 %v7214_v16  ;;  %1773 = vmatpush.msra.mxu2 %v7215_v27  ;;  %v7287_v27 = vld [vmem:[#allocation82_spill] sm:$0xff]  ;;  %v1377_v59 = vand.u32 2147483648, %v1365_v52  ;;  %v1375_v42 = vand.u32 2147483647, %v1365_v52  ;;  %vm1371_vm10 = vweird.f32 %v1365_v52  ;;  %7298 = vst [vmem:[#allocation55_spill] sm:$0xff] %v5439_v47 }
 0x315   :  { %1686 = vmatpush.msrb.mxu0 %v7216_v4  ;;  %v7288_v4 = vld [vmem:[#allocation83_spill] sm:$0xff] }
 0x316   :  { %1754 = vmatpush.msrb.mxu1 %v7279_v51  ;;  %1774 = vmatpush.msra.mxu2 %v7280_v20  ;;  %v1378_v35 = vor.u32 1.1754944e-38, %v1377_v59  ;;  %vm1376_vm12 = vcmp.eq.f32.partialorder %v1375_v42, 8.507059e+37  ;;  %v1401_v51 = vadd.f32 %v5439_v47, %v1358_v37  ;;  %v7299_v20 = vld [vmem:[#allocation94_spill] sm:$0xff]  ;;  %v7306_v59 = vld [vmem:[#allocation103_spill] sm:$0xff] }
 0x317   :  { %v3030_v39 = vpop.eup %3029  ;;  %1687 = vmatpush.msrb.mxu0 %v7281_v0  ;;  %v7301_v0 = vld [vmem:[#allocation96_spill] sm:$0xff] }
 0x318   :  { %v1385_v3 = vadd.f32 1.0, %v3030_v39  ;;  %1755 = vmatpush.msrb.mxu1 %v7282_v9  ;;  %1775 = vmatpush.msra.mxu2 %v7283_v34  ;;  %v7300_v39 = vld [vmem:[#allocation95_spill] sm:$0xff] }
 0x319   :  { %1688 = vmatpush.msrb.mxu0 %v7284_v44 }
 0x31a   :  { %v3032_v38 = vpop.eup %3031  ;;  %3033 = vrcp.f32 %v1385_v3  ;;  %1756 = vmatpush.msrb.mxu1 %v7285_v24  ;;  %1776 = vmatpush.msra.mxu2 %v7286_v1  ;;  %v1397_v34 = vand.u32 2147483648, %v1385_v3  ;;  %v1395_v24 = vand.u32 2147483647, %v1385_v3  ;;  %v7303_v1 = vld [vmem:[#allocation98_spill] sm:$0xff]  ;;  %vm1391_vm14 = vweird.f32 %v1385_v3 }
 0x31b   :  { %v1367_v16 = vmul.f32 %v3032_v38, %v1365_v52  ;;  %1689 = vmatpush.msrb.mxu0 %v7287_v27  ;;  %vm1372_vm9 = vweird.f32 %v3032_v38 }
 0x31c   :  { %1757 = vmatpush.msrb.mxu1 %v7288_v4  ;;  %1777 = vmatpush.msra.mxu2 %v7289_v55  ;;  %vm1373_vm11 = vmor %vm1371_vm10, %vm1372_vm9  ;;  %v7305_v4 = vld [vmem:[#allocation76_spill] sm:$0xff]  ;;  %vm1396_vm0 = vcmp.eq.f32.partialorder %v1395_v24, 8.507059e+37 }
 0x31d   :  { %v1368_v2 = vsub.f32 1.0, %v1367_v16  ;;  %1690 = vmatpush.msrb.mxu0 %v7290_v19  ;;  %v7304_v16 = vld [vmem:[#allocation99_spill] sm:$0xff] }
 0x31e   :  { %1758 = vmatpush.msrb.mxu1 %v7291_v61  ;;  %1778 = vmatpush.msra.mxu2 %v7230_v32  ;;  %v7297_v32 = vld [vmem:[#allocation93_spill] sm:$0xff]  ;;  %v7307_v61 = vld [vmem:[#allocation104_spill] sm:$0xff] }
 0x31f   :  { %v1369_v57 = vmul.f32 %v3032_v38, %v1368_v2  ;;  %1691 = vmatpush.msrb.mxu0 %v7292_v14  ;;  %v1398_v2 = vor.u32 1.1754944e-38, %v1397_v34 }
 0x320   :  { %v3034_v12 = vpop.eup %3033  ;;  %1759 = vmatpush.msrb.mxu1 %v7293_v48  ;;  %1779 = vmatpush.msra.mxu2 %v7294_v5  ;;  %v5510_v48 = vld [vmem:[%s6686_s4 + $0x128] sm:$0xff]  ;;  %v5523_v5 = vld [vmem:[%s6686_s4 + $0x110] sm:$0xff] }
 0x321   :  { %v1387_v62 = vmul.f32 %v3034_v12, %v1385_v3  ;;  %v1370_v30 = vadd.f32 %v3032_v38, %v1369_v57  ;;  %1692 = vmatpush.msrb.mxu0 %v7295_v41  ;;  %vm1392_vm13 = vweird.f32 %v3034_v12  ;;  %v5562_v41 = vld [vmem:[%s6686_s4 + $0xc8] sm:$0xff] }
 0x322   :  { %1760 = vmatpush.msrb.mxu1 %v7296_v11  ;;  %1780 = vmatpush.msra.mxu2 %v7297_v32  ;;  %vm1393_vm15 = vmor %vm1391_vm14, %vm1392_vm13  ;;  %v5588_v11 = vld [vmem:[%s6686_s4 + $0x98] sm:$0xff]  ;;  %v5601_v32 = vld [vmem:[%s6686_s4 + $0x80] sm:$0xff] }
 0x323   :  { %v1388_v58 = vsub.f32 1.0, %v1387_v62  ;;  %v1374_v6 = vsel %vm1373_vm11, %v3032_v38, %v1370_v30  ;;  %1693 = vmatpush.msrb.mxu0 %v7299_v20  ;;  %v7302_v38 = vld [vmem:[#allocation97_spill] sm:$0xff]  ;;  %v5536_v62 = vld [vmem:[%s6686_s4 + $0xf8] sm:$0xff]  ;;  %v5549_v30 = vld [vmem:[%s6686_s4 + $0xe0] sm:$0xff] }
 0x324   :  { %v1379_v52 = vsel %vm1376_vm12, %v1378_v35, %v1374_v6  ;;  %1761 = vmatpush.msrb.mxu1 %v7300_v39  ;;  %1781 = vmatpush.msra.mxu2 %v7301_v0  ;;  %v5575_v35 = vld [vmem:[%s6686_s4 + $0xb0] sm:$0xff]  ;;  %v5653_v20 = vld [vmem:[%s6686_s4 + $0x20] sm:$0xff] }
 0x325   :  { %v1389_v9 = vmul.f32 %v3034_v12, %v1388_v58  ;;  %v1402_v44 = vmul.f32 %v1401_v51, %v1379_v52  ;;  %1694 = vmatpush.msrb.mxu0 %v7302_v38  ;;  %v5614_v58 = vld [vmem:[%s6686_s4 + $0x68] sm:$0xff]  ;;  %v5627_v6 = vld [vmem:[%s6686_s4 + $0x50] sm:$0xff]  ;;  %v5640_v51 = vld [vmem:[%s6686_s4 + $0x38] sm:$0xff] }
 0x326   :  { %1762 = vmatpush.msrb.mxu1 %v7303_v1  ;;  %1782 = vmatpush.msra.mxu2 %v7304_v16  ;;  %v5666_v52 = vld [vmem:[%s6686_s4 + $0x8] sm:$0xff]  ;;  %v7308_v39 = vld [vmem:[#allocation32_spill] sm:$0xff] }
 0x327   :  { %v1390_v27 = vadd.f32 %v3034_v12, %v1389_v9  ;;  %v1403_v55 = vadd.f32 %v1402_v44, %v7305_v4  ;;  %1695 = vmatpush.msrb.mxu0 %v7237_v43  ;;  %v248_v0 = vadd.f32 %v7308_v39, %v7270_v21  ;;  %v7309_v9 = vld [vmem:[#allocation36_spill] sm:$0xff] }
 0x328   :  { %1763 = vmatpush.msrb.mxu1 %v7238_v33  ;;  %1783 = vmatpush.msra.mxu2 %v5096_v53  ;;  %v5465_v33 = vld [vmem:[%s6686_s4 + $0x168] sm:$0xff]  ;;  %v5471_v53 = vld [vmem:[%s6686_s4 + $0x170] sm:$0xff] }
 0x329   :  { %v1394_v19 = vsel %vm1393_vm15, %v3034_v12, %v1390_v27  ;;  %3035 = vtanh.f32 %v1403_v55  ;;  %1696 = vmatpush.msrb.mxu0 %v7240_v28  ;;  %v5484_v28 = vld [vmem:[%s6686_s4 + $0x158] sm:$0xff]  ;;  %v5497_v12 = vld [vmem:[%s6686_s4 + $0x140] sm:$0xff] }
 0x32a   :  { %1764 = vmatpush.msrb.mxu1 %v7306_v59  ;;  %1784 = vmatpush.msra.mxu2 %v7307_v61  ;;  %v1399_v3 = vsel %vm1396_vm0, %v1398_v2, %v1394_v19 }
 0x32b   :  { %v1405_v57 = vsub.f32 1.0, %v1399_v3  ;;  %v1407_v43 = vmul.f32 %v1399_v3, %v5326_v25 }
 0x32f   :  { %v3036_v42 = vpop.eup %3035 }
 0x330   :  { %v1406_v14 = vmul.f32 %v3036_v42, %v1405_v57 }
 0x332   :  { %v5456_v37 = vadd.f32 %v1407_v43, %v1406_v14 }
 0x334   :  { %1541 = vmatmul.f32.vlgmr.msra.gmra.mxu3 %v5456_v37  ;;  %1561 = vmatmul.f32.vlgmr.msra.gmra.mxu0 %v5456_v37 }
 0x335   :  { %1581 = vmatmul.f32.vlgmr.msra.gmra.mxu1 %v5456_v37  ;;  %1789 = vmatpush.msra.mxu3 %v5128_v40  ;;  %v5478_v40 = vld [vmem:[%s6686_s4 + $0x150] sm:$0xff] }
 0x336   :  { %1865 = vmatpush.msra.mxu0 %v5465_v33  ;;  %1885 = vmatpush.msra.mxu1 %v5471_v53 }
 0x337   :  { %1790 = vmatpush.msra.mxu3 %v5136_v54  ;;  %v5491_v54 = vld [vmem:[%s6686_s4 + $0x138] sm:$0xff] }
 0x338   :  { %1866 = vmatpush.msra.mxu0 %v5478_v40  ;;  %1886 = vmatpush.msra.mxu1 %v5484_v28 }
 0x339   :  { %1791 = vmatpush.msra.mxu3 %v5144_v18  ;;  %v5504_v18 = vld [vmem:[%s6686_s4 + $0x120] sm:$0xff] }
 0x33a   :  { %1867 = vmatpush.msra.mxu0 %v5491_v54  ;;  %1887 = vmatpush.msra.mxu1 %v5497_v12 }
 0x33b   :  { %1792 = vmatpush.msra.mxu3 %v5152_v15  ;;  %v5517_v15 = vld [vmem:[%s6686_s4 + $0x108] sm:$0xff] }
 0x33c   :  { %1868 = vmatpush.msra.mxu0 %v5504_v18  ;;  %1888 = vmatpush.msra.mxu1 %v5510_v48 }
 0x33d   :  { %1793 = vmatpush.msra.mxu3 %v5160_v13  ;;  %v5530_v13 = vld [vmem:[%s6686_s4 + $0xf0] sm:$0xff] }
 0x33e   :  { %1869 = vmatpush.msra.mxu0 %v5517_v15  ;;  %1889 = vmatpush.msra.mxu1 %v5523_v5 }
 0x33f   :  { %1794 = vmatpush.msra.mxu3 %v5168_v31  ;;  %v5543_v31 = vld [vmem:[%s6686_s4 + $0xd8] sm:$0xff] }
 0x340   :  { %1870 = vmatpush.msra.mxu0 %v5530_v13  ;;  %1890 = vmatpush.msra.mxu1 %v5536_v62 }
 0x341   :  { %1795 = vmatpush.msra.mxu3 %v5176_v23  ;;  %v5556_v23 = vld [vmem:[%s6686_s4 + $0xc0] sm:$0xff] }
 0x342   :  { %1871 = vmatpush.msra.mxu0 %v5543_v31  ;;  %1891 = vmatpush.msra.mxu1 %v5549_v30 }
 0x343   :  { %1796 = vmatpush.msra.mxu3 %v5184_v29  ;;  %v5569_v29 = vld [vmem:[%s6686_s4 + $0xa8] sm:$0xff] }
 0x344   :  { %1872 = vmatpush.msra.mxu0 %v5556_v23  ;;  %1892 = vmatpush.msra.mxu1 %v5562_v41 }
 0x345   :  { %1797 = vmatpush.msra.mxu3 %v7246_v63  ;;  %v5582_v63 = vld [vmem:[%s6686_s4 + $0x90] sm:$0xff] }
 0x346   :  { %1873 = vmatpush.msra.mxu0 %v5569_v29  ;;  %1893 = vmatpush.msra.mxu1 %v5575_v35 }
 0x347   :  { %1798 = vmatpush.msra.mxu3 %v7249_v46  ;;  %v5595_v46 = vld [vmem:[%s6686_s4 + $0x78] sm:$0xff] }
 0x348   :  { %1874 = vmatpush.msra.mxu0 %v5582_v63  ;;  %1894 = vmatpush.msra.mxu1 %v5588_v11 }
 0x349   :  { %1799 = vmatpush.msra.mxu3 %v7252_v8  ;;  %v5608_v8 = vld [vmem:[%s6686_s4 + $0x60] sm:$0xff] }
 0x34a   :  { %1875 = vmatpush.msra.mxu0 %v5595_v46  ;;  %1895 = vmatpush.msra.mxu1 %v5601_v32 }
 0x34b   :  { %1800 = vmatpush.msra.mxu3 %v7255_v56  ;;  %v5621_v56 = vld [vmem:[%s6686_s4 + $0x48] sm:$0xff] }
 0x34c   :  { %1876 = vmatpush.msra.mxu0 %v5608_v8  ;;  %1896 = vmatpush.msra.mxu1 %v5614_v58 }
 0x34d   :  { %1801 = vmatpush.msra.mxu3 %v7258_v60  ;;  %v5634_v60 = vld [vmem:[%s6686_s4 + $0x30] sm:$0xff] }
 0x34e   :  { %1877 = vmatpush.msra.mxu0 %v5621_v56  ;;  %1897 = vmatpush.msra.mxu1 %v5627_v6 }
 0x34f   :  { %1802 = vmatpush.msra.mxu3 %v7261_v10  ;;  %v5647_v10 = vld [vmem:[%s6686_s4 + $0x18] sm:$0xff] }
 0x350   :  { %1878 = vmatpush.msra.mxu0 %v5634_v60  ;;  %1898 = vmatpush.msra.mxu1 %v5640_v51 }
 0x351   :  { %1803 = vmatpush.msra.mxu3 %v7264_v22  ;;  %v5660_v22 = vld [vmem:[%s6686_s4] sm:$0xff] }
 0x352   :  { %1879 = vmatpush.msra.mxu0 %v5647_v10  ;;  %1899 = vmatpush.msra.mxu1 %v5653_v20 }
 0x353   :  { %1804 = vmatpush.msra.mxu3 %v7267_v26  ;;  %v289_v26 = vadd.f32 %v7309_v9, %v7272_v36 }
 0x354   :  { %1880 = vmatpush.msra.mxu0 %v5660_v22  ;;  %1900 = vmatpush.msra.mxu1 %v5666_v52 }
 0x387   :  { %v1434_v34 = vpop.f32.mrf.mxu0  ;;  %v1454_v44 = vpop.f32.mrf.mxu1 }
 0x388   :  { %v1477_v38 = vadd.f32 %v1434_v34, %v248_v0  ;;  %v1497_v24 = vadd.f32 %v1454_v44, %v289_v26 }
 0x38a   :  { %v2934_v1 = vmul.f32 -1.442695, %v1477_v38  ;;  %v2935_v16 = vmul.f32 -1.442695, %v1497_v24 }
 0x38c   :  { %3037 = vpow2.f32 %v2934_v1 }
 0x38d   :  { %3039 = vpow2.f32 %v2935_v16  ;;  %v7310_v16 = vld [vmem:[#allocation43_spill] sm:$0xff] }
 0x38e   :  { %v1474_v9 = vpop.f32.mrf.mxu2 }
 0x38f   :  { %v1517_v38 = vadd.f32 %v5386_v45, %v1474_v9 }
 0x392   :  { %v3038_v27 = vpop.eup %3037 }
 0x393   :  { %v3040_v4 = vpop.eup %3039  ;;  %v1481_v55 = vadd.f32 1.0, %v3038_v27  ;;  %v330_v27 = vadd.f32 %v7310_v16, %v4421_v49 }
 0x394   :  { %v1501_v2 = vadd.f32 1.0, %v3040_v4 }
 0x395   :  { %3041 = vrcp.f32 %v1481_v55  ;;  %v1493_v14 = vand.u32 2147483648, %v1481_v55  ;;  %v1491_v39 = vand.u32 2147483647, %v1481_v55  ;;  %vm1487_vm2 = vweird.f32 %v1481_v55 }
 0x396   :  { %3043 = vrcp.f32 %v1501_v2  ;;  %v1513_v4 = vand.u32 2147483648, %v1501_v2  ;;  %vm1507_vm6 = vweird.f32 %v1501_v2 }
 0x397   :  { %v1494_v34 = vor.u32 1.1754944e-38, %v1493_v14  ;;  %vm1492_vm4 = vcmp.eq.f32.partialorder %v1491_v39, 8.507059e+37  ;;  %v7311_v39 = vld [vmem:[#allocation73_spill] sm:$0xff] }
 0x39b   :  { %v3042_v19 = vpop.eup %3041 }
 0x39c   :  { %v3044_v59 = vpop.eup %3043  ;;  %v1483_v61 = vmul.f32 %v3042_v19, %v1481_v55  ;;  %vm1488_vm1 = vweird.f32 %v3042_v19  ;;  %v1514_v55 = vor.u32 1.1754944e-38, %v1513_v4  ;;  %v5701_v4 = vld [vmem:[%s6687_s6 + $0x170] sm:$0xff] }
 0x39d   :  { %v1503_v3 = vmul.f32 %v3044_v59, %v1501_v2  ;;  %vm1489_vm3 = vmor %vm1487_vm2, %vm1488_vm1  ;;  %vm1508_vm5 = vweird.f32 %v3044_v59 }
 0x39e   :  { %v1484_v57 = vsub.f32 1.0, %v1483_v61  ;;  %vm1509_vm7 = vmor %vm1507_vm6, %vm1508_vm5 }
 0x39f   :  { %v1504_v42 = vsub.f32 1.0, %v1503_v3  ;;  %v1511_v3 = vand.u32 2147483647, %v1501_v2 }
 0x3a0   :  { %v1485_v43 = vmul.f32 %v3042_v19, %v1484_v57 }
 0x3a1   :  { %v1505_v0 = vmul.f32 %v3044_v59, %v1504_v42  ;;  %vm1512_vm8 = vcmp.eq.f32.partialorder %v1511_v3, 8.507059e+37  ;;  %v5707_v3 = vld [vmem:[%s6686_s4 + $0x160] sm:$0xff] }
 0x3a2   :  { %v1486_v26 = vadd.f32 %v3042_v19, %v1485_v43 }
 0x3a3   :  { %v1506_v24 = vadd.f32 %v3044_v59, %v1505_v0  ;;  %v7312_v0 = vld [vmem:[#allocation71_spill] sm:$0xff] }
 0x3a4   :  { %v1490_v44 = vsel %vm1489_vm3, %v3042_v19, %v1486_v26  ;;  %v409_v9 = vadd.f32 %v7312_v0, %v7311_v39 }
 0x3a5   :  { %v1495_v1 = vsel %vm1492_vm4, %v1494_v34, %v1490_v44  ;;  %v1510_v42 = vsel %vm1509_vm7, %v3044_v59, %v1506_v24  ;;  %v7313_v59 = vld [vmem:[#allocation48_spill] sm:$0xff] }
 0x3a6   :  { %v1518_v61 = vmul.f32 %v1517_v38, %v1495_v1  ;;  %v1515_v19 = vsel %vm1512_vm8, %v1514_v55, %v1510_v42  ;;  %v368_v24 = vadd.f32 %v7313_v59, %v7275_v50  ;;  %v5689_v1 = vld [vmem:[%s6686_s4 + $0x178] sm:$0xff]  ;;  %v5775_v59 = vld [vmem:[%s6687_s6 + $0x110] sm:$0xff] }
 0x3a7   :  { %v1521_v14 = vsub.f32 1.0, %v1515_v19  ;;  %v1523_v34 = vmul.f32 %v1515_v19, %v5394_v17  ;;  %v5719_v42 = vld [vmem:[%s6687_s6 + $0x158] sm:$0xff]  ;;  %v5725_v19 = vld [vmem:[%s6686_s4 + $0x148] sm:$0xff]  ;;  %7321 = vst [vmem:[#allocation46_spill] sm:$0xff] %v5775_v59 }
 0x3a8   :  { %v1519_v57 = vadd.f32 %v1518_v61, %v330_v27  ;;  %v5695_v27 = vld [vmem:[%s6687_s6 + $0x168] sm:$0xff]  ;;  %v5808_v17 = vld [vmem:[%s6687_s6 + $0xd8] sm:$0xff] }
 0x3a9   :  { %7326 = vst [vmem:[#allocation102_spill] sm:$0xff] %v5808_v17 }
 0x3aa   :  { %3045 = vtanh.f32 %v1519_v57  ;;  %v5713_v57 = vld [vmem:[%s6687_s6 + $0x150] sm:$0xff] }
 0x3b0   :  { %v3046_v43 = vpop.eup %3045 }
 0x3b1   :  { %v1522_v26 = vmul.f32 %v3046_v43, %v1521_v14  ;;  %v1562_v49 = vpop.f32.mrf.mxu0  ;;  %v5731_v14 = vld [vmem:[%s6687_s6 + $0x138] sm:$0xff]  ;;  %v5737_v43 = vld [vmem:[%s6687_s6 + $0x140] sm:$0xff] }
 0x3b2   :  { %v1605_v44 = vadd.f32 %v1562_v49, %v409_v9  ;;  %7314 = vst [vmem:[#allocation50_spill] sm:$0xff] %v5731_v14  ;;  %v5743_v9 = vld [vmem:[%s6686_s4 + $0x130] sm:$0xff]  ;;  %v5757_v49 = vld [vmem:[%s6687_s6 + $0x128] sm:$0xff] }
 0x3b3   :  { %v5679_v38 = vadd.f32 %v1523_v34, %v1522_v26  ;;  %7315 = vst [vmem:[#allocation13_spill] sm:$0xff] %v5737_v43  ;;  %v5751_v34 = vld [vmem:[%s6687_s6 + $0x120] sm:$0xff] }
 0x3b4   :  { %v2937_v2 = vmul.f32 -1.442695, %v1605_v44  ;;  %7316 = vst [vmem:[#allocation17_spill] sm:$0xff] %v5743_v9  ;;  %v5763_v44 = vld [vmem:[%s6686_s4 + $0x118] sm:$0xff] }
 0x3b5   :  { %1657 = vmatmul.f32.vlgmr.msrb.gmra.mxu2 %v5679_v38  ;;  %1677 = vmatmul.f32.vlgmr.msrb.gmra.mxu3 %v5679_v38  ;;  %7317 = vst [vmem:[#allocation24_spill] sm:$0xff] %v5751_v34 }
 0x3b6   :  { %3047 = vpow2.f32 %v2937_v2  ;;  %1697 = vmatmul.f32.vlgmr.msrb.gmra.mxu0 %v5679_v38  ;;  %1905 = vmatpush.msrb.mxu2 %v5689_v1  ;;  %7318 = vst [vmem:[#allocation26_spill] sm:$0xff] %v5757_v49  ;;  %v5769_v2 = vld [vmem:[%s6687_s6 + $0x108] sm:$0xff] }
 0x3b7   :  { %v1542_v16 = vpop.f32.mrf.mxu3  ;;  %1973 = vmatpush.msrb.mxu3 %v5695_v27  ;;  %1993 = vmatpush.msrb.mxu0 %v5701_v4  ;;  %7319 = vst [vmem:[#allocation33_spill] sm:$0xff] %v5763_v44 }
 0x3b8   :  { %v1585_v61 = vadd.f32 %v1542_v16, %v368_v24  ;;  %1906 = vmatpush.msrb.mxu2 %v5707_v3  ;;  %7320 = vst [vmem:[#allocation44_spill] sm:$0xff] %v5769_v2  ;;  %v5782_v24 = vld [vmem:[%s6686_s4 + $0x100] sm:$0xff]  ;;  %v5788_v16 = vld [vmem:[%s6687_s6 + $0xf0] sm:$0xff] }
 0x3b9   :  { %1974 = vmatpush.msrb.mxu3 %v5713_v57  ;;  %1994 = vmatpush.msrb.mxu0 %v5719_v42  ;;  %7322 = vst [vmem:[#allocation87_spill] sm:$0xff] %v5782_v24 }
 0x3ba   :  { %v2936_v55 = vmul.f32 -1.442695, %v1585_v61  ;;  %1907 = vmatpush.msrb.mxu2 %v5725_v19  ;;  %7323 = vst [vmem:[#allocation100_spill] sm:$0xff] %v5788_v16  ;;  %v5794_v61 = vld [vmem:[%s6687_s6 + $0xf8] sm:$0xff] }
 0x3bb   :  { %1975 = vmatpush.msrb.mxu3 %v5731_v14  ;;  %1995 = vmatpush.msrb.mxu0 %v5737_v43  ;;  %7324 = vst [vmem:[#allocation101_spill] sm:$0xff] %v5794_v61 }
 0x3bc   :  { %v3048_v0 = vpop.eup %3047  ;;  %3049 = vpow2.f32 %v2936_v55  ;;  %1908 = vmatpush.msrb.mxu2 %v5743_v9 }
 0x3bd   :  { %v5746_v26 = vadd.f32 1.0, %v3048_v0  ;;  %1976 = vmatpush.msrb.mxu3 %v5751_v34  ;;  %1996 = vmatpush.msrb.mxu0 %v5757_v49  ;;  %v5800_v0 = vld [vmem:[%s6686_s4 + $0xe8] sm:$0xff]  ;;  %v1582_v34 = vpop.f32.mrf.mxu1  ;;  %v5943_v49 = vld [vmem:[%s6687_s6 + $0x30] sm:$0xff] }
 0x3be   :  { %1909 = vmatpush.msrb.mxu2 %v5763_v44  ;;  %7325 = vst [vmem:[#allocation12_spill] sm:$0xff] %v5800_v0  ;;  %v5936_v44 = vld [vmem:[%s6686_s4 + $0x40] sm:$0xff] }
 0x3bf   :  { %1977 = vmatpush.msrb.mxu3 %v5769_v2  ;;  %1997 = vmatpush.msrb.mxu0 %v5775_v59  ;;  %3051 = vrcp.f32 %v5746_v26  ;;  %7346 = vst [vmem:[#allocation39_spill] sm:$0xff] %v5936_v44  ;;  %vm1615_vm14 = vweird.f32 %v5746_v26 }
 0x3c0   :  { %1910 = vmatpush.msrb.mxu2 %v5782_v24  ;;  %v5885_v24 = vld [vmem:[%s6687_s6 + $0x78] sm:$0xff]  ;;  %7347 = vst [vmem:[#allocation38_spill] sm:$0xff] %v5943_v49 }
 0x3c1   :  { %1978 = vmatpush.msrb.mxu3 %v5788_v16  ;;  %1998 = vmatpush.msrb.mxu0 %v5794_v61  ;;  %v5859_v16 = vld [vmem:[%s6686_s4 + $0xa0] sm:$0xff]  ;;  %7338 = vst [vmem:[#allocation27_spill] sm:$0xff] %v5885_v24 }
 0x3c2   :  { %v3050_v55 = vpop.eup %3049  ;;  %1911 = vmatpush.msrb.mxu2 %v5800_v0  ;;  %v5820_v0 = vld [vmem:[%s6686_s4 + $0xd0] sm:$0xff]  ;;  %7334 = vst [vmem:[#allocation23_spill] sm:$0xff] %v5859_v16 }
 0x3c3   :  { %v5803_v25 = vadd.f32 1.0, %v3050_v55  ;;  %1979 = vmatpush.msrb.mxu3 %v5808_v17  ;;  %1999 = vmatpush.msrb.mxu0 %v5814_v7  ;;  %7328 = vst [vmem:[#allocation16_spill] sm:$0xff] %v5820_v0  ;;  %v5827_v55 = vld [vmem:[%s6687_s6 + $0xc0] sm:$0xff]  ;;  %v5833_v17 = vld [vmem:[%s6687_s6 + $0xc8] sm:$0xff] }
 0x3c4   :  { %1912 = vmatpush.msrb.mxu2 %v5820_v0  ;;  %7329 = vst [vmem:[#allocation15_spill] sm:$0xff] %v5827_v55  ;;  %v5841_v0 = vld [vmem:[%s6686_s4 + $0xb8] sm:$0xff] }
 0x3c5   :  { %3053 = vrcp.f32 %v5803_v25  ;;  %1980 = vmatpush.msrb.mxu3 %v5827_v55  ;;  %7330 = vst [vmem:[#allocation106_spill] sm:$0xff] %v5833_v17  ;;  %2000 = vmatpush.msrb.mxu0 %v5833_v17  ;;  %v5836_v7 = vpop.eup %3051  ;;  %v5847_v55 = vld [vmem:[%s6687_s6 + $0xa8] sm:$0xff]  ;;  %v5853_v17 = vld [vmem:[%s6687_s6 + $0xb0] sm:$0xff]  ;;  %vm1595_vm10 = vweird.f32 %v5803_v25 }
 0x3c6   :  { %7331 = vst [vmem:[#allocation20_spill] sm:$0xff] %v5841_v0  ;;  %1913 = vmatpush.msrb.mxu2 %v5841_v0  ;;  %v1611_v0 = vmul.f32 %v5836_v7, %v5746_v26  ;;  %vm1616_vm13 = vweird.f32 %v5836_v7 }
 0x3c7   :  { %7332 = vst [vmem:[#allocation19_spill] sm:$0xff] %v5847_v55  ;;  %1981 = vmatpush.msrb.mxu3 %v5847_v55  ;;  %2001 = vmatpush.msrb.mxu0 %v5853_v17  ;;  %v5867_v55 = vld [vmem:[%s6687_s6 + $0x90] sm:$0xff]  ;;  %vm1617_vm15 = vmor %vm1615_vm14, %vm1616_vm13 }
 0x3c8   :  { %7333 = vst [vmem:[#allocation107_spill] sm:$0xff] %v5853_v17  ;;  %1914 = vmatpush.msrb.mxu2 %v5859_v16  ;;  %v5873_v17 = vld [vmem:[%s6687_s6 + $0x98] sm:$0xff]  ;;  %v5879_v16 = vld [vmem:[%s6686_s4 + $0x88] sm:$0xff]  ;;  %v1612_v2 = vsub.f32 1.0, %v1611_v0  ;;  %v1601_v0 = vand.u32 2147483648, %v5803_v25 }
 0x3c9   :  { %7335 = vst [vmem:[#allocation22_spill] sm:$0xff] %v5867_v55  ;;  %1982 = vmatpush.msrb.mxu3 %v5867_v55  ;;  %2002 = vmatpush.msrb.mxu0 %v5873_v17  ;;  %v5891_v55 = vld [vmem:[%s6687_s6 + $0x80] sm:$0xff] }
 0x3ca   :  { %7336 = vst [vmem:[#allocation108_spill] sm:$0xff] %v5873_v17  ;;  %1915 = vmatpush.msrb.mxu2 %v5879_v16 }
 0x3cb   :  { %7337 = vst [vmem:[#allocation28_spill] sm:$0xff] %v5879_v16  ;;  %v3054_v61 = vpop.eup %3053  ;;  %1983 = vmatpush.msrb.mxu3 %v5885_v24  ;;  %2003 = vmatpush.msrb.mxu0 %v5891_v55  ;;  %v5898_v16 = vld [vmem:[%s6686_s4 + $0x70] sm:$0xff]  ;;  %v5904_v24 = vld [vmem:[%s6687_s6 + $0x60] sm:$0xff] }
 0x3cc   :  { %7339 = vst [vmem:[#allocation109_spill] sm:$0xff] %v5891_v55  ;;  %v1591_v17 = vmul.f32 %v3054_v61, %v5803_v25  ;;  %1916 = vmatpush.msrb.mxu2 %v5898_v16  ;;  %v5910_v55 = vld [vmem:[%s6687_s6 + $0x68] sm:$0xff]  ;;  %vm1596_vm9 = vweird.f32 %v3054_v61 }
 0x3cd   :  { %7340 = vst [vmem:[#allocation31_spill] sm:$0xff] %v5898_v16  ;;  %1984 = vmatpush.msrb.mxu3 %v5904_v24  ;;  %2004 = vmatpush.msrb.mxu0 %v5910_v55  ;;  %v5916_v16 = vld [vmem:[%s6686_s4 + $0x58] sm:$0xff]  ;;  %vm1597_vm11 = vmor %vm1595_vm10, %vm1596_vm9 }
 0x3ce   :  { %7341 = vst [vmem:[#allocation30_spill] sm:$0xff] %v5904_v24  ;;  %v1592_v59 = vsub.f32 1.0, %v1591_v17  ;;  %1917 = vmatpush.msrb.mxu2 %v5916_v16  ;;  %v5923_v24 = vld [vmem:[%s6687_s6 + $0x48] sm:$0xff]  ;;  %v5929_v17 = vld [vmem:[%s6687_s6 + $0x50] sm:$0xff] }
 0x3cf   :  { %7342 = vst [vmem:[#allocation110_spill] sm:$0xff] %v5910_v55  ;;  %1985 = vmatpush.msrb.mxu3 %v5923_v24  ;;  %2005 = vmatpush.msrb.mxu0 %v5929_v17 }
 0x3d0   :  { %7343 = vst [vmem:[#allocation35_spill] sm:$0xff] %v5916_v16  ;;  %v1593_v55 = vmul.f32 %v3054_v61, %v1592_v59  ;;  %v1599_v16 = vand.u32 2147483647, %v5803_v25  ;;  %1918 = vmatpush.msrb.mxu2 %v5936_v44  ;;  %v5949_v59 = vld [vmem:[%s6687_s6 + $0x38] sm:$0xff]  ;;  %v1602_v44 = vor.u32 1.1754944e-38, %v1601_v0  ;;  %v5968_v25 = vld [vmem:[%s6687_s6 + $0x20] sm:$0xff] }
 0x3d1   :  { %7344 = vst [vmem:[#allocation34_spill] sm:$0xff] %v5923_v24  ;;  %v1613_v24 = vmul.f32 %v5836_v7, %v1612_v2  ;;  %1986 = vmatpush.msrb.mxu3 %v5943_v49  ;;  %2006 = vmatpush.msrb.mxu0 %v5949_v59  ;;  %v5956_v2 = vld [vmem:[%s6686_s4 + $0x28] sm:$0xff]  ;;  %v5962_v49 = vld [vmem:[%s6687_s6 + $0x18] sm:$0xff]  ;;  %v5975_v0 = vld [vmem:[%s6686_s4 + $0x10] sm:$0xff] }
 0x3d2   :  { %7345 = vst [vmem:[#allocation111_spill] sm:$0xff] %v5929_v17  ;;  %v1594_v17 = vadd.f32 %v3054_v61, %v1593_v55  ;;  %1919 = vmatpush.msrb.mxu2 %v5956_v2  ;;  %v1625_v55 = vadd.f32 %v5439_v47, %v1582_v34  ;;  %vm1600_vm12 = vcmp.eq.f32.partialorder %v1599_v16, 8.507059e+37  ;;  %v5989_v34 = vld [vmem:[%s6687_s6 + $0x8] sm:$0xff]  ;;  %v7355_v16 = vld [vmem:[#allocation74_spill] sm:$0xff] }
 0x3d3   :  { %7348 = vst [vmem:[#allocation112_spill] sm:$0xff] %v5949_v59  ;;  %1987 = vmatpush.msrb.mxu3 %v5962_v49  ;;  %2007 = vmatpush.msrb.mxu0 %v5968_v25 }
 0x3d4   :  { %7349 = vst [vmem:[#allocation41_spill] sm:$0xff] %v5956_v2  ;;  %v1598_v59 = vsel %vm1597_vm11, %v3054_v61, %v1594_v17  ;;  %1920 = vmatpush.msrb.mxu2 %v5975_v0  ;;  %v7356_v61 = vld [vmem:[#allocation72_spill] sm:$0xff]  ;;  %v1621_v17 = vand.u32 2147483648, %v5746_v26 }
 0x3d5   :  { %7350 = vst [vmem:[#allocation40_spill] sm:$0xff] %v5962_v49  ;;  %v1614_v49 = vadd.f32 %v5836_v7, %v1613_v24  ;;  %v1603_v2 = vsel %vm1600_vm12, %v1602_v44, %v1598_v59  ;;  %2008 = vmatpush.msrb.mxu0 %v5989_v34  ;;  %v450_v24 = vadd.f32 %v7356_v61, %v7355_v16  ;;  %v1619_v59 = vand.u32 2147483647, %v5746_v26 }
 0x3d6   :  { %7351 = vst [vmem:[#allocation113_spill] sm:$0xff] %v5968_v25  ;;  %v5983_v25 = vld [vmem:[%s6687_s6] sm:$0xff]  ;;  %v1626_v44 = vmul.f32 %v1625_v55, %v1603_v2  ;;  %v1622_v47 = vor.u32 1.1754944e-38, %v1621_v17 }
 0x3d7   :  { %7352 = vst [vmem:[#allocation42_spill] sm:$0xff] %v5975_v0  ;;  %1988 = vmatpush.msrb.mxu3 %v5983_v25  ;;  %vm1620_vm0 = vcmp.eq.f32.partialorder %v1619_v59, 8.507059e+37 }
 0x3d8   :  { %7353 = vst [vmem:[#allocation47_spill] sm:$0xff] %v5983_v25  ;;  %v1627_v0 = vadd.f32 %v1626_v44, %v450_v24  ;;  %v1618_v25 = vsel %vm1617_vm15, %v5836_v7, %v1614_v49  ;;  %v6007_v7 = vld [vmem:[%s6687_s6 + $0x178] sm:$0xff] }
 0x3d9   :  { %7354 = vst [vmem:[#allocation65_spill] sm:$0xff] %v5989_v34  ;;  %v1623_v9 = vsel %vm1620_vm0, %v1622_v47, %v1618_v25  ;;  %v6015_v47 = vld [vmem:[%s6687_s6 + $0x160] sm:$0xff] }
 0x3da   :  { %3055 = vtanh.f32 %v1627_v0  ;;  %v1629_v14 = vsub.f32 1.0, %v1623_v9  ;;  %v1631_v43 = vmul.f32 %v1623_v9, %v5456_v37 }
 0x3e0   :  { %v3056_v34 = vpop.eup %3055 }
 0x3e1   :  { %v1630_v61 = vmul.f32 %v3056_v34, %v1629_v14  ;;  %v6023_v14 = vld [vmem:[%s6687_s6 + $0x148] sm:$0xff] }
 0x3e3   :  { %v5999_v16 = vadd.f32 %v1631_v43, %v1630_v61 }
 0x3e5   :  { %1765 = vmatmul.f32.vlgmr.msrb.gmra.mxu1 %v5999_v16  ;;  %1785 = vmatmul.f32.vlgmr.msra.gmra.mxu2 %v5999_v16 }
 0x3e6   :  { %1805 = vmatmul.f32.vlgmr.msra.gmra.mxu3 %v5999_v16  ;;  %2013 = vmatpush.msrb.mxu1 %v6007_v7 }
 0x3e7   :  { %2089 = vmatpush.msra.mxu2 %v5465_v33  ;;  %2109 = vmatpush.msra.mxu3 %v5471_v53  ;;  %v6031_v33 = vld [vmem:[%s6687_s6 + $0x130] sm:$0xff]  ;;  %v6039_v53 = vld [vmem:[%s6687_s6 + $0x118] sm:$0xff] }
 0x3e8   :  { %2014 = vmatpush.msrb.mxu1 %v6015_v47 }
 0x3e9   :  { %2090 = vmatpush.msra.mxu2 %v5478_v40  ;;  %2110 = vmatpush.msra.mxu3 %v5484_v28  ;;  %v6047_v40 = vld [vmem:[%s6687_s6 + $0x100] sm:$0xff]  ;;  %v6055_v28 = vld [vmem:[%s6687_s6 + $0xe8] sm:$0xff] }
 0x3ea   :  { %2015 = vmatpush.msrb.mxu1 %v6023_v14 }
 0x3eb   :  { %2091 = vmatpush.msra.mxu2 %v5491_v54  ;;  %2111 = vmatpush.msra.mxu3 %v5497_v12  ;;  %v6063_v54 = vld [vmem:[%s6687_s6 + $0xd0] sm:$0xff]  ;;  %v6071_v12 = vld [vmem:[%s6687_s6 + $0xb8] sm:$0xff] }
 0x3ec   :  { %2016 = vmatpush.msrb.mxu1 %v6031_v33 }
 0x3ed   :  { %2092 = vmatpush.msra.mxu2 %v5504_v18  ;;  %2112 = vmatpush.msra.mxu3 %v5510_v48  ;;  %v6079_v18 = vld [vmem:[%s6687_s6 + $0xa0] sm:$0xff]  ;;  %v6087_v48 = vld [vmem:[%s6687_s6 + $0x88] sm:$0xff] }
 0x3ee   :  { %2017 = vmatpush.msrb.mxu1 %v6039_v53 }
 0x3ef   :  { %2093 = vmatpush.msra.mxu2 %v5517_v15  ;;  %2113 = vmatpush.msra.mxu3 %v5523_v5  ;;  %v6095_v15 = vld [vmem:[%s6687_s6 + $0x70] sm:$0xff]  ;;  %v6103_v5 = vld [vmem:[%s6687_s6 + $0x58] sm:$0xff] }
 0x3f0   :  { %2018 = vmatpush.msrb.mxu1 %v6047_v40 }
 0x3f1   :  { %2094 = vmatpush.msra.mxu2 %v5530_v13  ;;  %2114 = vmatpush.msra.mxu3 %v5536_v62  ;;  %v6111_v13 = vld [vmem:[%s6687_s6 + $0x40] sm:$0xff]  ;;  %v6119_v62 = vld [vmem:[%s6687_s6 + $0x28] sm:$0xff] }
 0x3f2   :  { %2019 = vmatpush.msrb.mxu1 %v6055_v28 }
 0x3f3   :  { %2095 = vmatpush.msra.mxu2 %v5543_v31  ;;  %2115 = vmatpush.msra.mxu3 %v5549_v30  ;;  %v6127_v31 = vld [vmem:[%s6687_s6 + $0x10] sm:$0xff]  ;;  %v7357_v30 = vld [vmem:[#allocation45_spill] sm:$0xff] }
 0x3f4   :  { %2020 = vmatpush.msrb.mxu1 %v6063_v54 }
 0x3f5   :  { %2096 = vmatpush.msra.mxu2 %v5556_v23  ;;  %2116 = vmatpush.msra.mxu3 %v5562_v41  ;;  %v251_v23 = vadd.f32 %v7357_v30, %v7270_v21  ;;  %v7358_v41 = vld [vmem:[#allocation54_spill] sm:$0xff] }
 0x3f6   :  { %2021 = vmatpush.msrb.mxu1 %v6071_v12 }
 0x3f7   :  { %2097 = vmatpush.msra.mxu2 %v5569_v29  ;;  %2117 = vmatpush.msra.mxu3 %v5575_v35  ;;  %v292_v29 = vadd.f32 %v7358_v41, %v7272_v36 }
 0x3f8   :  { %2022 = vmatpush.msrb.mxu1 %v6079_v18 }
 0x3f9   :  { %2098 = vmatpush.msra.mxu2 %v5582_v63  ;;  %2118 = vmatpush.msra.mxu3 %v5588_v11 }
 0x3fa   :  { %2023 = vmatpush.msrb.mxu1 %v6087_v48 }
 0x3fb   :  { %2099 = vmatpush.msra.mxu2 %v5595_v46  ;;  %2119 = vmatpush.msra.mxu3 %v5601_v32 }
 0x3fc   :  { %2024 = vmatpush.msrb.mxu1 %v6095_v15 }
 0x3fd   :  { %2100 = vmatpush.msra.mxu2 %v5608_v8  ;;  %2120 = vmatpush.msra.mxu3 %v5614_v58 }
 0x3fe   :  { %2025 = vmatpush.msrb.mxu1 %v6103_v5 }
 0x3ff   :  { %2101 = vmatpush.msra.mxu2 %v5621_v56  ;;  %2121 = vmatpush.msra.mxu3 %v5627_v6 }
 0x400   :  { %2026 = vmatpush.msrb.mxu1 %v6111_v13 }
 0x401   :  { %2102 = vmatpush.msra.mxu2 %v5634_v60  ;;  %2122 = vmatpush.msra.mxu3 %v5640_v51 }
 0x402   :  { %2027 = vmatpush.msrb.mxu1 %v6119_v62 }
 0x403   :  { %2103 = vmatpush.msra.mxu2 %v5647_v10  ;;  %2123 = vmatpush.msra.mxu3 %v5653_v20 }
 0x404   :  { %2028 = vmatpush.msrb.mxu1 %v6127_v31 }
 0x405   :  { %2104 = vmatpush.msra.mxu2 %v5660_v22  ;;  %2124 = vmatpush.msra.mxu3 %v5666_v52 }
 0x433   :  { %v1698_v2 = vpop.f32.mrf.mxu0 }
 0x434   :  { %v1741_v34 = vadd.f32 %v5386_v45, %v1698_v2  ;;  %v7360_v45 = vld [vmem:[#allocation14_spill] sm:$0xff]  ;;  %v7366_v2 = vld [vmem:[#allocation24_spill] sm:$0xff] }
 0x438   :  { %v1658_v35 = vpop.f32.mrf.mxu2  ;;  %v1678_v63 = vpop.f32.mrf.mxu3 }
 0x439   :  { %v1701_v11 = vadd.f32 %v1658_v35, %v251_v23  ;;  %v1721_v46 = vadd.f32 %v1678_v63, %v292_v29  ;;  %v7359_v23 = vld [vmem:[#allocation52_spill] sm:$0xff] }
 0x43b   :  { %v2938_v32 = vmul.f32 -1.442695, %v1701_v11  ;;  %v2939_v8 = vmul.f32 -1.442695, %v1721_v46 }
 0x43d   :  { %3057 = vpow2.f32 %v2938_v32  ;;  %v365_v32 = vadd.f32 %v7360_v45, %v7275_v50 }
 0x43e   :  { %3059 = vpow2.f32 %v2939_v8 }
 0x443   :  { %v3058_v58 = vpop.eup %3057 }
 0x444   :  { %v3060_v56 = vpop.eup %3059  ;;  %v1705_v6 = vadd.f32 1.0, %v3058_v58 }
 0x445   :  { %v1725_v60 = vadd.f32 1.0, %v3060_v56 }
 0x446   :  { %3061 = vrcp.f32 %v1705_v6  ;;  %v1717_v43 = vand.u32 2147483648, %v1705_v6  ;;  %v1715_v49 = vand.u32 2147483647, %v1705_v6  ;;  %vm1711_vm2 = vweird.f32 %v1705_v6 }
 0x447   :  { %3063 = vrcp.f32 %v1725_v60  ;;  %v1737_v61 = vand.u32 2147483648, %v1725_v60  ;;  %vm1731_vm6 = vweird.f32 %v1725_v60  ;;  %v1735_v30 = vand.u32 2147483647, %v1725_v60 }
 0x448   :  { %v1718_v0 = vor.u32 1.1754944e-38, %v1717_v43  ;;  %vm1716_vm4 = vcmp.eq.f32.partialorder %v1715_v49, 8.507059e+37  ;;  %v7364_v49 = vld [vmem:[#allocation17_spill] sm:$0xff] }
 0x449   :  { %v1738_v35 = vor.u32 1.1754944e-38, %v1737_v61  ;;  %vm1736_vm8 = vcmp.eq.f32.partialorder %v1735_v30, 8.507059e+37  ;;  %v7377_v30 = vld [vmem:[#allocation106_spill] sm:$0xff] }
 0x44c   :  { %v3062_v51 = vpop.eup %3061 }
 0x44d   :  { %v3064_v10 = vpop.eup %3063  ;;  %v1707_v20 = vmul.f32 %v3062_v51, %v1705_v6  ;;  %vm1712_vm1 = vweird.f32 %v3062_v51 }
 0x44e   :  { %v1727_v22 = vmul.f32 %v3064_v10, %v1725_v60  ;;  %vm1713_vm3 = vmor %vm1711_vm2, %vm1712_vm1  ;;  %vm1732_vm5 = vweird.f32 %v3064_v10 }
 0x44f   :  { %v1708_v52 = vsub.f32 1.0, %v1707_v20  ;;  %vm1733_vm7 = vmor %vm1731_vm6, %vm1732_vm5 }
 0x450   :  { %v1728_v9 = vsub.f32 1.0, %v1727_v22 }
 0x451   :  { %v1709_v26 = vmul.f32 %v3062_v51, %v1708_v52 }
 0x452   :  { %v1729_v25 = vmul.f32 %v3064_v10, %v1728_v9  ;;  %v7362_v9 = vld [vmem:[#allocation13_spill] sm:$0xff] }
 0x453   :  { %v1710_v55 = vadd.f32 %v3062_v51, %v1709_v26  ;;  %v7363_v26 = vld [vmem:[#allocation50_spill] sm:$0xff] }
 0x454   :  { %v1730_v44 = vadd.f32 %v3064_v10, %v1729_v25  ;;  %v7371_v25 = vld [vmem:[#allocation101_spill] sm:$0xff] }
 0x455   :  { %v1714_v24 = vsel %vm1713_vm3, %v3062_v51, %v1710_v55  ;;  %v7372_v55 = vld [vmem:[#allocation100_spill] sm:$0xff] }
 0x456   :  { %v1719_v17 = vsel %vm1716_vm4, %v1718_v0, %v1714_v24  ;;  %v1734_v29 = vsel %vm1733_vm7, %v3064_v10, %v1730_v44  ;;  %v7361_v10 = vld [vmem:[#allocation69_spill] sm:$0xff]  ;;  %v7375_v44 = vld [vmem:[#allocation102_spill] sm:$0xff] }
 0x457   :  { %v1742_v59 = vmul.f32 %v1741_v34, %v1719_v17  ;;  %v1739_v63 = vsel %vm1736_vm8, %v1738_v35, %v1734_v29  ;;  %v406_v20 = vadd.f32 %v7361_v10, %v7311_v39  ;;  %v7373_v34 = vld [vmem:[#allocation12_spill] sm:$0xff]  ;;  %v7374_v17 = vld [vmem:[#allocation77_spill] sm:$0xff]  ;;  %v7380_v35 = vld [vmem:[#allocation107_spill] sm:$0xff] }
 0x458   :  { %v1745_v11 = vsub.f32 1.0, %v1739_v63  ;;  %v1747_v58 = vmul.f32 %v1739_v63, %v5679_v38  ;;  %v7379_v29 = vld [vmem:[#allocation20_spill] sm:$0xff]  ;;  %v7381_v63 = vld [vmem:[#allocation19_spill] sm:$0xff] }
 0x459   :  { %v1743_v41 = vadd.f32 %v1742_v59, %v7359_v23  ;;  %v7376_v59 = vld [vmem:[#allocation16_spill] sm:$0xff]  ;;  %v7378_v23 = vld [vmem:[#allocation15_spill] sm:$0xff] }
 0x45b   :  { %3065 = vtanh.f32 %v1743_v41 }
 0x461   :  { %v3066_v46 = vpop.eup %3065 }
 0x462   :  { %v1746_v8 = vmul.f32 %v3066_v46, %v1745_v11  ;;  %v1766_v56 = vpop.f32.mrf.mxu1  ;;  %v7382_v46 = vld [vmem:[#allocation23_spill] sm:$0xff] }
 0x463   :  { %v1809_v6 = vadd.f32 %v1766_v56, %v365_v32  ;;  %v7383_v32 = vld [vmem:[#allocation108_spill] sm:$0xff] }
 0x464   :  { %v6141_v51 = vadd.f32 %v1747_v58, %v1746_v8  ;;  %v7384_v8 = vld [vmem:[#allocation22_spill] sm:$0xff] }
 0x465   :  { %v2940_v60 = vmul.f32 -1.442695, %v1809_v6  ;;  %v7385_v6 = vld [vmem:[#allocation28_spill] sm:$0xff] }
 0x466   :  { %1881 = vmatmul.f32.vlgmr.msra.gmra.mxu0 %v6141_v51  ;;  %1901 = vmatmul.f32.vlgmr.msra.gmra.mxu1 %v6141_v51 }
 0x467   :  { %3067 = vpow2.f32 %v2940_v60  ;;  %1921 = vmatmul.f32.vlgmr.msrb.gmra.mxu2 %v6141_v51  ;;  %2129 = vmatpush.msra.mxu0 %v5689_v1 }
 0x468   :  { %v1786_v22 = vpop.f32.mrf.mxu2  ;;  %2217 = vmatpush.msrb.mxu2 %v5701_v4  ;;  %2197 = vmatpush.msra.mxu1 %v5695_v27  ;;  %v7365_v27 = vld [vmem:[#allocation26_spill] sm:$0xff] }
 0x469   :  { %v1829_v52 = vadd.f32 %v1786_v22, %v406_v20  ;;  %2130 = vmatpush.msra.mxu0 %v5707_v3  ;;  %v7367_v3 = vld [vmem:[#allocation33_spill] sm:$0xff]  ;;  %v1806_v10 = vpop.f32.mrf.mxu3  ;;  %v7387_v22 = vld [vmem:[#allocation27_spill] sm:$0xff] }
 0x46a   :  { %2218 = vmatpush.msrb.mxu2 %v5719_v42  ;;  %2198 = vmatpush.msra.mxu1 %v5713_v57  ;;  %v7368_v57 = vld [vmem:[#allocation46_spill] sm:$0xff]  ;;  %v7369_v42 = vld [vmem:[#allocation44_spill] sm:$0xff]  ;;  %v7386_v20 = vld [vmem:[#allocation109_spill] sm:$0xff] }
 0x46b   :  { %v2941_v43 = vmul.f32 -1.442695, %v1829_v52  ;;  %2131 = vmatpush.msra.mxu0 %v5725_v19  ;;  %v7370_v19 = vld [vmem:[#allocation87_spill] sm:$0xff] }
 0x46c   :  { %2219 = vmatpush.msrb.mxu2 %v7362_v9  ;;  %2199 = vmatpush.msra.mxu1 %v7363_v26  ;;  %v7388_v9 = vld [vmem:[#allocation31_spill] sm:$0xff] }
 0x46d   :  { %v3068_v1 = vpop.eup %3067  ;;  %3069 = vpow2.f32 %v2941_v43  ;;  %2132 = vmatpush.msra.mxu0 %v7364_v49  ;;  %v7390_v49 = vld [vmem:[#allocation30_spill] sm:$0xff] }
 0x46e   :  { %v1813_v4 = vadd.f32 1.0, %v3068_v1  ;;  %2220 = vmatpush.msrb.mxu2 %v7365_v27  ;;  %2200 = vmatpush.msra.mxu1 %v7366_v2  ;;  %v7389_v1 = vld [vmem:[#allocation110_spill] sm:$0xff] }
 0x46f   :  { %2133 = vmatpush.msra.mxu0 %v7367_v3  ;;  %v7391_v3 = vld [vmem:[#allocation55_spill] sm:$0xff] }
 0x470   :  { %3071 = vrcp.f32 %v1813_v4  ;;  %2221 = vmatpush.msrb.mxu2 %v7368_v57  ;;  %2201 = vmatpush.msra.mxu1 %v7369_v42  ;;  %v1825_v45 = vand.u32 2147483648, %v1813_v4  ;;  %v1823_v56 = vand.u32 2147483647, %v1813_v4  ;;  %vm1819_vm10 = vweird.f32 %v1813_v4  ;;  %v7392_v42 = vld [vmem:[#allocation35_spill] sm:$0xff] }
 0x471   :  { %2134 = vmatpush.msra.mxu0 %v7370_v19  ;;  %v1849_v57 = vadd.f32 %v7391_v3, %v1806_v10  ;;  %v7393_v19 = vld [vmem:[#allocation74_spill] sm:$0xff] }
 0x472   :  { %2222 = vmatpush.msrb.mxu2 %v7371_v25  ;;  %2202 = vmatpush.msra.mxu1 %v7372_v55  ;;  %v1826_v26 = vor.u32 1.1754944e-38, %v1825_v45  ;;  %vm1824_vm12 = vcmp.eq.f32.partialorder %v1823_v56, 8.507059e+37  ;;  %v7394_v25 = vld [vmem:[#allocation70_spill] sm:$0xff]  ;;  %v7405_v56 = vld [vmem:[#allocation47_spill] sm:$0xff] }
 0x473   :  { %v3070_v0 = vpop.eup %3069  ;;  %2135 = vmatpush.msra.mxu0 %v7373_v34  ;;  %v447_v55 = vadd.f32 %v7394_v25, %v7393_v19  ;;  %v7396_v34 = vld [vmem:[#allocation34_spill] sm:$0xff]  ;;  %v2330_v25 = vld [vmem:[%s6692_s8 + $0x20] sm:$0xff] }
 0x474   :  { %v1833_v24 = vadd.f32 1.0, %v3070_v0  ;;  %2223 = vmatpush.msrb.mxu2 %v7374_v17  ;;  %2203 = vmatpush.msra.mxu1 %v7375_v44 }
 0x475   :  { %2136 = vmatpush.msra.mxu0 %v7376_v59 }
 0x476   :  { %v3072_v61 = vpop.eup %3071  ;;  %3073 = vrcp.f32 %v1833_v24  ;;  %2224 = vmatpush.msrb.mxu2 %v7377_v30  ;;  %2204 = vmatpush.msra.mxu1 %v7378_v23  ;;  %v1845_v44 = vand.u32 2147483648, %v1833_v24  ;;  %v7397_v30 = vld [vmem:[#allocation39_spill] sm:$0xff]  ;;  %v7398_v23 = vld [vmem:[#allocation112_spill] sm:$0xff]  ;;  %vm1839_vm14 = vweird.f32 %v1833_v24 }
 0x477   :  { %v1815_v41 = vmul.f32 %v3072_v61, %v1813_v4  ;;  %2137 = vmatpush.msra.mxu0 %v7379_v29  ;;  %vm1820_vm9 = vweird.f32 %v3072_v61  ;;  %v7395_v4 = vld [vmem:[#allocation111_spill] sm:$0xff] }
 0x478   :  { %2225 = vmatpush.msrb.mxu2 %v7380_v35  ;;  %2205 = vmatpush.msra.mxu1 %v7381_v63  ;;  %vm1821_vm11 = vmor %vm1819_vm10, %vm1820_vm9  ;;  %v7400_v63 = vld [vmem:[#allocation41_spill] sm:$0xff]  ;;  %v1846_v45 = vor.u32 1.1754944e-38, %v1845_v44 }
 0x479   :  { %v1816_v11 = vsub.f32 1.0, %v1815_v41  ;;  %2138 = vmatpush.msra.mxu0 %v7382_v46  ;;  %v7399_v41 = vld [vmem:[#allocation38_spill] sm:$0xff]  ;;  %v7402_v46 = vld [vmem:[#allocation40_spill] sm:$0xff] }
 0x47a   :  { %2226 = vmatpush.msrb.mxu2 %v7383_v32  ;;  %2206 = vmatpush.msra.mxu1 %v7384_v8  ;;  %v7403_v8 = vld [vmem:[#allocation42_spill] sm:$0xff] }
 0x47b   :  { %v1817_v58 = vmul.f32 %v3072_v61, %v1816_v11  ;;  %2139 = vmatpush.msra.mxu0 %v7385_v6  ;;  %v7401_v11 = vld [vmem:[#allocation113_spill] sm:$0xff] }
 0x47c   :  { %v3074_v60 = vpop.eup %3073  ;;  %2227 = vmatpush.msrb.mxu2 %v7386_v20  ;;  %2207 = vmatpush.msra.mxu1 %v7387_v22 }
 0x47d   :  { %v1835_v52 = vmul.f32 %v3074_v60, %v1833_v24  ;;  %v1818_v43 = vadd.f32 %v3072_v61, %v1817_v58  ;;  %2140 = vmatpush.msra.mxu0 %v7388_v9  ;;  %vm1840_vm13 = vweird.f32 %v3074_v60  ;;  %v7404_v58 = vld [vmem:[#allocation65_spill] sm:$0xff]  ;;  %v2340_v9 = vld [vmem:[%s6692_s8 + $0x70] sm:$0xff] }
 0x47e   :  { %2228 = vmatpush.msrb.mxu2 %v7389_v1  ;;  %2208 = vmatpush.msra.mxu1 %v7390_v49  ;;  %vm1841_vm15 = vmor %vm1839_vm14, %vm1840_vm13  ;;  %v2336_v49 = vld [vmem:[%s6692_s8 + $0x50] sm:$0xff] }
 0x47f   :  { %v1836_v27 = vsub.f32 1.0, %v1835_v52  ;;  %v1822_v2 = vsel %vm1821_vm11, %v3072_v61, %v1818_v43  ;;  %2141 = vmatpush.msra.mxu0 %v7392_v42  ;;  %v1843_v61 = vand.u32 2147483647, %v1833_v24  ;;  %v2342_v43 = vld [vmem:[%s6692_s8 + $0x80] sm:$0xff]  ;;  %v2332_v42 = vld [vmem:[%s6692_s8 + $0x30] sm:$0xff] }
 0x480   :  { %v1827_v0 = vsel %vm1824_vm12, %v1826_v26, %v1822_v2  ;;  %2229 = vmatpush.msrb.mxu2 %v7395_v4  ;;  %2209 = vmatpush.msra.mxu1 %v7396_v34  ;;  %v2338_v26 = vld [vmem:[%s6692_s8 + $0x60] sm:$0xff] }
 0x481   :  { %v1837_v17 = vmul.f32 %v3074_v60, %v1836_v27  ;;  %v1850_v59 = vmul.f32 %v1849_v57, %v1827_v0  ;;  %2142 = vmatpush.msra.mxu0 %v7397_v30  ;;  %vm1844_vm0 = vcmp.eq.f32.partialorder %v1843_v61, 8.507059e+37  ;;  %v2334_v57 = vld [vmem:[%s6692_s8 + $0x40] sm:$0xff] }
 0x482   :  { %2230 = vmatpush.msrb.mxu2 %v7398_v23  ;;  %2210 = vmatpush.msra.mxu1 %v7399_v41 }
 0x483   :  { %v1838_v29 = vadd.f32 %v3074_v60, %v1837_v17  ;;  %v1851_v35 = vadd.f32 %v1850_v59, %v447_v55  ;;  %2143 = vmatpush.msra.mxu0 %v7400_v63  ;;  %v2328_v55 = vld [vmem:[%s6692_s8 + $0x10] sm:$0xff]  ;;  %v2326_v17 = vld [vmem:[%s6692_s8] sm:$0xff] }
 0x484   :  { %2231 = vmatpush.msrb.mxu2 %v7401_v11  ;;  %2211 = vmatpush.msra.mxu1 %v7402_v46 }
 0x485   :  { %v1842_v32 = vsel %vm1841_vm15, %v3074_v60, %v1838_v29  ;;  %3075 = vtanh.f32 %v1851_v35  ;;  %2144 = vmatpush.msra.mxu0 %v7403_v8  ;;  %v2344_v60 = vld [vmem:[%s6692_s8 + $0x90] sm:$0xff] }
 0x486   :  { %2232 = vmatpush.msrb.mxu2 %v7404_v58  ;;  %2212 = vmatpush.msra.mxu1 %v7405_v56  ;;  %v1847_v6 = vsel %vm1844_vm0, %v1846_v45, %v1842_v32  ;;  %v6276_v45 = vld [vmem:[%s6690_s5] sm:$0xff] }
 0x487   :  { %v1853_v24 = vsub.f32 1.0, %v1847_v6  ;;  %v1855_v22 = vmul.f32 %v1847_v6, %v5999_v16 }
 0x48b   :  { %v3076_v10 = vpop.eup %3075 }
 0x48c   :  { %v1854_v20 = vmul.f32 %v3076_v10, %v1853_v24  ;;  %v7408_v10 = vld [vmem:[#allocation58_spill] sm:$0xff] }
 0x48e   :  { %v6200_v52 = vadd.f32 %v1855_v22, %v1854_v20 }
 0x490   :  { %1989 = vmatmul.f32.vlgmr.msrb.gmra.mxu3 %v6200_v52  ;;  %2009 = vmatmul.f32.vlgmr.msrb.gmra.mxu0 %v6200_v52 }
 0x491   :  { %2029 = vmatmul.f32.vlgmr.msrb.gmra.mxu1 %v6200_v52  ;;  %2237 = vmatpush.msrb.mxu3 %v6007_v7  ;;  %v2356_v7 = vld [vmem:[%s6692_s8 + $0xf0] sm:$0xff] }
 0x492   :  { %2396 = vmatpush.msrb.mxu0 %v2356_v7 }
 0x493   :  { %2238 = vmatpush.msrb.mxu3 %v6015_v47  ;;  %v2354_v47 = vld [vmem:[%s6692_s8 + $0xe0] sm:$0xff] }
 0x494   :  { %2397 = vmatpush.msrb.mxu0 %v2354_v47 }
 0x495   :  { %2239 = vmatpush.msrb.mxu3 %v6023_v14  ;;  %v2352_v14 = vld [vmem:[%s6692_s8 + $0xd0] sm:$0xff] }
 0x496   :  { %2398 = vmatpush.msrb.mxu0 %v2352_v14 }
 0x497   :  { %2240 = vmatpush.msrb.mxu3 %v6031_v33  ;;  %v2350_v33 = vld [vmem:[%s6692_s8 + $0xc0] sm:$0xff] }
 0x498   :  { %2399 = vmatpush.msrb.mxu0 %v2350_v33 }
 0x499   :  { %2241 = vmatpush.msrb.mxu3 %v6039_v53  ;;  %v7406_v53 = vld [vmem:[#allocation56_spill] sm:$0xff] }
 0x49b   :  { %2242 = vmatpush.msrb.mxu3 %v6047_v40  ;;  %v254_v40 = vadd.f32 %v7406_v53, %v7270_v21  ;;  %v7409_v53 = vld [vmem:[#allocation67_spill] sm:$0xff] }
 0x49d   :  { %2243 = vmatpush.msrb.mxu3 %v6055_v28  ;;  %v7407_v28 = vld [vmem:[#allocation57_spill] sm:$0xff] }
 0x49f   :  { %2244 = vmatpush.msrb.mxu3 %v6063_v54  ;;  %v295_v54 = vadd.f32 %v7407_v28, %v7272_v36 }
 0x4a1   :  { %2245 = vmatpush.msrb.mxu3 %v6071_v12  ;;  %v2348_v12 = vld [vmem:[%s6692_s8 + $0xb0] sm:$0xff] }
 0x4a2   :  { %2400 = vmatpush.msrb.mxu0 %v2348_v12 }
 0x4a3   :  { %2246 = vmatpush.msrb.mxu3 %v6079_v18 }
 0x4a5   :  { %2247 = vmatpush.msrb.mxu3 %v6087_v48 }
 0x4a7   :  { %2248 = vmatpush.msrb.mxu3 %v6095_v15 }
 0x4a9   :  { %2249 = vmatpush.msrb.mxu3 %v6103_v5 }
 0x4ab   :  { %2250 = vmatpush.msrb.mxu3 %v6111_v13  ;;  %v2346_v13 = vld [vmem:[%s6692_s8 + $0xa0] sm:$0xff] }
 0x4ac   :  { %2401 = vmatpush.msrb.mxu0 %v2346_v13  ;;  %v2355_v13 = vld [vmem:[%s6692_s8 + $0xe8] sm:$0xff] }
 0x4ad   :  { %2251 = vmatpush.msrb.mxu3 %v6119_v62 }
 0x4ae   :  { %2402 = vmatpush.msrb.mxu0 %v2344_v60 }
 0x4af   :  { %2252 = vmatpush.msrb.mxu3 %v6127_v31 }
 0x4b0   :  { %2403 = vmatpush.msrb.mxu0 %v2342_v43  ;;  %v2353_v43 = vld [vmem:[%s6692_s8 + $0xd8] sm:$0xff] }
 0x4b2   :  { %2404 = vmatpush.msrb.mxu0 %v2340_v9 }
 0x4b4   :  { %2405 = vmatpush.msrb.mxu0 %v2338_v26  ;;  %v2351_v26 = vld [vmem:[%s6692_s8 + $0xc8] sm:$0xff] }
 0x4b6   :  { %2406 = vmatpush.msrb.mxu0 %v2336_v49  ;;  %v2349_v49 = vld [vmem:[%s6692_s8 + $0xb8] sm:$0xff] }
 0x4b8   :  { %2407 = vmatpush.msrb.mxu0 %v2334_v57  ;;  %v7411_v57 = vld [vmem:[#allocation29_spill] sm:$0xff] }
 0x4ba   :  { %2408 = vmatpush.msrb.mxu0 %v2332_v42  ;;  %v2345_v42 = vld [vmem:[%s6692_s8 + $0x98] sm:$0xff] }
 0x4bc   :  { %2409 = vmatpush.msrb.mxu0 %v2330_v25  ;;  %v2343_v25 = vld [vmem:[%s6692_s8 + $0x88] sm:$0xff] }
 0x4be   :  { %2410 = vmatpush.msrb.mxu0 %v2328_v55 }
 0x4c0   :  { %2411 = vmatpush.msrb.mxu0 %v2326_v17 }
 0x4e3   :  { %v1882_v18 = vpop.f32.mrf.mxu0  ;;  %v1902_v48 = vpop.f32.mrf.mxu1 }
 0x4e4   :  { %v1925_v15 = vadd.f32 %v1882_v18, %v254_v40  ;;  %v1945_v5 = vadd.f32 %v1902_v48, %v295_v54  ;;  %v403_v40 = vadd.f32 %v7409_v53, %v7311_v39 }
 0x4e6   :  { %v2942_v62 = vmul.f32 -1.442695, %v1925_v15  ;;  %v2943_v31 = vmul.f32 -1.442695, %v1945_v5  ;;  %v2357_v15 = vld [vmem:[%s6692_s8 + $0xf8] sm:$0xff] }
 0x4e8   :  { %3077 = vpow2.f32 %v2942_v62  ;;  %v7410_v62 = vld [vmem:[#allocation4_spill] sm:$0xff] }
 0x4e9   :  { %3079 = vpow2.f32 %v2943_v31  ;;  %v362_v31 = vadd.f32 %v7410_v62, %v7275_v50 }
 0x4ea   :  { %v1922_v35 = vpop.f32.mrf.mxu2 }
 0x4eb   :  { %v1965_v32 = vadd.f32 %v6276_v45, %v1922_v35 }
 0x4ee   :  { %v3078_v1 = vpop.eup %3077 }
 0x4ef   :  { %v3080_v27 = vpop.eup %3079  ;;  %v1929_v2 = vadd.f32 1.0, %v3078_v1 }
 0x4f0   :  { %v1949_v3 = vadd.f32 1.0, %v3080_v27 }
 0x4f1   :  { %3081 = vrcp.f32 %v1929_v2  ;;  %v1941_v61 = vand.u32 2147483648, %v1929_v2  ;;  %v1939_v41 = vand.u32 2147483647, %v1929_v2  ;;  %vm1935_vm2 = vweird.f32 %v1929_v2 }
 0x4f2   :  { %3083 = vrcp.f32 %v1949_v3  ;;  %v1961_v56 = vand.u32 2147483648, %v1949_v3  ;;  %vm1955_vm6 = vweird.f32 %v1949_v3  ;;  %v1959_v24 = vand.u32 2147483647, %v1949_v3 }
 0x4f3   :  { %v1942_v11 = vor.u32 1.1754944e-38, %v1941_v61  ;;  %vm1940_vm4 = vcmp.eq.f32.partialorder %v1939_v41, 8.507059e+37  ;;  %v2335_v61 = vld [vmem:[%s6692_s8 + $0x48] sm:$0xff]  ;;  %v2333_v41 = vld [vmem:[%s6692_s8 + $0x38] sm:$0xff] }
 0x4f4   :  { %v1962_v7 = vor.u32 1.1754944e-38, %v1961_v56  ;;  %vm1960_vm8 = vcmp.eq.f32.partialorder %v1959_v24, 8.507059e+37 }
 0x4f7   :  { %v3082_v0 = vpop.eup %3081 }
 0x4f8   :  { %v3084_v4 = vpop.eup %3083  ;;  %v1931_v34 = vmul.f32 %v3082_v0, %v1929_v2  ;;  %vm1936_vm1 = vweird.f32 %v3082_v0 }
 0x4f9   :  { %v1951_v44 = vmul.f32 %v3084_v4, %v1949_v3  ;;  %vm1937_vm3 = vmor %vm1935_vm2, %vm1936_vm1  ;;  %vm1956_vm5 = vweird.f32 %v3084_v4  ;;  %v2347_v3 = vld [vmem:[%s6692_s8 + $0xa8] sm:$0xff] }
 0x4fa   :  { %v1932_v59 = vsub.f32 1.0, %v1931_v34  ;;  %vm1957_vm7 = vmor %vm1955_vm6, %vm1956_vm5  ;;  %v2339_v34 = vld [vmem:[%s6692_s8 + $0x68] sm:$0xff] }
 0x4fb   :  { %v1952_v30 = vsub.f32 1.0, %v1951_v44  ;;  %v7412_v44 = vld [vmem:[#allocation49_spill] sm:$0xff] }
 0x4fc   :  { %v1933_v23 = vmul.f32 %v3082_v0, %v1932_v59  ;;  %v2337_v59 = vld [vmem:[%s6692_s8 + $0x58] sm:$0xff] }
 0x4fd   :  { %v1953_v29 = vmul.f32 %v3084_v4, %v1952_v30 }
 0x4fe   :  { %v1934_v63 = vadd.f32 %v3082_v0, %v1933_v23 }
 0x4ff   :  { %v1954_v8 = vadd.f32 %v3084_v4, %v1953_v29 }
 0x500   :  { %v1938_v46 = vsel %vm1937_vm3, %v3082_v0, %v1934_v63  ;;  %v2331_v63 = vld [vmem:[%s6692_s8 + $0x28] sm:$0xff] }
 0x501   :  { %v1943_v58 = vsel %vm1940_vm4, %v1942_v11, %v1938_v46  ;;  %v1958_v22 = vsel %vm1957_vm7, %v3084_v4, %v1954_v8  ;;  %v2341_v4 = vld [vmem:[%s6692_s8 + $0x78] sm:$0xff]  ;;  %v7413_v46 = vld [vmem:[#allocation5_spill] sm:$0xff] }
 0x502   :  { %v1966_v6 = vmul.f32 %v1965_v32, %v1943_v58  ;;  %v1963_v47 = vsel %vm1960_vm8, %v1962_v7, %v1958_v22  ;;  %v2329_v8 = vld [vmem:[%s6692_s8 + $0x18] sm:$0xff]  ;;  %v6348_v7 = vld [vmem:[%s6691_s7] sm:$0xff] }
 0x503   :  { %v1969_v14 = vsub.f32 1.0, %v1963_v47  ;;  %v1971_v54 = vmul.f32 %v1963_v47, %v6141_v51 }
 0x504   :  { %v1967_v20 = vadd.f32 %v1966_v6, %v7408_v10  ;;  %v2327_v10 = vld [vmem:[%s6692_s8 + $0x8] sm:$0xff] }
 0x506   :  { %3085 = vtanh.f32 %v1967_v20 }
 0x50c   :  { %v3086_v33 = vpop.eup %3085 }
 0x50d   :  { %v1970_v28 = vmul.f32 %v3086_v33, %v1969_v14  ;;  %v2010_v12 = vpop.f32.mrf.mxu0 }
 0x50e   :  { %v2053_v18 = vadd.f32 %v2010_v12, %v403_v40  ;;  %v2030_v24 = vpop.f32.mrf.mxu1  ;;  %v7414_v40 = vld [vmem:[#allocation68_spill] sm:$0xff] }
 0x50f   :  { %v6283_v48 = vadd.f32 %v1971_v54, %v1970_v28  ;;  %v2073_v47 = vadd.f32 %v6348_v7, %v2030_v24  ;;  %v444_v28 = vadd.f32 %v7414_v40, %v7393_v19  ;;  %v2384_v40 = vld [vmem:[%s6692_s8 + $0x1d0] sm:$0xff] }
 0x510   :  { %v2945_v5 = vmul.f32 -1.442695, %v2053_v18  ;;  %v7415_v18 = vld [vmem:[#allocation10_spill] sm:$0xff] }
 0x511   :  { %2105 = vmatmul.f32.vlgmr.msra.gmra.mxu2 %v6283_v48  ;;  %2125 = vmatmul.f32.vlgmr.msra.gmra.mxu3 %v6283_v48 }
 0x512   :  { %3087 = vpow2.f32 %v2945_v5  ;;  %2145 = vmatmul.f32.vlgmr.msra.gmra.mxu0 %v6283_v48  ;;  %2478 = vmatpush.msra.mxu2 %v2357_v15 }
 0x513   :  { %v1990_v60 = vpop.f32.mrf.mxu3 }
 0x514   :  { %v2033_v9 = vadd.f32 %v1990_v60, %v362_v31  ;;  %2479 = vmatpush.msra.mxu2 %v2355_v13 }
 0x516   :  { %v2944_v1 = vmul.f32 -1.442695, %v2033_v9  ;;  %2480 = vmatpush.msra.mxu2 %v2353_v43 }
 0x518   :  { %v3088_v27 = vpop.eup %3087  ;;  %3089 = vpow2.f32 %v2944_v1  ;;  %2481 = vmatpush.msra.mxu2 %v2351_v26 }
 0x519   :  { %v6305_v2 = vadd.f32 1.0, %v3088_v27 }
 0x51a   :  { %2412 = vmatmul.f32.vlgmr.msrb.gmra.mxu0 %v7411_v57  ;;  %2482 = vmatpush.msra.mxu2 %v2349_v49  ;;  %v7416_v49 = vld [vmem:[#allocation60_spill] sm:$0xff] }
 0x51b   :  { %3091 = vrcp.f32 %v6305_v2  ;;  %v2069_v54 = vand.u32 2147483648, %v6305_v2  ;;  %vm2063_vm14 = vweird.f32 %v6305_v2  ;;  %v2067_v15 = vand.u32 2147483647, %v6305_v2 }
 0x51c   :  { %2483 = vmatpush.msra.mxu2 %v2347_v3  ;;  %v257_v27 = vadd.f32 %v7416_v49, %v7270_v21  ;;  %v2379_v49 = vld [vmem:[%s6692_s8 + $0x1a8] sm:$0xff] }
 0x51d   :  { %v2070_v62 = vor.u32 1.1754944e-38, %v2069_v54  ;;  %vm2068_vm0 = vcmp.eq.f32.partialorder %v2067_v15, 8.507059e+37  ;;  %v2382_v15 = vld [vmem:[%s6692_s8 + $0x1c0] sm:$0xff] }
 0x51e   :  { %v3090_v55 = vpop.eup %3089  ;;  %2484 = vmatpush.msra.mxu2 %v2345_v42 }
 0x51f   :  { %v2037_v0 = vadd.f32 1.0, %v3090_v55 }
 0x520   :  { %2485 = vmatpush.msra.mxu2 %v2343_v25 }
 0x521   :  { %3093 = vrcp.f32 %v2037_v0  ;;  %v3092_v17 = vpop.eup %3091  ;;  %v2049_v32 = vand.u32 2147483648, %v2037_v0  ;;  %v2047_v56 = vand.u32 2147483647, %v2037_v0  ;;  %vm2043_vm10 = vweird.f32 %v2037_v0 }
 0x522   :  { %2415 = vmatmul.f32.gmra.mxu0 %v7412_v44  ;;  %2486 = vmatpush.msra.mxu2 %v2341_v4  ;;  %v2059_v30 = vmul.f32 %v3092_v17, %v6305_v2  ;;  %vm2064_vm13 = vweird.f32 %v3092_v17  ;;  %v7417_v2 = vld [vmem:[#allocation61_spill] sm:$0xff] }
 0x523   :  { %v2050_v22 = vor.u32 1.1754944e-38, %v2049_v32  ;;  %vm2048_vm12 = vcmp.eq.f32.partialorder %v2047_v56, 8.507059e+37  ;;  %vm2065_vm15 = vmor %vm2063_vm14, %vm2064_vm13  ;;  %v298_v3 = vadd.f32 %v7417_v2, %v7272_v36  ;;  %v2388_v56 = vld [vmem:[%s6692_s8 + $0x1f0] sm:$0xff] }
 0x524   :  { %2487 = vmatpush.msra.mxu2 %v2339_v34  ;;  %v2060_v35 = vsub.f32 1.0, %v2059_v30  ;;  %2437 = vmatpush.msrb.mxu1 %v2388_v56  ;;  %v2376_v2 = vld [vmem:[%s6692_s8 + $0x190] sm:$0xff]  ;;  %v2367_v56 = vld [vmem:[%s6692_s8 + $0x148] sm:$0xff] }
 0x526   :  { %2488 = vmatpush.msra.mxu2 %v2337_v59  ;;  %v2061_v6 = vmul.f32 %v3092_v17, %v2060_v35 }
 0x527   :  { %v3094_v23 = vpop.eup %3093 }
 0x528   :  { %v2039_v29 = vmul.f32 %v3094_v23, %v2037_v0  ;;  %2489 = vmatpush.msra.mxu2 %v2335_v61  ;;  %vm2044_vm9 = vweird.f32 %v3094_v23  ;;  %v2062_v33 = vadd.f32 %v3092_v17, %v2061_v6  ;;  %v2389_v6 = vld [vmem:[%s6692_s8 + $0x1f8] sm:$0xff] }
 0x529   :  { %vm2045_vm11 = vmor %vm2043_vm10, %vm2044_vm9  ;;  %2519 = vmatpush.msra.mxu3 %v2389_v6 }
 0x52a   :  { %v2040_v11 = vsub.f32 1.0, %v2039_v29  ;;  %2418 = vmatmul.f32.gmra.mxu0 %v7413_v46  ;;  %2490 = vmatpush.msra.mxu2 %v2333_v41  ;;  %v2066_v13 = vsel %vm2065_vm15, %v3092_v17, %v2062_v33 }
 0x52b   :  { %v2071_v31 = vsel %vm2068_vm0, %v2070_v62, %v2066_v13  ;;  %v7418_v13 = vld [vmem:[#allocation62_spill] sm:$0xff] }
 0x52c   :  { %v2041_v58 = vmul.f32 %v3094_v23, %v2040_v11  ;;  %2491 = vmatpush.msra.mxu2 %v2331_v63  ;;  %v2077_v60 = vsub.f32 1.0, %v2071_v31  ;;  %v2079_v9 = vmul.f32 %v2071_v31, %v6200_v52 }
 0x52e   :  { %v2042_v20 = vadd.f32 %v3094_v23, %v2041_v58  ;;  %2492 = vmatpush.msra.mxu2 %v2329_v8 }
 0x530   :  { %v2046_v14 = vsel %vm2045_vm11, %v3094_v23, %v2042_v20  ;;  %2493 = vmatpush.msra.mxu2 %v2327_v10  ;;  %v2386_v20 = vld [vmem:[%s6692_s8 + $0x1e0] sm:$0xff] }
 0x531   :  { %v2051_v53 = vsel %vm2048_vm12, %v2050_v22, %v2046_v14  ;;  %v2387_v22 = vld [vmem:[%s6692_s8 + $0x1e8] sm:$0xff]  ;;  %2438 = vmatpush.msrb.mxu1 %v2386_v20  ;;  %v2362_v20 = vld [vmem:[%s6692_s8 + $0x120] sm:$0xff] }
 0x532   :  { %v2074_v12 = vmul.f32 %v2073_v47, %v2051_v53  ;;  %2421 = vmatmul.f32.gmra.mxu0 %v7415_v18  ;;  %2520 = vmatpush.msra.mxu3 %v2387_v22  ;;  %v2363_v22 = vld [vmem:[%s6692_s8 + $0x128] sm:$0xff] }
 0x533   :  { %2439 = vmatpush.msrb.mxu1 %v2384_v40  ;;  %v2358_v40 = vld [vmem:[%s6692_s8 + $0x100] sm:$0xff] }
 0x534   :  { %v2075_v5 = vadd.f32 %v2074_v12, %v444_v28  ;;  %v2385_v28 = vld [vmem:[%s6692_s8 + $0x1d8] sm:$0xff] }
 0x535   :  { %2521 = vmatpush.msra.mxu3 %v2385_v28  ;;  %2440 = vmatpush.msrb.mxu1 %v2382_v15  ;;  %v2359_v28 = vld [vmem:[%s6692_s8 + $0x108] sm:$0xff] }
 0x536   :  { %3095 = vtanh.f32 %v2075_v5  ;;  %v2383_v5 = vld [vmem:[%s6692_s8 + $0x1c8] sm:$0xff] }
 0x537   :  { %2522 = vmatpush.msra.mxu3 %v2383_v5 }
 0x53a   :  { %2424 = vmatmul.f32.gmra.mxu0 %v5679_v38 }
 0x53c   :  { %v3096_v43 = vpop.eup %3095 }
 0x53d   :  { %v2078_v26 = vmul.f32 %v3096_v43, %v2077_v60  ;;  %v2380_v60 = vld [vmem:[%s6692_s8 + $0x1b0] sm:$0xff]  ;;  %v2381_v43 = vld [vmem:[%s6692_s8 + $0x1b8] sm:$0xff] }
 0x53e   :  { %2441 = vmatpush.msrb.mxu1 %v2380_v60  ;;  %2523 = vmatpush.msra.mxu3 %v2381_v43 }
 0x53f   :  { %v6359_v1 = vadd.f32 %v2079_v9, %v2078_v26  ;;  %v2378_v26 = vld [vmem:[%s6692_s8 + $0x1a0] sm:$0xff] }
 0x540   :  { %2442 = vmatpush.msrb.mxu1 %v2378_v26  ;;  %2524 = vmatpush.msra.mxu3 %v2379_v49 }
 0x541   :  { %2213 = vmatmul.f32.vlgmr.msra.gmra.mxu1 %v6359_v1  ;;  %2233 = vmatmul.f32.vlgmr.msrb.gmra.mxu2 %v6359_v1 }
 0x542   :  { %2427 = vmatmul.f32.gmra.mxu0 %v6141_v51  ;;  %2253 = vmatmul.f32.vlgmr.msrb.gmra.mxu3 %v6359_v1 }
 0x543   :  { %2443 = vmatpush.msrb.mxu1 %v2376_v2 }
 0x549   :  { %2494 = vmatmul.f32.vlgmr.msra.gmra.mxu2 %v7411_v57 }
 0x54a   :  { %2430 = vmatmul.f32.gmra.mxu0 %v6283_v48 }
 0x551   :  { %2497 = vmatmul.f32.gmra.mxu2 %v7412_v44 }
 0x559   :  { %2500 = vmatmul.f32.gmra.mxu2 %v7413_v46 }
 0x561   :  { %2503 = vmatmul.f32.gmra.mxu2 %v7415_v18 }
 0x569   :  { %2506 = vmatmul.f32.gmra.mxu2 %v5679_v38 }
 0x571   :  { %2509 = vmatmul.f32.gmra.mxu2 %v6141_v51 }
 0x579   :  { %2512 = vmatmul.f32.gmra.mxu2 %v6283_v48 }
 0x58f   :  { %v2146_v8 = vpop.f32.mrf.mxu0 }
 0x590   :  { %v2189_v47 = vadd.f32 %v6276_v45, %v2146_v8 }
 0x594   :  { %v2106_v42 = vpop.f32.mrf.mxu2  ;;  %v2126_v25 = vpop.f32.mrf.mxu3 }
 0x595   :  { %v2149_v55 = vadd.f32 %v2106_v42, %v257_v27  ;;  %v2169_v0 = vadd.f32 %v2126_v25, %v298_v3  ;;  %v2377_v3 = vld [vmem:[%s6692_s8 + $0x198] sm:$0xff]  ;;  %v2374_v25 = vld [vmem:[%s6692_s8 + $0x180] sm:$0xff] }
 0x596   :  { %2525 = vmatpush.msra.mxu3 %v2377_v3  ;;  %2444 = vmatpush.msrb.mxu1 %v2374_v25 }
 0x597   :  { %v2946_v4 = vmul.f32 -1.442695, %v2149_v55  ;;  %v2947_v34 = vmul.f32 -1.442695, %v2169_v0  ;;  %v2375_v55 = vld [vmem:[%s6692_s8 + $0x188] sm:$0xff] }
 0x598   :  { %2526 = vmatpush.msra.mxu3 %v2375_v55 }
 0x599   :  { %3097 = vpow2.f32 %v2946_v4  ;;  %v7419_v4 = vld [vmem:[#allocation6_spill] sm:$0xff] }
 0x59a   :  { %3099 = vpow2.f32 %v2947_v34  ;;  %v359_v34 = vadd.f32 %v7419_v4, %v7275_v50  ;;  %v2370_v50 = vld [vmem:[%s6692_s8 + $0x160] sm:$0xff] }
 0x59f   :  { %v3098_v17 = vpop.eup %3097 }
 0x5a0   :  { %v3100_v59 = vpop.eup %3099  ;;  %v2153_v30 = vadd.f32 1.0, %v3098_v17 }
 0x5a1   :  { %v2173_v61 = vadd.f32 1.0, %v3100_v59 }
 0x5a2   :  { %3101 = vrcp.f32 %v2153_v30  ;;  %v2165_v36 = vand.u32 2147483648, %v2153_v30  ;;  %v2163_v32 = vand.u32 2147483647, %v2153_v30  ;;  %vm2159_vm2 = vweird.f32 %v2153_v30 }
 0x5a3   :  { %3103 = vrcp.f32 %v2173_v61  ;;  %v2185_v54 = vand.u32 2147483648, %v2173_v61  ;;  %vm2179_vm6 = vweird.f32 %v2173_v61  ;;  %v2183_v45 = vand.u32 2147483647, %v2173_v61 }
 0x5a4   :  { %v2166_v10 = vor.u32 1.1754944e-38, %v2165_v36  ;;  %vm2164_vm4 = vcmp.eq.f32.partialorder %v2163_v32, 8.507059e+37  ;;  %v2368_v36 = vld [vmem:[%s6692_s8 + $0x150] sm:$0xff] }
 0x5a5   :  { %v2186_v9 = vor.u32 1.1754944e-38, %v2185_v54  ;;  %vm2184_vm8 = vcmp.eq.f32.partialorder %v2183_v45, 8.507059e+37 }
 0x5a8   :  { %v3102_v23 = vpop.eup %3101 }
 0x5a9   :  { %v3104_v41 = vpop.eup %3103  ;;  %v2155_v21 = vmul.f32 %v3102_v23, %v2153_v30  ;;  %vm2160_vm1 = vweird.f32 %v3102_v23 }
 0x5aa   :  { %v2175_v29 = vmul.f32 %v3104_v41, %v2173_v61  ;;  %vm2161_vm3 = vmor %vm2159_vm2, %vm2160_vm1  ;;  %vm2180_vm5 = vweird.f32 %v3104_v41  ;;  %v2372_v61 = vld [vmem:[%s6692_s8 + $0x170] sm:$0xff]  ;;  %vm2653_vm2 = vcmask 1041409  }
 0x5ab   :  { %v2156_v35 = vsub.f32 1.0, %v2155_v21  ;;  %vm2181_vm7 = vmor %vm2179_vm6, %vm2180_vm5  ;;  %2445 = vmatpush.msrb.mxu1 %v2372_v61  ;;  %vm2659_vm5 = vcmask 1044484   ;;  %vm2661_vm6 = vcmask 1045509  }
 0x5ac   :  { %v2176_v63 = vsub.f32 1.0, %v2175_v29  ;;  %v2371_v29 = vld [vmem:[%s6692_s8 + $0x168] sm:$0xff] }
 0x5ad   :  { %v2157_v11 = vmul.f32 %v3102_v23, %v2156_v35  ;;  %2446 = vmatpush.msrb.mxu1 %v2370_v50 }
 0x5ae   :  { %v2177_v58 = vmul.f32 %v3104_v41, %v2176_v63  ;;  %v2369_v63 = vld [vmem:[%s6692_s8 + $0x158] sm:$0xff] }
 0x5af   :  { %v2158_v24 = vadd.f32 %v3102_v23, %v2157_v11  ;;  %v7420_v11 = vld [vmem:[#allocation63_spill] sm:$0xff]  ;;  %2447 = vmatpush.msrb.mxu1 %v2368_v36  ;;  %v7422_v36 = vld [vmem:[#allocation9_spill] sm:$0xff] }
 0x5b0   :  { %v2178_v53 = vadd.f32 %v3104_v41, %v2177_v58  ;;  %v400_v32 = vadd.f32 %v7420_v11, %v7311_v39  ;;  %v2366_v58 = vld [vmem:[%s6692_s8 + $0x140] sm:$0xff]  ;;  %v2365_v39 = vld [vmem:[%s6692_s8 + $0x138] sm:$0xff] }
 0x5b1   :  { %v2162_v14 = vsel %vm2161_vm3, %v3102_v23, %v2158_v24  ;;  %v2373_v23 = vld [vmem:[%s6692_s8 + $0x178] sm:$0xff]  ;;  %2448 = vmatpush.msrb.mxu1 %v2366_v58  ;;  %v2364_v24 = vld [vmem:[%s6692_s8 + $0x130] sm:$0xff]  ;;  %v2390_v58 = vld [vmem:[%s6694_s9] sm:$0x3]  ;;  %vm2655_vm3 = vcmask 1042434  }
 0x5b2   :  { %v2167_v33 = vsel %vm2164_vm4, %v2166_v10, %v2162_v14  ;;  %v2182_v31 = vsel %vm2181_vm7, %v3104_v41, %v2178_v53  ;;  %2527 = vmatpush.msra.mxu3 %v2373_v23  ;;  %v7424_v11 = vld [vmem:[#allocation11_spill] sm:$0xff]  ;;  %vm2657_vm4 = vcmask 1043459   ;;  %vm2663_vm7 = vcmask 1046534  }
 0x5b3   :  { %v2190_v12 = vmul.f32 %v2189_v47, %v2167_v33  ;;  %v2187_v27 = vsel %vm2184_vm8, %v2186_v9, %v2182_v31  ;;  %2449 = vmatpush.msrb.mxu1 %v2364_v24  ;;  %v2360_v47 = vld [vmem:[%s6692_s8 + $0x110] sm:$0xff]  ;;  %v2361_v33 = vld [vmem:[%s6692_s8 + $0x118] sm:$0xff]  ;;  %vm2665_vm8 = vcmask 1047559  }
 0x5b4   :  { %v2193_v42 = vsub.f32 1.0, %v2187_v27  ;;  %v2195_v30 = vmul.f32 %v2187_v27, %v6283_v48  ;;  %2528 = vmatpush.msra.mxu3 %v2371_v29 }
 0x5b5   :  { %v2191_v62 = vadd.f32 %v2190_v12, %v7418_v13  ;;  %2450 = vmatpush.msrb.mxu1 %v2362_v20  ;;  %v6520_v20 = vperm.slane %v2390_v58, 1 }
 0x5b6   :  { %2529 = vmatpush.msra.mxu3 %v2369_v63  ;;  %v7423_v63 = vld [vmem:[#allocation105_spill] sm:$0xff] }
 0x5b7   :  { %3105 = vtanh.f32 %v2191_v62  ;;  %2451 = vmatpush.msrb.mxu1 %v2360_v47 }
 0x5b8   :  { %2530 = vmatpush.msra.mxu3 %v2367_v56 }
 0x5b9   :  { %2452 = vmatpush.msrb.mxu1 %v2358_v40 }
 0x5ba   :  { %2531 = vmatpush.msra.mxu3 %v2365_v39 }
 0x5bc   :  { %2532 = vmatpush.msra.mxu3 %v2363_v22 }
 0x5bd   :  { %v3106_v0 = vpop.eup %3105 }
 0x5be   :  { %v2214_v17 = vpop.f32.mrf.mxu1  ;;  %v2194_v59 = vmul.f32 %v3106_v0, %v2193_v42  ;;  %2533 = vmatpush.msra.mxu3 %v2361_v33  ;;  %v7421_v42 = vld [vmem:[#allocation64_spill] sm:$0xff] }
 0x5bf   :  { %v2257_v41 = vadd.f32 %v2214_v17, %v359_v34  ;;  %v441_v25 = vadd.f32 %v7421_v42, %v7393_v19 }
 0x5c0   :  { %v6436_v21 = vadd.f32 %v2195_v30, %v2194_v59  ;;  %2534 = vmatpush.msra.mxu3 %v2359_v28 }
 0x5c1   :  { %v2948_v35 = vmul.f32 -1.442695, %v2257_v41 }
 0x5c2   :  { %2307 = vst [vmem:[%s6693_s15] sm:$0xff] %v6436_v21  ;;  %2433 = vmatmul.f32.gmra.mxu0 %v6436_v21  ;;  %2515 = vmatmul.f32.gmra.mxu2 %v6436_v21 }
 0x5c3   :  { %3107 = vpow2.f32 %v2948_v35 }
 0x5c4   :  { %v2234_v8 = vpop.f32.mrf.mxu2 }
 0x5c5   :  { %v2277_v6 = vadd.f32 %v2234_v8, %v400_v32  ;;  %v2254_v43 = vpop.f32.mrf.mxu3  ;;  %v2413_v32 = vpop.f32.mrf.mxu0 }
 0x5c6   :  { %v2297_v3 = vadd.f32 %v6348_v7, %v2254_v43 }
 0x5c7   :  { %v2949_v10 = vmul.f32 -1.442695, %v2277_v6  ;;  %v6517_v6 = vperm.slane %v2390_v58, 0 }
 0x5c9   :  { %v3108_v14 = vpop.eup %3107  ;;  %3109 = vpow2.f32 %v2949_v10  ;;  %v2414_v10 = vadd.f32 %v2413_v32, %v6517_v6 }
 0x5ca   :  { %v2261_v53 = vadd.f32 1.0, %v3108_v14 }
 0x5cc   :  { %3111 = vrcp.f32 %v2261_v53  ;;  %v2273_v13 = vand.u32 2147483648, %v2261_v53  ;;  %v2271_v31 = vand.u32 2147483647, %v2261_v53  ;;  %vm2267_vm10 = vweird.f32 %v2261_v53  ;;  %v2495_v8 = vpop.f32.mrf.mxu2 }
 0x5cd   :  { %v2416_v56 = vpop.f32.mrf.mxu0  ;;  %v2496_v47 = vadd.f32 %v2495_v8, %v6520_v20 }
 0x5ce   :  { %v2274_v49 = vor.u32 1.1754944e-38, %v2273_v13  ;;  %vm2272_vm12 = vcmp.eq.f32.partialorder %v2271_v31, 8.507059e+37  ;;  %v2417_v28 = vadd.f32 %v2416_v56, %v6517_v6 }
 0x5cf   :  { %v3110_v54 = vpop.eup %3109 }
 0x5d0   :  { %v2281_v12 = vadd.f32 1.0, %v3110_v54  ;;  %v2576_v54 = vld [vmem:[%s6695_s10] sm:$0x3] }
 0x5d2   :  { %v3112_v45 = vpop.eup %3111  ;;  %3113 = vrcp.f32 %v2281_v12  ;;  %v2293_v4 = vand.u32 2147483648, %v2281_v12  ;;  %v2291_v17 = vand.u32 2147483647, %v2281_v12  ;;  %vm2287_vm14 = vweird.f32 %v2281_v12 }
 0x5d3   :  { %v2263_v15 = vmul.f32 %v3112_v45, %v2261_v53  ;;  %vm2268_vm9 = vweird.f32 %v3112_v45 }
 0x5d4   :  { %vm2269_vm11 = vmor %vm2267_vm10, %vm2268_vm9  ;;  %v2294_v61 = vor.u32 1.1754944e-38, %v2293_v4  ;;  %vm2292_vm0 = vcmp.eq.f32.partialorder %v2291_v17, 8.507059e+37  ;;  %v2498_v24 = vpop.f32.mrf.mxu2  ;;  %vm2669_vm10 = vcmask 64512  }
 0x5d5   :  { %v2264_v5 = vsub.f32 1.0, %v2263_v15  ;;  %v2419_v14 = vpop.f32.mrf.mxu0  ;;  %v6527_v15 = vperm.slane %v2576_v54, 0 }
 0x5d7   :  { %v2265_v62 = vmul.f32 %v3112_v45, %v2264_v5  ;;  %v6529_v5 = vperm.slane %v2576_v54, 1 }
 0x5d8   :  { %v3114_v60 = vpop.eup %3113 }
 0x5d9   :  { %v2283_v9 = vmul.f32 %v3114_v60, %v2281_v12  ;;  %v2266_v26 = vadd.f32 %v3112_v45, %v2265_v62  ;;  %vm2288_vm13 = vweird.f32 %v3114_v60  ;;  %v2499_v62 = vadd.f32 %v2498_v24, %v6520_v20 }
 0x5da   :  { %vm2289_vm15 = vmor %vm2287_vm14, %vm2288_vm13 }
 0x5db   :  { %v2284_v27 = vsub.f32 1.0, %v2283_v9  ;;  %v2270_v2 = vsel %vm2269_vm11, %v3112_v45, %v2266_v26 }
 0x5dc   :  { %v2275_v55 = vsel %vm2272_vm12, %v2274_v49, %v2270_v2  ;;  %v2501_v12 = vpop.f32.mrf.mxu2  ;;  %v2420_v2 = vadd.f32 %v2419_v14, %v6517_v6 }
 0x5dd   :  { %v2285_v0 = vmul.f32 %v3114_v60, %v2284_v27  ;;  %v2298_v34 = vmul.f32 %v2297_v3, %v2275_v55  ;;  %v2422_v9 = vpop.f32.mrf.mxu0 }
 0x5df   :  { %v2286_v59 = vadd.f32 %v3114_v60, %v2285_v0  ;;  %v2299_v30 = vadd.f32 %v2298_v34, %v441_v25  ;;  %v2502_v0 = vadd.f32 %v2501_v12, %v6520_v20 }
 0x5e1   :  { %v2290_v23 = vsel %vm2289_vm15, %v3114_v60, %v2286_v59  ;;  %3115 = vtanh.f32 %v2299_v30 }
 0x5e2   :  { %v2295_v41 = vsel %vm2292_vm0, %v2294_v61, %v2290_v23  ;;  %v2423_v23 = vadd.f32 %v2422_v9, %v6517_v6 }
 0x5e3   :  { %v2301_v50 = vsub.f32 1.0, %v2295_v41  ;;  %v2303_v19 = vmul.f32 %v2295_v41, %v6359_v1 }
 0x5e4   :  { %v2504_v25 = vpop.f32.mrf.mxu2 }
 0x5e5   :  { %v2425_v41 = vpop.f32.mrf.mxu0 }
 0x5e7   :  { %v3116_v7 = vpop.eup %3115 }
 0x5e8   :  { %v2302_v29 = vmul.f32 %v3116_v7, %v2301_v50 }
 0x5ea   :  { %v6492_v35 = vadd.f32 %v2303_v19, %v2302_v29  ;;  %v2505_v19 = vadd.f32 %v2504_v25, %v6520_v20 }
 0x5ec   :  { %2950 = vst [vmem:[%s6693_s15 + $0x8] sm:$0xff] %v6492_v35  ;;  %2453 = vmatmul.f32.vlgmr.msrb.gmra.mxu1 %v6492_v35  ;;  %2535 = vmatmul.f32.vlgmr.msra.gmra.mxu3 %v6492_v35  ;;  %v2507_v32 = vpop.f32.mrf.mxu2 }
 0x5f4   :  { %2456 = vmatmul.f32.gmra.mxu1 %v6359_v1  ;;  %2538 = vmatmul.f32.gmra.mxu3 %v6359_v1 }
 0x5fc   :  { %2459 = vmatmul.f32.gmra.mxu1 %v6200_v52  ;;  %2541 = vmatmul.f32.gmra.mxu3 %v6200_v52 }
 0x604   :  { %2462 = vmatmul.f32.gmra.mxu1 %v5999_v16  ;;  %2544 = vmatmul.f32.gmra.mxu3 %v5999_v16 }
 0x60c   :  { %2465 = vmatmul.f32.gmra.mxu1 %v5456_v37  ;;  %2547 = vmatmul.f32.gmra.mxu3 %v5456_v37 }
 0x614   :  { %2468 = vmatmul.f32.gmra.mxu1 %v7422_v36  ;;  %2550 = vmatmul.f32.gmra.mxu3 %v7422_v36 }
 0x61c   :  { %2471 = vmatmul.f32.gmra.mxu1 %v7423_v63  ;;  %2553 = vmatmul.f32.gmra.mxu3 %v7423_v63 }
 0x624   :  { %2474 = vmatmul.f32.gmra.mxu1 %v7424_v11  ;;  %2556 = vmatmul.f32.gmra.mxu3 %v7424_v11 }
 0x669   :  { %v2454_v39 = vpop.f32.mrf.mxu1 }
 0x66a   :  { %v2455_v22 = vadd.f32 %v2454_v39, %v2414_v10 }
 0x66c   :  { %3117 = vtanh.f32 %v2455_v22  ;;  %v2426_v22 = vadd.f32 %v2425_v41, %v6517_v6 }
 0x66f   :  { %v2536_v33 = vpop.f32.mrf.mxu3 }
 0x670   :  { %v2537_v53 = vadd.f32 %v2536_v33, %v2496_v47  ;;  %v2428_v33 = vpop.f32.mrf.mxu0 }
 0x671   :  { %v2457_v40 = vpop.f32.mrf.mxu1 }
 0x672   :  { %3119 = vtanh.f32 %v2537_v53  ;;  %v2458_v45 = vadd.f32 %v2457_v40, %v2417_v28  ;;  %v3118_v13 = vpop.eup %3117  ;;  %v2508_v40 = vadd.f32 %v2507_v32, %v6520_v20 }
 0x673   :  { %v2582_v49 = vmul.f32 %v3118_v13, %v6527_v15 }
 0x674   :  { %3121 = vtanh.f32 %v2458_v45  ;;  %v2510_v45 = vpop.f32.mrf.mxu2 }
 0x677   :  { %v2539_v31 = vpop.f32.mrf.mxu3 }
 0x678   :  { %v3120_v60 = vpop.eup %3119  ;;  %v2540_v43 = vadd.f32 %v2539_v31, %v2499_v62 }
 0x679   :  { %v2460_v26 = vpop.f32.mrf.mxu1  ;;  %v2583_v27 = vmul.f32 %v3120_v60, %v6529_v5  ;;  %v2429_v60 = vadd.f32 %v2428_v33, %v6517_v6 }
 0x67a   :  { %3123 = vtanh.f32 %v2540_v43  ;;  %v2461_v42 = vadd.f32 %v2460_v26, %v2420_v2  ;;  %v3122_v55 = vpop.eup %3121 }
 0x67b   :  { %v2598_v3 = vadd.f32 %v2583_v27, %v2582_v49  ;;  %v2584_v30 = vmul.f32 %v3122_v55, %v6527_v15  ;;  %v2511_v49 = vadd.f32 %v2510_v45, %v6520_v20  ;;  %v2431_v27 = vpop.f32.mrf.mxu0 }
 0x67c   :  { %3125 = vtanh.f32 %v2461_v42 }
 0x67d   :  { %2599 = vadd.xlane.f32.xlu0 %v2598_v3 }
 0x67f   :  { %v2542_v4 = vpop.f32.mrf.mxu3 }
 0x680   :  { %v3124_v34 = vpop.eup %3123  ;;  %v2543_v17 = vadd.f32 %v2542_v4, %v2502_v0  ;;  %v2432_v4 = vadd.f32 %v2431_v27, %v6517_v6 }
 0x681   :  { %v2463_v59 = vpop.f32.mrf.mxu1  ;;  %v2585_v61 = vmul.f32 %v3124_v34, %v6529_v5  ;;  %v2513_v34 = vpop.f32.mrf.mxu2 }
 0x682   :  { %3127 = vtanh.f32 %v2543_v17  ;;  %v2464_v7 = vadd.f32 %v2463_v59, %v2423_v23  ;;  %v3126_v29 = vpop.eup %3125 }
 0x683   :  { %v2601_v50 = vadd.f32 %v2585_v61, %v2584_v30  ;;  %v2586_v39 = vmul.f32 %v3126_v29, %v6527_v15  ;;  %v2514_v61 = vadd.f32 %v2513_v34, %v6520_v20  ;;  %v2434_v23 = vpop.f32.mrf.mxu0  ;;  %v3365_v34 = vmov 0  }
 0x684   :  { %3129 = vtanh.f32 %v2464_v7 }
 0x685   :  { %2602 = vadd.xlane.f32.xlu0 %v2601_v50 }
 0x687   :  { %v2545_v8 = vpop.f32.mrf.mxu3 }
 0x688   :  { %v3128_v58 = vpop.eup %3127  ;;  %v2546_v56 = vadd.f32 %v2545_v8, %v2505_v19  ;;  %v2435_v8 = vadd.f32 %v2434_v23, %v6517_v6 }
 0x689   :  { %v2466_v24 = vpop.f32.mrf.mxu1  ;;  %v2587_v10 = vmul.f32 %v3128_v58, %v6529_v5  ;;  %v2516_v58 = vpop.f32.mrf.mxu2 }
 0x68a   :  { %3131 = vtanh.f32 %v2546_v56  ;;  %v2467_v14 = vadd.f32 %v2466_v24, %v2426_v22  ;;  %v3130_v53 = vpop.eup %3129 }
 0x68b   :  { %v2604_v47 = vadd.f32 %v2587_v10, %v2586_v39  ;;  %v2588_v62 = vmul.f32 %v3130_v53, %v6527_v15  ;;  %v2517_v10 = vadd.f32 %v2516_v58, %v6520_v20 }
 0x68c   :  { %3133 = vtanh.f32 %v2467_v14 }
 0x68d   :  { %2605 = vadd.xlane.f32.xlu1 %v2604_v47 }
 0x68f   :  { %v2548_v28 = vpop.f32.mrf.mxu3 }
 0x690   :  { %v3132_v54 = vpop.eup %3131  ;;  %v2549_v12 = vadd.f32 %v2548_v28, %v2508_v40 }
 0x691   :  { %v2469_v13 = vpop.f32.mrf.mxu1  ;;  %v2589_v31 = vmul.f32 %v3132_v54, %v6529_v5 }
 0x692   :  { %3135 = vtanh.f32 %v2549_v12  ;;  %v2470_v9 = vadd.f32 %v2469_v13, %v2429_v60  ;;  %v3134_v26 = vpop.eup %3133 }
 0x693   :  { %v2607_v43 = vadd.f32 %v2589_v31, %v2588_v62  ;;  %v2590_v55 = vmul.f32 %v3134_v26, %v6527_v15  ;;  %v2643_v26 = vlaneseq }
 0x694   :  { %3137 = vtanh.f32 %v2470_v9 }
 0x695   :  { %2608 = vadd.xlane.f32.xlu1 %v2607_v43 }
 0x697   :  { %v2551_v2 = vpop.f32.mrf.mxu3 }
 0x698   :  { %v3136_v3 = vpop.eup %3135  ;;  %v2552_v42 = vadd.f32 %v2551_v2, %v2511_v49  ;;  %v2644_v2 = vand.u32 127, %v2643_v26 }
 0x699   :  { %v2472_v25 = vpop.f32.mrf.mxu1  ;;  %v2591_v0 = vmul.f32 %v3136_v3, %v6529_v5 }
 0x69a   :  { %3139 = vtanh.f32 %v2552_v42  ;;  %v2473_v59 = vadd.f32 %v2472_v25, %v2432_v4  ;;  %v3138_v30 = vpop.eup %3137 }
 0x69b   :  { %v2610_v17 = vadd.f32 %v2591_v0, %v2590_v55  ;;  %v2592_v19 = vmul.f32 %v3138_v30, %v6527_v15 }
 0x69c   :  { %3141 = vtanh.f32 %v2473_v59 }
 0x69d   :  { %2611 = vadd.xlane.f32.xlu2 %v2610_v17 }
 0x69f   :  { %v2554_v41 = vpop.f32.mrf.mxu3 }
 0x6a0   :  { %v3140_v50 = vpop.eup %3139  ;;  %v2555_v7 = vadd.f32 %v2554_v41, %v2514_v61 }
 0x6a1   :  { %v2475_v29 = vpop.f32.mrf.mxu1  ;;  %v2593_v32 = vmul.f32 %v3140_v50, %v6529_v5 }
 0x6a2   :  { %3143 = vtanh.f32 %v2555_v7  ;;  %v2476_v24 = vadd.f32 %v2475_v29, %v2435_v8  ;;  %v3142_v39 = vpop.eup %3141 }
 0x6a3   :  { %v2613_v56 = vadd.f32 %v2593_v32, %v2592_v19  ;;  %v2594_v33 = vmul.f32 %v3142_v39, %v6527_v15 }
 0x6a4   :  { %3145 = vtanh.f32 %v2476_v24 }
 0x6a5   :  { %2614 = vadd.xlane.f32.xlu2 %v2613_v56 }
 0x6a7   :  { %v2557_v22 = vpop.f32.mrf.mxu3 }
 0x6a8   :  { %v3144_v47 = vpop.eup %3143  ;;  %v2558_v14 = vadd.f32 %v2557_v22, %v2517_v10 }
 0x6a9   :  { %v2595_v53 = vmul.f32 %v3144_v47, %v6529_v5 }
 0x6aa   :  { %3147 = vtanh.f32 %v2558_v14  ;;  %v3146_v6 = vpop.eup %3145 }
 0x6ab   :  { %v2616_v40 = vadd.f32 %v2595_v53, %v2594_v33  ;;  %v2596_v54 = vmul.f32 %v3146_v6, %v6527_v15  ;;  %v2630_v15 = vld [vmem:[%s6696_s13] sm:$0x1] }
 0x6ac   :  { %vm2631_vm1 = vcmp.gt.f32.partialorder %v2630_v15, 0.0  ;;  %v2799_v15 = vld [vmem:[%s6697_s11 + $0x78] sm:$0xff] }
 0x6ad   :  { %2617 = vadd.xlane.f32.xlu0 %v2616_v40  ;;  %v2632_v17 = vsel %vm2631_vm1, 1, %v3365_v34  ;;  %v2955_v40 = vld [vmem:[%s6696_s13] ss:$0 sm:$0xff]  ;;  %2820 = vmatpush.msra.mxu0 %v2799_v15 }
 0x6ae   :  { %v2633_v7 = vperm.slane %v2632_v17, 0 }
 0x6b0   :  { %v3148_v28 = vpop.eup %3147  ;;  %vm2634_vm9 = vcmp.eq.s32.totalorder %v2633_v7, 1 }
 0x6b1   :  { %v2597_v12 = vmul.f32 %v3148_v28, %v6529_v5 }
 0x6b3   :  { %v2619_v45 = vadd.f32 %v2597_v12, %v2596_v54  ;;  %v2700_v12 = vshrl.u32 %v2643_v26, 7  ;;  %v2815_v26 = vld [vmem:[%s6697_s11 + $0xf8] sm:$0xff] }
 0x6b4   :  { %2840 = vmatpush.msra.mxu1 %v2815_v26 }
 0x6b5   :  { %2620 = vadd.xlane.f32.xlu1 %v2619_v45  ;;  %2954 = vset.pattern.permute.xlu0 %v2700_v12 }
 0x6b6   :  { %2953 = vset.pattern.permute.xlu2 %v2700_v12  ;;  %2952 = vset.pattern.permute.xlu1 %v2700_v12  ;;  %v2802_v12 = vld [vmem:[%s6697_s11 + $0x90] sm:$0xff] }
 0x6f0   :  { %v2600_v20 = vpop.xlane.xlu0 %2599 }
 0x6f1   :  { %3149 = vtanh.f32 %v2600_v20 }
 0x6f7   :  { %v3150_v5 = vpop.eup %3149 }
 0x6f8   :  { %v2603_v31 = vpop.xlane.xlu0 %2602  ;;  %v2645_v30 = vperm.slane %v3150_v5, %v2644_v2  ;;  %v2798_v5 = vld [vmem:[%s6697_s11 + $0x70] sm:$0xff] }
 0x6f9   :  { %3151 = vtanh.f32 %v2603_v31  ;;  %2821 = vmatpush.msra.mxu0 %v2798_v5 }
 0x6ff   :  { %v3152_v49 = vpop.eup %3151 }
 0x700   :  { %v2606_v13 = vpop.xlane.xlu1 %2605  ;;  %v2646_v25 = vperm.slane %v3152_v49, %v2644_v2 }
 0x701   :  { %3153 = vtanh.f32 %v2606_v13 }
 0x702   :  { %v2654_v41 = vsel %vm2653_vm2, %v2646_v25, %v2645_v30  ;;  %v2795_v30 = vld [vmem:[%s6697_s11 + $0x58] sm:$0xff] }
 0x707   :  { %v3154_v27 = vpop.eup %3153 }
 0x708   :  { %v2609_v60 = vpop.xlane.xlu1 %2608  ;;  %v2647_v4 = vperm.slane %v3154_v27, %v2644_v2  ;;  %v2814_v27 = vld [vmem:[%s6697_s11 + $0xf0] sm:$0xff] }
 0x709   :  { %3155 = vtanh.f32 %v2609_v60  ;;  %2841 = vmatpush.msra.mxu1 %v2814_v27 }
 0x70a   :  { %v2656_v29 = vsel %vm2655_vm3, %v2647_v4, %v2654_v41  ;;  %v2812_v4 = vld [vmem:[%s6697_s11 + $0xe0] sm:$0xff] }
 0x70f   :  { %v3156_v3 = vpop.eup %3155 }
 0x710   :  { %v2612_v62 = vpop.xlane.xlu2 %2611  ;;  %v2648_v61 = vperm.slane %v3156_v3, %v2644_v2  ;;  %v2797_v3 = vld [vmem:[%s6697_s11 + $0x68] sm:$0xff] }
 0x711   :  { %3157 = vtanh.f32 %v2612_v62  ;;  %2822 = vmatpush.msra.mxu0 %v2797_v3 }
 0x712   :  { %v2658_v32 = vsel %vm2657_vm4, %v2648_v61, %v2656_v29  ;;  %v2811_v29 = vld [vmem:[%s6697_s11 + $0xd8] sm:$0xff] }
 0x717   :  { %v3158_v42 = vpop.eup %3157 }
 0x718   :  { %v2615_v43 = vpop.xlane.xlu2 %2614  ;;  %v2649_v23 = vperm.slane %v3158_v42, %v2644_v2  ;;  %v2813_v42 = vld [vmem:[%s6697_s11 + $0xe8] sm:$0xff] }
 0x719   :  { %3159 = vtanh.f32 %v2615_v43  ;;  %2842 = vmatpush.msra.mxu1 %v2813_v42 }
 0x71a   :  { %v2660_v58 = vsel %vm2659_vm5, %v2649_v23, %v2658_v32  ;;  %v2810_v32 = vld [vmem:[%s6697_s11 + $0xd0] sm:$0xff] }
 0x71b   :  { %2843 = vmatpush.msra.mxu1 %v2812_v4 }
 0x71d   :  { %2844 = vmatpush.msra.mxu1 %v2811_v29 }
 0x71f   :  { %v3160_v0 = vpop.eup %3159  ;;  %2845 = vmatpush.msra.mxu1 %v2810_v32 }
 0x720   :  { %v2618_v9 = vpop.xlane.xlu0 %2617  ;;  %v2650_v50 = vperm.slane %v3160_v0, %v2644_v2  ;;  %v2796_v0 = vld [vmem:[%s6697_s11 + $0x60] sm:$0xff] }
 0x721   :  { %3161 = vtanh.f32 %v2618_v9  ;;  %2823 = vmatpush.msra.mxu0 %v2796_v0 }
 0x722   :  { %v2662_v24 = vsel %vm2661_vm6, %v2650_v50, %v2660_v58  ;;  %v2809_v58 = vld [vmem:[%s6697_s11 + $0xc8] sm:$0xff] }
 0x723   :  { %2824 = vmatpush.msra.mxu0 %v2795_v30  ;;  %2846 = vmatpush.msra.mxu1 %v2809_v58 }
 0x727   :  { %v3162_v59 = vpop.eup %3161 }
 0x728   :  { %v2621_v55 = vpop.xlane.xlu1 %2620  ;;  %v2651_v19 = vperm.slane %v3162_v59, %v2644_v2 }
 0x729   :  { %3163 = vtanh.f32 %v2621_v55 }
 0x72a   :  { %v2664_v39 = vsel %vm2663_vm7, %v2651_v19, %v2662_v24  ;;  %v2794_v19 = vld [vmem:[%s6697_s11 + $0x50] sm:$0xff]  ;;  %v2808_v24 = vld [vmem:[%s6697_s11 + $0xc0] sm:$0xff] }
 0x72b   :  { %2825 = vmatpush.msra.mxu0 %v2794_v19  ;;  %2847 = vmatpush.msra.mxu1 %v2808_v24 }
 0x72f   :  { %v3164_v8 = vpop.eup %3163 }
 0x730   :  { %v2652_v56 = vperm.slane %v3164_v8, %v2644_v2  ;;  %v2793_v8 = vld [vmem:[%s6697_s11 + $0x48] sm:$0xff] }
 0x731   :  { %2826 = vmatpush.msra.mxu0 %v2793_v8 }
 0x732   :  { %v2666_v10 = vsel %vm2665_vm8, %v2652_v56, %v2664_v39  ;;  %v2792_v56 = vld [vmem:[%s6697_s11 + $0x40] sm:$0xff]  ;;  %v2791_v39 = vld [vmem:[%s6697_s11 + $0x38] sm:$0xff] }
 0x733   :  { %v2668_v22 = vsel %vm2634_vm9, %v2666_v10, -1e+30  ;;  %2827 = vmatpush.msra.mxu0 %v2792_v56  ;;  %v2807_v10 = vld [vmem:[%s6697_s11 + $0xb8] sm:$0xff] }
 0x734   :  { %v2670_v47 = vsel %vm2669_vm10, %v2668_v22, -inf  ;;  %2848 = vmatpush.msra.mxu1 %v2807_v10 }
 0x735   :  { %2671 = vmax.xlane.f32.xlu2 %v2670_v47  ;;  %2828 = vmatpush.msra.mxu0 %v2791_v39  ;;  %v2806_v47 = vld [vmem:[%s6697_s11 + $0xb0] sm:$0xff] }
 0x736   :  { %2849 = vmatpush.msra.mxu1 %v2806_v47 }
 0x7a8   :  { %v2672_v14 = vpop.xlane.xlu2 %2671 }
 0x7a9   :  { %v2673_v33 = vsub.f32 %v2668_v22, %v2672_v14  ;;  %v2790_v22 = vld [vmem:[%s6697_s11 + $0x30] sm:$0xff]  ;;  %v2789_v14 = vld [vmem:[%s6697_s11 + $0x28] sm:$0xff] }
 0x7aa   :  { %2829 = vmatpush.msra.mxu0 %v2790_v22 }
 0x7ab   :  { %v2674_v53 = vmul.f32 1.442695, %v2673_v33  ;;  %v2805_v33 = vld [vmem:[%s6697_s11 + $0xa8] sm:$0xff] }
 0x7ac   :  { %2830 = vmatpush.msra.mxu0 %v2789_v14  ;;  %2850 = vmatpush.msra.mxu1 %v2805_v33 }
 0x7ad   :  { %3165 = vpow2.f32 %v2674_v53  ;;  %v2788_v53 = vld [vmem:[%s6697_s11 + $0x20] sm:$0xff] }
 0x7ae   :  { %2831 = vmatpush.msra.mxu0 %v2788_v53 }
 0x7b3   :  { %v3166_v6 = vpop.eup %3165 }
 0x7b4   :  { %v2679_v28 = vmul.f32 %v3166_v6, %v2955_v40  ;;  %v2804_v40 = vld [vmem:[%s6697_s11 + $0xa0] sm:$0xff]  ;;  %v2787_v6 = vld [vmem:[%s6697_s11 + $0x18] sm:$0xff] }
 0x7b5   :  { %2851 = vmatpush.msra.mxu1 %v2804_v40  ;;  %2832 = vmatpush.msra.mxu0 %v2787_v6 }
 0x7b6   :  { %v2680_v54 = vsel %vm2669_vm10, %v2679_v28, 0.0 }
 0x7b7   :  { %2681 = vadd.xlane.f32.xlu0 %v2680_v54  ;;  %v2786_v54 = vld [vmem:[%s6697_s11 + $0x10] sm:$0xff] }
 0x7b8   :  { %2833 = vmatpush.msra.mxu0 %v2786_v54 }
 0x82a   :  { %v2682_v45 = vpop.xlane.xlu0 %2681 }
 0x82b   :  { %3167 = vrcp.f32 %v2682_v45  ;;  %v2694_v31 = vand.u32 2147483648, %v2682_v45  ;;  %v2692_v43 = vand.u32 2147483647, %v2682_v45  ;;  %vm2688_vm12 = vweird.f32 %v2682_v45 }
 0x82d   :  { %v2695_v49 = vor.u32 1.1754944e-38, %v2694_v31  ;;  %vm2693_vm14 = vcmp.eq.f32.partialorder %v2692_v43, 8.507059e+37  ;;  %v2800_v31 = vld [vmem:[%s6697_s11 + $0x80] sm:$0xff] }
 0x831   :  { %v3168_v20 = vpop.eup %3167 }
 0x832   :  { %v2684_v13 = vmul.f32 %v3168_v20, %v2682_v45  ;;  %vm2689_vm11 = vweird.f32 %v3168_v20  ;;  %v2785_v45 = vld [vmem:[%s6697_s11 + $0x8] sm:$0xff] }
 0x833   :  { %vm2690_vm13 = vmor %vm2688_vm12, %vm2689_vm11  ;;  %2834 = vmatpush.msra.mxu0 %v2785_v45 }
 0x834   :  { %v2685_v62 = vsub.f32 1.0, %v2684_v13  ;;  %v2801_v13 = vld [vmem:[%s6697_s11 + $0x88] sm:$0xff] }
 0x836   :  { %v2686_v60 = vmul.f32 %v3168_v20, %v2685_v62  ;;  %v2784_v62 = vld [vmem:[%s6697_s11] sm:$0xff] }
 0x837   :  { %2835 = vmatpush.msra.mxu0 %v2784_v62 }
 0x838   :  { %v2687_v9 = vadd.f32 %v3168_v20, %v2686_v60 }
 0x83a   :  { %v2691_v2 = vsel %vm2690_vm13, %v3168_v20, %v2687_v9 }
 0x83b   :  { %v2696_v25 = vsel %vm2693_vm14, %v2695_v49, %v2691_v2 }
 0x83c   :  { %v2697_v55 = vmul.f32 %v2696_v25, %v2679_v28  ;;  %v2803_v28 = vld [vmem:[%s6697_s11 + $0x98] sm:$0xff] }
 0x83d   :  { %2852 = vmatpush.msra.mxu1 %v2803_v28 }
 0x83e   :  { %v2712_v34 = vperm.slane %v2697_v55, 2  ;;  %v2705_v17 = vperm.slane %v2697_v55, 1  ;;  %v2698_v59 = vperm.slane %v2697_v55, 0  ;;  %v2719_v61 = vperm.slane %v2697_v55, 3 }
 0x83f   :  { %v2726_v23 = vperm.slane %v2697_v55, 4  ;;  %v2733_v41 = vperm.slane %v2697_v55, 5  ;;  %v2740_v50 = vperm.slane %v2697_v55, 6  ;;  %v2747_v7 = vperm.slane %v2697_v55, 7  ;;  %2853 = vmatpush.msra.mxu1 %v2802_v12 }
 0x840   :  { %2717 = vperm.xlu0 %2954, %v2712_v34   ;;  %2710 = vperm.xlu2 %2953, %v2705_v17  }
 0x841   :  { %2703 = vperm.xlu1 %2952, %v2698_v59   ;;  %2854 = vmatpush.msra.mxu1 %v2801_v13 }
 0x843   :  { %2855 = vmatpush.msra.mxu1 %v2800_v31 }
 0x848   :  { %2724 = vperm.xlu2 %2953, %v2719_v61  }
 0x849   :  { %2731 = vperm.xlu1 %2952, %v2726_v23  }
 0x850   :  { %2738 = vperm.xlu2 %2953, %v2733_v41  }
 0x851   :  { %2745 = vperm.xlu1 %2952, %v2740_v50  }
 0x858   :  { %2752 = vperm.xlu2 %2953, %v2747_v7  }
 0x89a   :  { %v2711_v20 = vpop.permute.xlu2 %2710 }
 0x89b   :  { %v2756_v9 = vmul.f32 %v2711_v20, %v7412_v44  ;;  %v2757_v15 = vmul.f32 %v2711_v20, %v6359_v1 }
 0x8a2   :  { %v2725_v60 = vpop.permute.xlu2 %2724 }
 0x8a3   :  { %v2760_v34 = vmul.f32 %v2725_v60, %v7415_v18  ;;  %v2761_v44 = vmul.f32 %v2725_v60, %v5999_v16 }
 0x8aa   :  { %v2739_v25 = vpop.permute.xlu2 %2738 }
 0x8b2   :  { %v2718_v49 = vpop.permute.xlu0 %2717  ;;  %v2753_v61 = vpop.permute.xlu2 %2752 }
 0x8b3   :  { %v2704_v43 = vpop.permute.xlu1 %2703  ;;  %v2758_v3 = vmul.f32 %v2718_v49, %v7413_v46  ;;  %v2759_v42 = vmul.f32 %v2718_v49, %v6200_v52  ;;  %v2764_v46 = vmul.f32 %v2739_v25, %v6141_v51  ;;  %v2765_v52 = vmul.f32 %v2739_v25, %v7422_v36  ;;  %v2956_v51 = vld [vmem:[%s6698_s12] ss:$0 sm:$0xff] }
 0x8b4   :  { %v2754_v26 = vmul.f32 %v2704_v43, %v7411_v57  ;;  %v2755_v5 = vmul.f32 %v2704_v43, %v6492_v35 }
 0x8b6   :  { %v2770_v27 = vadd.f32 %v2756_v9, %v2754_v26  ;;  %v2777_v2 = vadd.f32 %v2757_v15, %v2755_v5 }
 0x8b8   :  { %v2771_v55 = vadd.f32 %v2770_v27, %v2758_v3  ;;  %v2778_v0 = vadd.f32 %v2777_v2, %v2759_v42 }
 0x8ba   :  { %v2772_v35 = vadd.f32 %v2771_v55, %v2760_v34  ;;  %v2779_v17 = vadd.f32 %v2778_v0, %v2761_v44 }
 0x8bb   :  { %v2732_v4 = vpop.permute.xlu1 %2731 }
 0x8bc   :  { %v2762_v1 = vmul.f32 %v2732_v4, %v5679_v38  ;;  %v2763_v57 = vmul.f32 %v2732_v4, %v5456_v37  ;;  %v2768_v38 = vmul.f32 %v2753_v61, %v6436_v21  ;;  %v2769_v37 = vmul.f32 %v2753_v61, %v7424_v11 }
 0x8be   :  { %v2773_v59 = vadd.f32 %v2772_v35, %v2762_v1  ;;  %v2780_v30 = vadd.f32 %v2779_v17, %v2763_v57 }
 0x8c0   :  { %v2774_v41 = vadd.f32 %v2773_v59, %v2764_v46  ;;  %v2781_v50 = vadd.f32 %v2780_v30, %v2765_v52 }
 0x8c3   :  { %v2746_v23 = vpop.permute.xlu1 %2745 }
 0x8c4   :  { %v2766_v18 = vmul.f32 %v2746_v23, %v6283_v48  ;;  %v2767_v16 = vmul.f32 %v2746_v23, %v7423_v63 }
 0x8c6   :  { %v2775_v7 = vadd.f32 %v2774_v41, %v2766_v18  ;;  %v2782_v29 = vadd.f32 %v2781_v50, %v2767_v16 }
 0x8c8   :  { %v2776_v19 = vadd.f32 %v2775_v7, %v2768_v38  ;;  %v2783_v32 = vadd.f32 %v2782_v29, %v2769_v37 }
 0x8ca   :  { %2836 = vmatmul.f32.vlgmr.msra.gmra.mxu0 %v2776_v19  ;;  %2856 = vmatmul.f32.vlgmr.msra.gmra.mxu1 %v2783_v32 }
 0x947   :  { %v2837_v36 = vpop.f32.mrf.mxu0  ;;  %v2857_v58 = vpop.f32.mrf.mxu1 }
 0x948   :  { %v2838_v8 = vadd.f32 %v2956_v51, %v2837_v36 }
 0x94a   :  { %v2858_v48 = vadd.f32 %v2857_v58, %v2838_v8 }
 0x94c   :  { %2860 = vst [vmem:[%s6699_s14] sm:$0xff] %v2858_v48 }

</bundles_post_ra>
